<compile_context>
chip_gen: v7x
topology: tpu7x:2x2x1
jax: 0.10.0
libtpu: 0.0.40
codegen_flags: <defaults>
</compile_context>

<pallas_src>
import jax
import jax.numpy as jnp
from jax import lax
from jax.experimental import pallas as pl
from jax.experimental.pallas import tpu as pltpu

HIDDEN = 576
NUM_HEADS = 9
NUM_KV_HEADS = 3
GROUPS = NUM_HEADS // NUM_KV_HEADS            # 3
HEAD_DIM = HIDDEN // NUM_HEADS                # 64
REDUCED = HIDDEN * NUM_KV_HEADS // NUM_HEADS  # 192
SCALING = HEAD_DIM ** -0.5                    # 0.125 (exact power of two)


def _llama_attn_kernel(x_full_ref, x_q_ref, mask_ref,
                       wq_ref, wkv_ref, wo_ref, out_ref):
    """One grid step = (one batch element, one query tile)."""
    cdt = x_q_ref.dtype                    # compute dtype for MXU operands
    x_full = x_full_ref[0]                 # (S, H)   — source of K/V
    x_q = x_q_ref[0]                       # (TQ, H)  — source of Q
    S = x_full.shape[0]
    TQ = x_q.shape[0]

    # Head-concatenated projections. Operands are in cdt (bf16 on the bf16
    # path), accumulation is f32 on the MXU; results are cast back to cdt so
    # the attention matmuls below also run in cdt.
    q = jnp.dot(x_q, wq_ref[...],
                preferred_element_type=jnp.float32).astype(cdt)     # (TQ, 576), pre-scaled
    kv = jnp.dot(x_full, wkv_ref[...],
                 preferred_element_type=jnp.float32).astype(cdt)    # (S, 384)
    k = kv[:, :REDUCED]                                             # (S, 192)
    v = kv[:, REDUCED:]                                             # (S, 192)

    # Additive mask, broadcast ONCE (the group loop below is unrolled and JAX
    # does not CSE broadcast_in_dim).
    mask_b = jnp.broadcast_to(mask_ref[0], (GROUPS * TQ, S)).astype(jnp.float32)

    attn_heads = []                        # per-head (TQ, 64) tiles, head order
    for g in range(NUM_KV_HEADS):
        k_g = k[:, g * HEAD_DIM:(g + 1) * HEAD_DIM]                 # (S, 64)
        v_g = v[:, g * HEAD_DIM:(g + 1) * HEAD_DIM]                 # (S, 64)
        # The 3 query heads sharing this KV head, stacked along sublanes so
        # scores / softmax / P·V run once per group.
        q_g = jnp.concatenate(
            [q[:, (g * GROUPS + i) * HEAD_DIM:(g * GROUPS + i + 1) * HEAD_DIM]
             for i in range(GROUPS)],
            axis=0)                                                 # (3*TQ, 64)

        # Contract head_dim of both operands directly (no k.T materialization).
        scores = lax.dot_general(
            q_g, k_g,
            dimension_numbers=(((1,), (1,)), ((), ())),
            preferred_element_type=jnp.float32)                     # (3*TQ, S)
        scores = scores + mask_b

        # Numerically stable softmax in f32. Normalization: EUP approximate
        # reciprocal + one Newton-Raphson step (rel err ~1e-5, still no VALU
        # divide over the wide tile).
        scores = scores - jnp.max(scores, axis=-1, keepdims=True)
        p = jnp.exp(scores)
        s = jnp.sum(p, axis=-1, keepdims=True)
        r = pl.reciprocal(s, approx=True)
        r = r * (2.0 - s * r)
        p = (p * r).astype(cdt)

        attn_g = jnp.dot(p, v_g, preferred_element_type=jnp.float32)  # (3*TQ, 64)
        for i in range(GROUPS):
            attn_heads.append(attn_g[i * TQ:(i + 1) * TQ, :])

    # Single lane-dense o_proj: (TQ, 576) @ (576, 576), K=576 MXU depth,
    # f32 accumulation on the MXU — replaces 9 K=64 matmuls + 9 RMW sweeps.
    attn_all = jnp.concatenate(attn_heads, axis=-1).astype(cdt)     # (TQ, 576)
    out = jnp.dot(attn_all, wo_ref[...], preferred_element_type=jnp.float32)
    out_ref[0] = out.astype(out_ref.dtype)


def _choose_tq(S: int) -> int:
    """Query tile: 256 when it divides S cleanly, else the whole sequence."""
    TQ = 256
    if S > TQ and S % TQ == 0:
        return TQ
    return S


def llama_attention_pallas(x, mask, wq_t, wk_t, wv_t, wo_t, *, compute_dtype=None):
    """x: (B,S,H); mask: (B,1,S) additive; w*_t are W.T ("x @ W" layout).

    compute_dtype: optional dtype (e.g. jnp.bfloat16) — casts x and weights at
    the kernel boundary so every MXU matmul runs with narrow operands while
    softmax / accumulation stay f32. Output dtype follows the compute dtype.
    """
    if compute_dtype is not None:
        x = x.astype(compute_dtype)
        wq_t = wq_t.astype(compute_dtype)
        wk_t = wk_t.astype(compute_dtype)
        wv_t = wv_t.astype(compute_dtype)
        wo_t = wo_t.astype(compute_dtype)

    B, S, H = x.shape
    assert H == HIDDEN
    TQ = _choose_tq(S)
    NQ = S // TQ

    # Fold SCALING into Wq^T (0.125 is an exact power of two: no extra
    # rounding) and fuse the K/V projection weights into one (576, 384) slab.
    wq_scaled = (wq_t * SCALING).astype(wq_t.dtype)
    wkv = jnp.concatenate([wk_t, wv_t], axis=-1)          # (H, 2*REDUCED)
    mask = mask.astype(jnp.float32)

    return pl.pallas_call(
        _llama_attn_kernel,
        out_shape=jax.ShapeDtypeStruct((B, S, H), x.dtype),
        grid_spec=pltpu.PrefetchScalarGridSpec(
            num_scalar_prefetch=0,
            grid=(B, NQ),
            in_specs=[
                pl.BlockSpec((1, S, H), lambda b, qi: (b, 0, 0)),       # x (full, for K/V)
                pl.BlockSpec((1, TQ, H), lambda b, qi: (b, qi, 0)),     # x (query tile)
                pl.BlockSpec((1, 1, S), lambda b, qi: (b, 0, 0)),       # additive mask
                pl.BlockSpec((H, H), lambda b, qi: (0, 0)),             # Wq^T * scaling (resident)
                pl.BlockSpec((H, 2 * REDUCED), lambda b, qi: (0, 0)),   # [Wk^T | Wv^T] (resident)
                pl.BlockSpec((H, H), lambda b, qi: (0, 0)),             # Wo^T (resident)
            ],
            out_specs=pl.BlockSpec((1, TQ, H), lambda b, qi: (b, qi, 0)),
        ),
        compiler_params=pltpu.CompilerParams(
            # Both axes independent -> shard across TensorCores (v7x megacore),
            # and the query-tile axis keeps both cores busy even at B=1.
            dimension_semantics=("parallel", "parallel"),
            vmem_limit_bytes=64 * 1024 * 1024),
    )(x, x, mask, wq_scaled, wkv, wo_t)


def llama_attention_ref(x, mask, Wq, Wk, Wv, Wo):
    """Pure-JAX reference matching the PyTorch forward exactly."""
    B, S, H = x.shape
    q = x @ Wq.T
    k = x @ Wk.T
    v = x @ Wv.T
    q = q.reshape(B, S, NUM_HEADS, HEAD_DIM).transpose(0, 2, 1, 3)
    k = k.reshape(B, S, NUM_KV_HEADS, HEAD_DIM).transpose(0, 2, 1, 3)
    v = v.reshape(B, S, NUM_KV_HEADS, HEAD_DIM).transpose(0, 2, 1, 3)
    k = jnp.repeat(k, GROUPS, axis=1)
    v = jnp.repeat(v, GROUPS, axis=1)
    w = jnp.einsum('bhqd,bhkd->bhqk', q, k) * SCALING
    w = w + mask.reshape(B, 1, 1, S)
    w = jax.nn.softmax(w, axis=-1)
    o = jnp.einsum('bhqk,bhkd->bhqd', w, v)
    o = o.transpose(0, 2, 1, 3).reshape(B, S, H)
    return o @ Wo.T


if __name__ == "__main__":
    B, S = 2, 8
    key = jax.random.PRNGKey(0)
    kx, km, kq, kk, kv, ko = jax.random.split(key, 6)

    x = jax.random.normal(kx, (B, S, HIDDEN), jnp.float32)
    # Additive attention mask (as in the PyTorch forward: viewed (B,1,1,S)).
    mask = -5.0 * jax.random.bernoulli(km, 0.25, (B, 1, S)).astype(jnp.float32)

    # Parameters in PyTorch nn.Linear layout (out_features, in_features).
    Wq = 0.02 * jax.random.normal(kq, (HIDDEN, HIDDEN), jnp.float32)
    Wk = 0.02 * jax.random.normal(kk, (REDUCED, HIDDEN), jnp.float32)
    Wv = 0.02 * jax.random.normal(kv, (REDUCED, HIDDEN), jnp.float32)
    Wo = 0.02 * jax.random.normal(ko, (HIDDEN, HIDDEN), jnp.float32)

    # Glue: pre-transpose to "x @ W" layout (columns stay head-ordered).
    wq_t, wk_t, wv_t, wo_t = Wq.T, Wk.T, Wv.T, Wo.T

    ref = llama_attention_ref(x, mask, Wq, Wk, Wv, Wo)

    # f32 path (same dtype as the PyTorch module). The NR-refined EUP
    # reciprocal keeps the error at f32-rounding level (<< 1e-3).
    out = jax.block_until_ready(
        llama_attention_pallas(x, mask, wq_t, wk_t, wv_t, wo_t))
    assert out.shape == (B, S, HIDDEN)
    err = jnp.max(jnp.abs(out - ref))
    assert jnp.allclose(out, ref, atol=1e-3, rtol=1e-3), f"f32 max abs err {err}"

    # bf16 MXU path: all matmul operands (x, weights, q/k/v, softmax probs)
    # are bf16; softmax math and MXU accumulation stay f32; output is bf16.
    out_bf16 = jax.block_until_ready(
        llama_attention_pallas(x, mask, wq_t, wk_t, wv_t, wo_t,
                               compute_dtype=jnp.bfloat16))
    assert out_bf16.dtype == jnp.bfloat16
    err_bf16 = jnp.max(jnp.abs(out_bf16.astype(jnp.float32) - ref))
    assert jnp.allclose(out_bf16.astype(jnp.float32), ref, atol=5e-2, rtol=5e-2), \
        f"bf16 max abs err {err_bf16}"

    print("KERNEL_OK")
</pallas_src>

<mosaic_0001>
module attributes {stable_mosaic.version = 11 : i64} {
  func.func @_llama_attn_kernel(%arg0: i32, %arg1: i32, %arg2: memref<1x8x576xf32, #tpu.memory_space<vmem>>, %arg3: memref<1x8x576xf32, #tpu.memory_space<vmem>>, %arg4: memref<1x1x8xf32, #tpu.memory_space<vmem>>, %arg5: memref<576x576xf32, #tpu.memory_space<vmem>>, %arg6: memref<576x384xf32, #tpu.memory_space<vmem>>, %arg7: memref<576x576xf32, #tpu.memory_space<vmem>>, %arg8: memref<1x8x576xf32, #tpu.memory_space<vmem>>) attributes {dimension_semantics = [#tpu.dimension_semantics<parallel>, #tpu.dimension_semantics<parallel>], iteration_bounds = array<i64: 2, 1>, scalar_prefetch = 0 : i64, scratch_operands = 0 : i64, tpu.core_type = #tpu.core_type<tc>, window_params = [{transform_indices = @transform_0, window_bounds = array<i64: 1, 8, 576>}, {transform_indices = @transform_1, window_bounds = array<i64: 1, 8, 576>}, {transform_indices = @transform_2, window_bounds = array<i64: 1, 1, 8>}, {pipeline_mode = #tpu.pipeline_mode<synchronous>, transform_indices = @transform_3, window_bounds = array<i64: 576, 576>}, {pipeline_mode = #tpu.pipeline_mode<synchronous>, transform_indices = @transform_4, window_bounds = array<i64: 576, 384>}, {pipeline_mode = #tpu.pipeline_mode<synchronous>, transform_indices = @transform_5, window_bounds = array<i64: 576, 576>}, {transform_indices = @transform_6, window_bounds = array<i64: 1, 8, 576>}]} {
    %c0 = arith.constant 0 : index
    %c0_0 = arith.constant 0 : index
    %c0_1 = arith.constant 0 : index
    %0 = vector.load %arg2[%c0, %c0_0, %c0_1] : memref<1x8x576xf32, #tpu.memory_space<vmem>>, vector<1x8x576xf32>
    %1 = vector.shape_cast %0 : vector<1x8x576xf32> to vector<8x576xf32>
    %c0_2 = arith.constant 0 : index
    %c0_3 = arith.constant 0 : index
    %c0_4 = arith.constant 0 : index
    %2 = vector.load %arg3[%c0_2, %c0_3, %c0_4] : memref<1x8x576xf32, #tpu.memory_space<vmem>>, vector<1x8x576xf32>
    %3 = vector.shape_cast %2 : vector<1x8x576xf32> to vector<8x576xf32>
    %c0_5 = arith.constant 0 : index
    %c0_6 = arith.constant 0 : index
    %4 = vector.load %arg5[%c0_5, %c0_6] : memref<576x576xf32, #tpu.memory_space<vmem>>, vector<576x576xf32>
    %cst = arith.constant dense<0.000000e+00> : vector<8x576xf32>
    %5 = tpu.matmul %3, %4, %cst {dimension_numbers = #tpu.dot_dimension_numbers<[1], [0], [0], [1], [0, 0, 1, 1], [], []>} : vector<8x576xf32>, vector<576x576xf32>, vector<8x576xf32> -> vector<8x576xf32>
    %c0_7 = arith.constant 0 : index
    %c0_8 = arith.constant 0 : index
    %6 = vector.load %arg6[%c0_7, %c0_8] : memref<576x384xf32, #tpu.memory_space<vmem>>, vector<576x384xf32>
    %cst_9 = arith.constant dense<0.000000e+00> : vector<8x384xf32>
    %7 = tpu.matmul %1, %6, %cst_9 {dimension_numbers = #tpu.dot_dimension_numbers<[1], [0], [0], [1], [0, 0, 1, 1], [], []>} : vector<8x576xf32>, vector<576x384xf32>, vector<8x384xf32> -> vector<8x384xf32>
    %8 = vector.extract_strided_slice %7 {offsets = [0, 0], sizes = [8, 192], strides = [1, 1]} : vector<8x384xf32> to vector<8x192xf32>
    %9 = vector.extract_strided_slice %7 {offsets = [0, 192], sizes = [8, 192], strides = [1, 1]} : vector<8x384xf32> to vector<8x192xf32>
    %c0_10 = arith.constant 0 : index
    %c0_11 = arith.constant 0 : index
    %c0_12 = arith.constant 0 : index
    %10 = vector.load %arg4[%c0_10, %c0_11, %c0_12] : memref<1x1x8xf32, #tpu.memory_space<vmem>>, vector<1x1x8xf32>
    %11 = vector.shape_cast %10 : vector<1x1x8xf32> to vector<1x8xf32>
    %12 = vector.shape_cast %11 : vector<1x8xf32> to vector<1x8xf32>
    %13 = vector.broadcast %12 : vector<1x8xf32> to vector<24x8xf32>
    %14 = vector.extract_strided_slice %8 {offsets = [0, 0], sizes = [8, 64], strides = [1, 1]} : vector<8x192xf32> to vector<8x64xf32>
    %15 = vector.extract_strided_slice %9 {offsets = [0, 0], sizes = [8, 64], strides = [1, 1]} : vector<8x192xf32> to vector<8x64xf32>
    %16 = vector.extract_strided_slice %5 {offsets = [0, 0], sizes = [8, 64], strides = [1, 1]} : vector<8x576xf32> to vector<8x64xf32>
    %17 = vector.extract_strided_slice %5 {offsets = [0, 64], sizes = [8, 64], strides = [1, 1]} : vector<8x576xf32> to vector<8x64xf32>
    %18 = vector.extract_strided_slice %5 {offsets = [0, 128], sizes = [8, 64], strides = [1, 1]} : vector<8x576xf32> to vector<8x64xf32>
    %19 = tpu.concatenate %16, %17, %18 in 0 : vector<8x64xf32>, vector<8x64xf32>, vector<8x64xf32> -> vector<24x64xf32>
    %cst_13 = arith.constant dense<0.000000e+00> : vector<24x8xf32>
    %20 = tpu.matmul %19, %14, %cst_13 {dimension_numbers = #tpu.dot_dimension_numbers<[1], [1], [0], [0], [0, 0, 1, 0], [], []>} : vector<24x64xf32>, vector<8x64xf32>, vector<24x8xf32> -> vector<24x8xf32>
    %21 = arith.addf %20, %13 : vector<24x8xf32>
    %cst_14 = arith.constant dense<0xFF800000> : vector<24xf32>
    %22 = vector.multi_reduction <maximumf>, %21, %cst_14 [1] : vector<24x8xf32> to vector<24xf32>
    %23 = vector.shape_cast %22 : vector<24xf32> to vector<24x1xf32>
    %24 = vector.broadcast %23 : vector<24x1xf32> to vector<24x8xf32>
    %25 = arith.subf %21, %24 : vector<24x8xf32>
    %26 = math.exp %25 : vector<24x8xf32>
    %cst_15 = arith.constant dense<0.000000e+00> : vector<24xf32>
    %27 = vector.multi_reduction <add>, %26, %cst_15 [1] : vector<24x8xf32> to vector<24xf32>
    %28 = vector.shape_cast %27 : vector<24xf32> to vector<24x1xf32>
    %29 = tpu.reciprocal %28 {approx = true} : vector<24x1xf32> -> vector<24x1xf32>
    %30 = arith.mulf %28, %29 : vector<24x1xf32>
    %cst_16 = arith.constant 2.000000e+00 : f32
    %31 = vector.broadcast %cst_16 : f32 to vector<24x1xf32>
    %32 = arith.subf %31, %30 : vector<24x1xf32>
    %33 = arith.mulf %29, %32 : vector<24x1xf32>
    %34 = vector.broadcast %33 : vector<24x1xf32> to vector<24x8xf32>
    %35 = arith.mulf %26, %34 : vector<24x8xf32>
    %cst_17 = arith.constant dense<0.000000e+00> : vector<24x64xf32>
    %36 = tpu.matmul %35, %15, %cst_17 {dimension_numbers = #tpu.dot_dimension_numbers<[1], [0], [0], [1], [0, 0, 1, 1], [], []>} : vector<24x8xf32>, vector<8x64xf32>, vector<24x64xf32> -> vector<24x64xf32>
    %37 = vector.extract_strided_slice %36 {offsets = [0, 0], sizes = [8, 64], strides = [1, 1]} : vector<24x64xf32> to vector<8x64xf32>
    %38 = vector.extract_strided_slice %36 {offsets = [8, 0], sizes = [8, 64], strides = [1, 1]} : vector<24x64xf32> to vector<8x64xf32>
    %39 = vector.extract_strided_slice %36 {offsets = [16, 0], sizes = [8, 64], strides = [1, 1]} : vector<24x64xf32> to vector<8x64xf32>
    %40 = vector.extract_strided_slice %8 {offsets = [0, 64], sizes = [8, 64], strides = [1, 1]} : vector<8x192xf32> to vector<8x64xf32>
    %41 = vector.extract_strided_slice %9 {offsets = [0, 64], sizes = [8, 64], strides = [1, 1]} : vector<8x192xf32> to vector<8x64xf32>
    %42 = vector.extract_strided_slice %5 {offsets = [0, 192], sizes = [8, 64], strides = [1, 1]} : vector<8x576xf32> to vector<8x64xf32>
    %43 = vector.extract_strided_slice %5 {offsets = [0, 256], sizes = [8, 64], strides = [1, 1]} : vector<8x576xf32> to vector<8x64xf32>
    %44 = vector.extract_strided_slice %5 {offsets = [0, 320], sizes = [8, 64], strides = [1, 1]} : vector<8x576xf32> to vector<8x64xf32>
    %45 = tpu.concatenate %42, %43, %44 in 0 : vector<8x64xf32>, vector<8x64xf32>, vector<8x64xf32> -> vector<24x64xf32>
    %cst_18 = arith.constant dense<0.000000e+00> : vector<24x8xf32>
    %46 = tpu.matmul %45, %40, %cst_18 {dimension_numbers = #tpu.dot_dimension_numbers<[1], [1], [0], [0], [0, 0, 1, 0], [], []>} : vector<24x64xf32>, vector<8x64xf32>, vector<24x8xf32> -> vector<24x8xf32>
    %47 = arith.addf %46, %13 : vector<24x8xf32>
    %cst_19 = arith.constant dense<0xFF800000> : vector<24xf32>
    %48 = vector.multi_reduction <maximumf>, %47, %cst_19 [1] : vector<24x8xf32> to vector<24xf32>
    %49 = vector.shape_cast %48 : vector<24xf32> to vector<24x1xf32>
    %50 = vector.broadcast %49 : vector<24x1xf32> to vector<24x8xf32>
    %51 = arith.subf %47, %50 : vector<24x8xf32>
    %52 = math.exp %51 : vector<24x8xf32>
    %cst_20 = arith.constant dense<0.000000e+00> : vector<24xf32>
    %53 = vector.multi_reduction <add>, %52, %cst_20 [1] : vector<24x8xf32> to vector<24xf32>
    %54 = vector.shape_cast %53 : vector<24xf32> to vector<24x1xf32>
    %55 = tpu.reciprocal %54 {approx = true} : vector<24x1xf32> -> vector<24x1xf32>
    %56 = arith.mulf %54, %55 : vector<24x1xf32>
    %cst_21 = arith.constant 2.000000e+00 : f32
    %57 = vector.broadcast %cst_21 : f32 to vector<24x1xf32>
    %58 = arith.subf %57, %56 : vector<24x1xf32>
    %59 = arith.mulf %55, %58 : vector<24x1xf32>
    %60 = vector.broadcast %59 : vector<24x1xf32> to vector<24x8xf32>
    %61 = arith.mulf %52, %60 : vector<24x8xf32>
    %cst_22 = arith.constant dense<0.000000e+00> : vector<24x64xf32>
    %62 = tpu.matmul %61, %41, %cst_22 {dimension_numbers = #tpu.dot_dimension_numbers<[1], [0], [0], [1], [0, 0, 1, 1], [], []>} : vector<24x8xf32>, vector<8x64xf32>, vector<24x64xf32> -> vector<24x64xf32>
    %63 = vector.extract_strided_slice %62 {offsets = [0, 0], sizes = [8, 64], strides = [1, 1]} : vector<24x64xf32> to vector<8x64xf32>
    %64 = vector.extract_strided_slice %62 {offsets = [8, 0], sizes = [8, 64], strides = [1, 1]} : vector<24x64xf32> to vector<8x64xf32>
    %65 = vector.extract_strided_slice %62 {offsets = [16, 0], sizes = [8, 64], strides = [1, 1]} : vector<24x64xf32> to vector<8x64xf32>
    %66 = vector.extract_strided_slice %8 {offsets = [0, 128], sizes = [8, 64], strides = [1, 1]} : vector<8x192xf32> to vector<8x64xf32>
    %67 = vector.extract_strided_slice %9 {offsets = [0, 128], sizes = [8, 64], strides = [1, 1]} : vector<8x192xf32> to vector<8x64xf32>
    %68 = vector.extract_strided_slice %5 {offsets = [0, 384], sizes = [8, 64], strides = [1, 1]} : vector<8x576xf32> to vector<8x64xf32>
    %69 = vector.extract_strided_slice %5 {offsets = [0, 448], sizes = [8, 64], strides = [1, 1]} : vector<8x576xf32> to vector<8x64xf32>
    %70 = vector.extract_strided_slice %5 {offsets = [0, 512], sizes = [8, 64], strides = [1, 1]} : vector<8x576xf32> to vector<8x64xf32>
    %71 = tpu.concatenate %68, %69, %70 in 0 : vector<8x64xf32>, vector<8x64xf32>, vector<8x64xf32> -> vector<24x64xf32>
    %cst_23 = arith.constant dense<0.000000e+00> : vector<24x8xf32>
    %72 = tpu.matmul %71, %66, %cst_23 {dimension_numbers = #tpu.dot_dimension_numbers<[1], [1], [0], [0], [0, 0, 1, 0], [], []>} : vector<24x64xf32>, vector<8x64xf32>, vector<24x8xf32> -> vector<24x8xf32>
    %73 = arith.addf %72, %13 : vector<24x8xf32>
    %cst_24 = arith.constant dense<0xFF800000> : vector<24xf32>
    %74 = vector.multi_reduction <maximumf>, %73, %cst_24 [1] : vector<24x8xf32> to vector<24xf32>
    %75 = vector.shape_cast %74 : vector<24xf32> to vector<24x1xf32>
    %76 = vector.broadcast %75 : vector<24x1xf32> to vector<24x8xf32>
    %77 = arith.subf %73, %76 : vector<24x8xf32>
    %78 = math.exp %77 : vector<24x8xf32>
    %cst_25 = arith.constant dense<0.000000e+00> : vector<24xf32>
    %79 = vector.multi_reduction <add>, %78, %cst_25 [1] : vector<24x8xf32> to vector<24xf32>
    %80 = vector.shape_cast %79 : vector<24xf32> to vector<24x1xf32>
    %81 = tpu.reciprocal %80 {approx = true} : vector<24x1xf32> -> vector<24x1xf32>
    %82 = arith.mulf %80, %81 : vector<24x1xf32>
    %cst_26 = arith.constant 2.000000e+00 : f32
    %83 = vector.broadcast %cst_26 : f32 to vector<24x1xf32>
    %84 = arith.subf %83, %82 : vector<24x1xf32>
    %85 = arith.mulf %81, %84 : vector<24x1xf32>
    %86 = vector.broadcast %85 : vector<24x1xf32> to vector<24x8xf32>
    %87 = arith.mulf %78, %86 : vector<24x8xf32>
    %cst_27 = arith.constant dense<0.000000e+00> : vector<24x64xf32>
    %88 = tpu.matmul %87, %67, %cst_27 {dimension_numbers = #tpu.dot_dimension_numbers<[1], [0], [0], [1], [0, 0, 1, 1], [], []>} : vector<24x8xf32>, vector<8x64xf32>, vector<24x64xf32> -> vector<24x64xf32>
    %89 = vector.extract_strided_slice %88 {offsets = [0, 0], sizes = [8, 64], strides = [1, 1]} : vector<24x64xf32> to vector<8x64xf32>
    %90 = vector.extract_strided_slice %88 {offsets = [8, 0], sizes = [8, 64], strides = [1, 1]} : vector<24x64xf32> to vector<8x64xf32>
    %91 = vector.extract_strided_slice %88 {offsets = [16, 0], sizes = [8, 64], strides = [1, 1]} : vector<24x64xf32> to vector<8x64xf32>
    %92 = tpu.concatenate %37, %38, %39, %63, %64, %65, %89, %90, %91 in 1 : vector<8x64xf32>, vector<8x64xf32>, vector<8x64xf32>, vector<8x64xf32>, vector<8x64xf32>, vector<8x64xf32>, vector<8x64xf32>, vector<8x64xf32>, vector<8x64xf32> -> vector<8x576xf32>
    %c0_28 = arith.constant 0 : index
    %c0_29 = arith.constant 0 : index
    %93 = vector.load %arg7[%c0_28, %c0_29] : memref<576x576xf32, #tpu.memory_space<vmem>>, vector<576x576xf32>
    %cst_30 = arith.constant dense<0.000000e+00> : vector<8x576xf32>
    %94 = tpu.matmul %92, %93, %cst_30 {dimension_numbers = #tpu.dot_dimension_numbers<[1], [0], [0], [1], [0, 0, 1, 1], [], []>} : vector<8x576xf32>, vector<576x576xf32>, vector<8x576xf32> -> vector<8x576xf32>
    %c0_31 = arith.constant 0 : index
    %c0_32 = arith.constant 0 : index
    %c0_33 = arith.constant 0 : index
    %95 = vector.load %arg8[%c0_31, %c0_32, %c0_33] : memref<1x8x576xf32, #tpu.memory_space<vmem>>, vector<1x8x576xf32>
    %96 = vector.shape_cast %95 : vector<1x8x576xf32> to vector<8x576xf32>
    %97 = vector.shape_cast %94 : vector<8x576xf32> to vector<1x8x576xf32>
    tpu.vector_store %arg8[%c0_31, %c0_32, %c0_33], %97 {strides = array<i32>} : memref<1x8x576xf32, #tpu.memory_space<vmem>>, vector<1x8x576xf32>,
    return
  }
  func.func @transform_0(%arg0: i32, %arg1: i32) -> (i32, i32, i32) {
    %c0_i32 = arith.constant 0 : i32
    %c0_i32_0 = arith.constant 0 : i32
    %c0_i32_1 = arith.constant 0 : i32
    return %arg0, %c0_i32, %c0_i32_0 : i32, i32, i32
  }
  func.func @transform_1(%arg0: i32, %arg1: i32) -> (i32, i32, i32) {
    %c0_i32 = arith.constant 0 : i32
    %c0_i32_0 = arith.constant 0 : i32
    return %arg0, %arg1, %c0_i32 : i32, i32, i32
  }
  func.func @transform_2(%arg0: i32, %arg1: i32) -> (i32, i32, i32) {
    %c0_i32 = arith.constant 0 : i32
    %c0_i32_0 = arith.constant 0 : i32
    %c0_i32_1 = arith.constant 0 : i32
    return %arg0, %c0_i32, %c0_i32_0 : i32, i32, i32
  }
  func.func @transform_3(%arg0: i32, %arg1: i32) -> (i32, i32) {
    %c0_i32 = arith.constant 0 : i32
    %c0_i32_0 = arith.constant 0 : i32
    %c0_i32_1 = arith.constant 0 : i32
    return %c0_i32, %c0_i32_0 : i32, i32
  }
  func.func @transform_4(%arg0: i32, %arg1: i32) -> (i32, i32) {
    %c0_i32 = arith.constant 0 : i32
    %c0_i32_0 = arith.constant 0 : i32
    %c0_i32_1 = arith.constant 0 : i32
    return %c0_i32, %c0_i32_0 : i32, i32
  }
  func.func @transform_5(%arg0: i32, %arg1: i32) -> (i32, i32) {
    %c0_i32 = arith.constant 0 : i32
    %c0_i32_0 = arith.constant 0 : i32
    %c0_i32_1 = arith.constant 0 : i32
    return %c0_i32, %c0_i32_0 : i32, i32
  }
  func.func @transform_6(%arg0: i32, %arg1: i32) -> (i32, i32, i32) {
    %c0_i32 = arith.constant 0 : i32
    %c0_i32_0 = arith.constant 0 : i32
    return %arg0, %arg1, %c0_i32 : i32, i32, i32
  }
}

</mosaic_0001>

<bundles_post_ra>
// kernel: tpu_custom_call.1
= control target key start
LH: loop header
LB: loop body
LE: loop exit
PB: predicated region body
PF: predicated region fallthrough
CT: control target
= control target key end

     0   :  { %s6406_s0 = inlined_call_operand.hbm [shape: f32[2,8,576], index: 0, kind: input, shape index: {}]   ;;  %s6407_s1 = inlined_call_operand.hbm [shape: f32[2,8,576], index: 1, kind: input, shape index: {}]   ;;  %s6408_s2 = inlined_call_operand.hbm [shape: f32[2,1,8], index: 2, kind: input, shape index: {}]   ;;  %s6409_s3 = inlined_call_operand.hbm [shape: f32[576,576], index: 3, kind: input, shape index: {}]   ;;  %s6410_s4 = inlined_call_operand.hbm [shape: f32[576,384], index: 4, kind: input, shape index: {}]   ;;  %s6411_s5 = inlined_call_operand.hbm [shape: f32[576,576], index: 5, kind: input, shape index: {}]   ;;  %s6412_s6 = inlined_call_operand.hbm [shape: f32[2,8,576], index: 6, kind: output, shape index: {}]  }
   0x1   :  { %6436 = sst [smem:[#allocation25_spill]] %s6407_s1 }
   0x2   :  { %6437 = sst [smem:[#allocation26_spill]] %s6409_s3 }
   0x3   :  { %6438 = sst [smem:[#allocation27_spill]] %s6412_s6 }
   0x4   :  { %11 = vsyncpa [#allocation3], 0 }
   0x5   :  { %13 = vsyncpa [#allocation3 + $0x1], 0 }
   0x6   :  { %14 = vsyncpa [#allocation6], 0 }
   0x7   :  { %16 = vsyncpa [#allocation6 + $0x1], 0 }
   0x8   :  { %17 = vsyncpa [#allocation9], 0 }
   0x9   :  { %18 = vsyncpa [#allocation12], 0 }
   0xa   :  { %19 = vsyncpa [#allocation4], 0 }
   0xb   :  { %21 = vsyncpa [#allocation4 + $0x1], 0  ;;  %s5820_s21 = smov 0   ;;  %s5822_s22 = smov 0  }
   0xc   :  { %s5824_s23 = smov 0   ;;  %s5826_s24 = smov 0  }
   0xd   :  { %s5828_s25 = smov 0   ;;  %s5830_s26 = smov 0  }
   0xe LB: > { %6439 = sst [smem:[#allocation19_spill]] %s5748_s21  ;;  %s5851_s27 = sadd.s32 4294967295, %s5768_s26   ;;  %s5768_s26 = sphi %s5830_s26, %s27_s26   ;;  %s5764_s25 = sphi %s5828_s25, %s6485_s25   ;;  %s5760_s24 = sphi %s5826_s24, %s6484_s24   ;;  %s5756_s23 = sphi %s5824_s23, %s6480_s23   ;;  %s5752_s22 = sphi %s5822_s22, %s6483_s22   ;;  %s5748_s21 = sphi %s5820_s21, %s6482_s21  }
   0xf   : > { %6440 = sst [smem:[#allocation20_spill]] %s5756_s23  ;;  %s3937_s28 = sadd.s32 4294967294, %s5768_s26  }
  0x10   : > { %6441 = sst [smem:[#allocation21_spill]] %s5768_s26  ;;  %p59_p0 = scmp.ne.s32.totalorder %s5752_s22, %s5748_s21 }
  0x11   : > { %p6413_p1 = scmp.eq.s32.totalorder %s5851_s27, 0  ;;  %p208_p3 = scmp.eq.s32.totalorder %s3937_s28, 1 }
  0x12   : > { %p3938_p5 = scmp.ge.s32.totalorder %s5768_s26, 1  ;;  %p215_p7 = scmp.lt.s32.totalorder %s5768_s26, 3 }
  0x13   : > { %p5860_p4 = por %p6413_p1, %p59_p0  ;;  %p5865_p6 = por %p208_p3, %p59_p0 }
  0x14   : > { %p5870_p8 = pnand %p3938_p5, %p215_p7  ;;  %s5770_s8 = smov [#allocation8]  }
  0x15   : > { %s6442_s29 = scalar_select %p5860_p4, 1, 0 }
  0x16   : > { %s6443_s30 = scalar_select %p5865_p6, 1, 0 }
  0x17   : > { %s6445_s7 = scalar_select %p5870_p8, 1, 0 }
  0x18   : > { %6444 = sst [smem:[#allocation22_spill]] %s6443_s30  ;;  %s227_s9 = sshll.u32 %s5770_s8, 4  ;;  %s228_s9 = int_to_ptr.vmem [resolvable:$true] %s227_s9 }
  0x19   : > { %p5363_p9 = pneg %p5870_p8  ;;  %s39_s11 = sadd.s32 1, %s5764_s25 }
  0x1a   : > { %s6447_s3 = sld [smem:[#allocation26_spill]] }
  0x1b   : > { %p5879_p11 = pnand %p5363_p9, %p6413_p1 }
  0x1d   : > { %s6446_s10 = scalar_select %p5879_p11, 1, 0 }
  0x1e   : > { %p5892_p13 = pneg %p5879_p11 }
  0x20   : > { %s5500_s14 = scalar_lea.hbm %s6447_s3, 46080 }
  0x21   : > { %p5501_p12 = scmp.ne.s32.totalorder %s6447_s3, %s5500_s14  ;;  %p5507_p5 = scmp.lt.u32.totalorder %s5500_s14, %s6447_s3 }
  0x22   : > { %s6448_s17 = scalar_select %p5892_p13, 1, 0 }
  0x23   : > { %p5503_p0 = pnand %p5892_p13, %p5501_p12 }
  0x25   : > { %p5504_p3 = pneg %p5503_p0 }
  0x27   : > { %p5509_p7 = pnand %p5507_p5, %p5504_p3 }
  0x29   : > { %5512 = shalt.err (!%p5509_p7)
}
  0x2a   : > { %s5513_s20 = scalar_lea.vmem %s228_s9, 46080  ;;  %p5521_p2 = scmp.lt.s32.totalorder %s228_s9, %s228_s9 }
  0x2b   : > { %p5514_p9 = scmp.ne.s32.totalorder %s228_s9, %s5513_s20  ;;  %p5522_p6 = scmp.lt.s32.totalorder %s5513_s20, %s5513_s20 }
  0x2d   : > { %p5516_p10 = pnand %p5514_p9, %p5892_p13  ;;  %p5523_p4 = por %p5522_p6, %p5521_p2 }
  0x2f   : > { %p5517_p1 = pneg %p5516_p10 }
  0x31   : > { %p5524_p8 = pnand %p5523_p4, %p5517_p1 }
  0x33   : > { %5527 = shalt.err (!%p5524_p8)
}
  0x34   : > { %s6416_s28 = smov 640   ;;  %s6417_s8 = smov 40  }
  0x35   : > { %5366 = dma.hbm_to_vmem [thread:$0]  (!%p5879_p11), %s6447_s3, 46080, %s228_s9, [#allocation9], %s6416_s28, %s6416_s28, %s6417_s8  }
  0x36   : > { %p41_p1 = scmp.ge.s32.totalorder %s39_s11, 2  ;;  %s46_s14 = sadd.s32 1, %s5756_s23 }
  0x37   : > { %p53_p2 = scmp.ne.s32.totalorder %s5756_s23, %s5752_s22  ;;  %p54_p4 = scmp.eq.s32.totalorder %s5768_s26, 0 }
  0x38   : > { %s6487_s11 = smov (%p41_p1, %s39_s11), 0  ;;  %p6450_p8 = scmp.eq.s32.totalorder %s5851_s27, 1 }
  0x39   : > { %6449 = sst [smem:[#allocation23_spill]] %s6487_s11  ;;  %p55_p6 = por %p54_p4, %p53_p2 }
  0x3a   : > { %p5919_p10 = por %p6450_p8, %p53_p2  ;;  %s43_s16 = ssub.s32 %s5764_s25, %s6487_s11 }
  0x3b   : > { %p5390_p12 = scmp.lt.s32.totalorder %s5768_s26, 2  ;;  %p44_p0 = scmp.eq.s32.totalorder %s43_s16, 0 }
  0x3c   : > { %s6451_s15 = scalar_select %p5919_p10, 1, 0 }
  0x3d   : > { %s5927_s18 = sand.u32 1, %s5756_s23   ;;  %p5930_p3 = pnand %p5390_p12, %p55_p6 }
  0x3e   : > { %s6421_s9 = smul.u32 40, %s5927_s18  ;;  %s286_s13 = sand.u32 1, %s5768_s26  }
  0x3f   : > { %s6452_s19 = scalar_select %p5930_p3, 1, 0 }
  0x40   : > { %s5935_s20 = scalar_select %p44_p0, %s5756_s23, %s46_s14  }
  0x41   : > { %s6422_s12 = smul.u32 640, %s5764_s25  ;;  %s6454_s1 = sld [smem:[#allocation25_spill]] }
  0x42   : > { %6453 = sst [smem:[#allocation24_spill]] %s5935_s20  ;;  %s290_s16 = scalar_lea.vmem [#allocation5], %s6421_s9 }
  0x43   : > { %s300_s11 = sshll.u32 %s290_s16, 4  ;;  %s5773_s30 = smov [#allocation10]   ;;  %s5948_s11 = int_to_ptr.vmem [resolvable:$true] %s300_s11 }
  0x44   : > { %s5950_s14 = sshll.u32 %s5773_s30, 4  ;;  %s5952_s20 = scalar_lea.sflag [#allocation6], %s286_s13  ;;  %s241_s14 = int_to_ptr.vmem [resolvable:$true] %s5950_s14 }
  0x45   : > { %p5958_p7 = pneg %p5930_p3 }
  0x47   : > { %s5944_s3 = scalar_lea.hbm %s6454_s1, %s6422_s12  ;;  %s5533_s9 = scalar_lea.hbm %s6454_s1, 1280 }
  0x48   : > { %s5528_s23 = scalar_lea.hbm %s5944_s3, 640  ;;  %p5534_p2 = scmp.lt.u32.totalorder %s5944_s3, %s6454_s1 }
  0x49   : > { %p5529_p5 = scmp.ne.s32.totalorder %s5944_s3, %s5528_s23  ;;  %p5535_p4 = scmp.lt.u32.totalorder %s5533_s9, %s5528_s23 }
  0x4a   : > { %s6455_s28 = scalar_select %p5958_p7, 1, 0 }
  0x4b   : > { %p5531_p9 = pnand %p5958_p7, %p5529_p5  ;;  %p5536_p6 = por %p5535_p4, %p5534_p2 }
  0x4c   : > { %p5537_p8 = scmp.lt.u32.totalorder %s5528_s23, %s5944_s3 }
  0x4d   : > { %p5532_p1 = pneg %p5531_p9 }
  0x4e   : > { %p5538_p12 = por %p5537_p8, %p5536_p6 }
  0x50   : > { %p5539_p0 = pnand %p5538_p12, %p5532_p1 }
  0x52   : > { %5542 = shalt.err (!%p5539_p0)
}
  0x53   : > { %s5543_s13 = scalar_lea.vmem %s5948_s11, 640  ;;  %s5774_s8 = smov [#allocation5]  }
  0x54   : > { %p5544_p5 = scmp.ne.s32.totalorder %s5948_s11, %s5543_s13  ;;  %s5548_s16 = sshll.u32 %s5774_s8, 4  ;;  %s5549_s16 = int_to_ptr.vmem [resolvable:$false] %s5548_s16 }
  0x55   : > { %s5550_s12 = scalar_lea.vmem %s5549_s16, 1280  ;;  %p5551_p11 = scmp.lt.s32.totalorder %s5948_s11, %s5549_s16 }
  0x56   : > { %p5546_p9 = pnand %p5544_p5, %p5958_p7  ;;  %p5552_p13 = scmp.lt.s32.totalorder %s5550_s12, %s5543_s13 }
  0x58   : > { %p5547_p10 = pneg %p5546_p9  ;;  %p5553_p2 = por %p5552_p13, %p5551_p11 }
  0x5a   : > { %p5554_p4 = pnand %p5553_p2, %p5547_p10 }
  0x5c   : > { %5557 = shalt.err (!%p5554_p4)
}
  0x5d   : > { %5379 = dma.hbm_to_vmem [thread:$0]  (!%p5930_p3), %s5944_s3, 640, %s5948_s11, %s5952_s20  }
  0x5e   : > { %s5558_s30 = scalar_lea.hbm %s6410_s4, 27648  ;;  %p6456_p11 = scmp.ne.s32.totalorder %s6448_s17, 0 }
  0x5f   : > { %p5559_p1 = scmp.ne.s32.totalorder %s6410_s4, %s5558_s30  ;;  %p5565_p6 = scmp.lt.u32.totalorder %s5558_s30, %s6410_s4 }
  0x61   : > { %p5561_p13 = pnand %p5559_p1, %p6456_p11 }
  0x63   : > { %p5562_p10 = pneg %p5561_p13 }
  0x65   : > { %p5567_p8 = pnand %p5565_p6, %p5562_p10 }
  0x67   : > { %5570 = shalt.err (!%p5567_p8)
}
  0x68   : > { %s5571_s12 = scalar_lea.vmem %s241_s14, 27648  ;;  %p5579_p9 = scmp.lt.s32.totalorder %s241_s14, %s241_s14 }
  0x69   : > { %p5572_p12 = scmp.ne.s32.totalorder %s241_s14, %s5571_s12  ;;  %p5580_p2 = scmp.lt.s32.totalorder %s5571_s12, %s5571_s12 }
  0x6b   : > { %p5574_p0 = pnand %p5572_p12, %p6456_p11  ;;  %p5581_p4 = por %p5580_p2, %p5579_p9 }
  0x6d   : > { %p5575_p5 = pneg %p5574_p0 }
  0x6f   : > { %p5582_p3 = pnand %p5581_p4, %p5575_p5 }
  0x71   : > { %5585 = shalt.err (!%p5582_p3)
}
  0x72   : > { %s5775_s1 = smov 384   ;;  %s5776_s3 = smov 24  }
  0x73   : > { %p6457_p1 = scmp.ne.s32.totalorder %s6446_s10, 0  ;;  %s5777_s9 = smov [#allocation11]  }
  0x74   : > { %s253_s30 = sshll.u32 %s5777_s9, 4  ;;  %s5586_s16 = scalar_lea.hbm %s6411_s5, 46080  ;;  %s254_s30 = int_to_ptr.vmem [resolvable:$true] %s253_s30 }
  0x75   : > { %5369 = dma.hbm_to_vmem [thread:$0]  (!%p6457_p1), %s6410_s4, 27648, %s241_s14, [#allocation9], %s5775_s1, %s5775_s1, %s5776_s3  }
  0x76   : > { %p5587_p3 = scmp.ne.s32.totalorder %s6411_s5, %s5586_s16  ;;  %p5593_p6 = scmp.lt.u32.totalorder %s5586_s16, %s6411_s5 }
  0x78   : > { %p5589_p13 = pnand %p5587_p3, %p6456_p11 }
  0x7a   : > { %p5590_p10 = pneg %p5589_p13 }
  0x7c   : > { %p5595_p8 = pnand %p5593_p6, %p5590_p10 }
  0x7e   : > { %5598 = shalt.err (!%p5595_p8)
}
  0x7f   : > { %s5599_s14 = scalar_lea.vmem %s254_s30, 46080  ;;  %p5607_p9 = scmp.lt.s32.totalorder %s254_s30, %s254_s30 }
  0x80   : > { %p5600_p12 = scmp.ne.s32.totalorder %s254_s30, %s5599_s14  ;;  %p5608_p2 = scmp.lt.s32.totalorder %s5599_s14, %s5599_s14 }
  0x82   : > { %p5602_p0 = pnand %p5600_p12, %p6456_p11  ;;  %p5609_p4 = por %p5608_p2, %p5607_p9 }
  0x84   : > { %p5603_p5 = pneg %p5602_p0 }
  0x86   : > { %p5610_p7 = pnand %p5609_p4, %p5603_p5 }
  0x88   : > { %5613 = shalt.err (!%p5610_p7)
}
  0x89   : > { %s6458_s26 = smov 40   ;;  %s6459_s1 = smov 640  }
  0x8a   : > { %5372 = dma.hbm_to_vmem [thread:$0]  (!%p6457_p1), %s6411_s5, 46080, %s254_s30, [#allocation12], %s6459_s1, %s6459_s1, %s6458_s26  }
  0x8b   : > { %s6460_s17 = smul.u32 640, %s5764_s25  ;;  %s268_s13 = scalar_lea.sflag [#allocation3], %s5927_s18 }
  0x8c   : > { %s6461_s9 = smul.u32 40, %s5927_s18  ;;  %p6462_p11 = scmp.ne.s32.totalorder %s6455_s28, 0 }
  0x8d   : > { %s6027_s23 = scalar_lea.hbm %s6406_s0, %s6460_s17  ;;  %s5619_s14 = scalar_lea.hbm %s6406_s0, 1280 }
  0x8e   : > { %s271_s10 = scalar_lea.vmem [#allocation2], %s6461_s9  ;;  %s5614_s16 = scalar_lea.hbm %s6027_s23, 640 }
  0x8f   : > { %s279_s8 = sshll.u32 %s271_s10, 4  ;;  %p5615_p7 = scmp.ne.s32.totalorder %s6027_s23, %s5614_s16  ;;  %s280_s8 = int_to_ptr.vmem [resolvable:$true] %s279_s8 }
  0x90   : > { %p5620_p13 = scmp.lt.u32.totalorder %s6027_s23, %s6406_s0  ;;  %p5621_p10 = scmp.lt.u32.totalorder %s5619_s14, %s5614_s16 }
  0x91   : > { %p5617_p3 = pnand %p5615_p7, %p6462_p11  ;;  %p5623_p8 = scmp.lt.u32.totalorder %s5614_s16, %s6027_s23 }
  0x92   : > { %p5622_p6 = por %p5621_p10, %p5620_p13 }
  0x93   : > { %p5618_p1 = pneg %p5617_p3 }
  0x94   : > { %p5624_p12 = por %p5623_p8, %p5622_p6 }
  0x96   : > { %p5625_p0 = pnand %p5624_p12, %p5618_p1 }
  0x98   : > { %5628 = shalt.err (!%p5625_p0)
}
  0x99   : > { %s5629_s6 = scalar_lea.vmem %s280_s8, 640  ;;  %s5778_s21 = smov [#allocation2]  }
  0x9a   : > { %p5630_p5 = scmp.ne.s32.totalorder %s280_s8, %s5629_s6  ;;  %s5634_s17 = sshll.u32 %s5778_s21, 4  ;;  %s5635_s17 = int_to_ptr.vmem [resolvable:$false] %s5634_s17 }
  0x9b   : > { %s5636_s3 = scalar_lea.vmem %s5635_s17, 1280  ;;  %p5637_p4 = scmp.lt.s32.totalorder %s280_s8, %s5635_s17 }
  0x9c   : > { %p5632_p9 = pnand %p5630_p5, %p6462_p11  ;;  %p5638_p7 = scmp.lt.s32.totalorder %s5636_s3, %s5629_s6 }
  0x9e   : > { %p5633_p2 = pneg %p5632_p9  ;;  %p5639_p3 = por %p5638_p7, %p5637_p4 }
  0xa0   : > { %p5640_p10 = pnand %p5639_p3, %p5633_p2 }
  0xa2   : > { %5643 = shalt.err (!%p5640_p10)
}
  0xa3   : > { %p6463_p13 = scmp.ne.s32.totalorder %s6452_s19, 0  ;;  %s3945_s11 = sshll.u32 %s5764_s25, 4 }
  0xa4   : > { %s310_s9 = scalar_lea.vmem [#allocation7], %s5927_s18  ;;  %s315_s12 = scalar_lea.hbm %s6408_s2, %s3945_s11 }
  0xa5   : > { %5376 = dma.hbm_to_vmem [thread:$0]  (!%p6463_p13), %s6027_s23, 640, %s280_s8, %s268_s13  }
  0xa6   : > { %s317_s10 = sshll.u32 %s310_s9, 4  ;;  %s5644_s14 = scalar_lea.hbm %s315_s12, 16  ;;  %s318_s10 = int_to_ptr.vmem [resolvable:$true] %s317_s10 }
  0xa7   : > { %p5645_p1 = scmp.ne.s32.totalorder %s315_s12, %s5644_s14  ;;  %s5649_s6 = scalar_lea.hbm %s6408_s2, 32 }
  0xa8   : > { %p5650_p12 = scmp.lt.u32.totalorder %s315_s12, %s6408_s2  ;;  %p5651_p0 = scmp.lt.u32.totalorder %s5649_s6, %s5644_s14 }
  0xa9   : > { %p5647_p6 = pnand %p5645_p1, %p6462_p11  ;;  %p5653_p9 = scmp.lt.u32.totalorder %s5644_s14, %s315_s12 }
  0xaa   : > { %p5652_p5 = por %p5651_p0, %p5650_p12 }
  0xab   : > { %p5648_p8 = pneg %p5647_p6 }
  0xac   : > { %p5654_p2 = por %p5653_p9, %p5652_p5 }
  0xae   : > { %p5655_p4 = pnand %p5654_p2, %p5648_p8 }
  0xb0   : > { %5658 = shalt.err (!%p5655_p4)
}
  0xb1   : > { %s5659_s18 = scalar_lea.vmem %s318_s10, 16  ;;  %s5779_s23 = smov [#allocation7]  }
  0xb2   : > { %p5660_p7 = scmp.ne.s32.totalorder %s318_s10, %s5659_s18  ;;  %s5664_s8 = sshll.u32 %s5779_s23, 4  ;;  %s5665_s8 = int_to_ptr.vmem [resolvable:$false] %s5664_s8 }
  0xb3   : > { %s5666_s13 = scalar_lea.vmem %s5665_s8, 32  ;;  %p5667_p1 = scmp.lt.s32.totalorder %s318_s10, %s5665_s8 }
  0xb4   : > { %p5662_p3 = pnand %p5660_p7, %p6462_p11  ;;  %p5668_p6 = scmp.lt.s32.totalorder %s5666_s13, %s5659_s18 }
  0xb6   : > { %p5663_p10 = pneg %p5662_p3  ;;  %p5669_p13 = por %p5668_p6, %p5667_p1 }
  0xb8   : > { %p5670_p0 = pnand %p5669_p13, %p5663_p10 }
  0xba   : > { %5673 = shalt.err (!%p5670_p0)
}
  0xbb   : > { %p6464_p12 = scmp.ne.s32.totalorder %s6452_s19, 0  ;;  %p6465_p8 = scmp.ne.s32.totalorder %s6445_s7, 0 }
  0xbc   : > { %s6070_s28 = sand.u32 (!%p6465_p8), 1, %s5752_s22   ;;  %p6466_p11 = scmp.ne.s32.totalorder (!%p6465_p8), %s6442_s29, 0 }
  0xbd   : > { %5382 = dma.hbm_to_vmem [thread:$0]  (!%p6464_p12), %s315_s12, 16, %s318_s10, %s5952_s20  }
  0xbe   : > { %326 = sbr.rel (%p6465_p8) target bundleno = 3002 (0xbba), region = 44  ;;  %s329_s11 = scalar_lea.sflag (!%p6465_p8), [#allocation3], %s6070_s28 }
  0xbf   : > { %s6073_s3 = smul.u32 (!%p6465_p8), 40, %s6070_s28 }
  0xc1   : > { %s6077_s9 = scalar_lea.vmem (!%p6465_p8), [#allocation2], %s6073_s3 }
  0xc5   : > { %5727 = dma.done.wait (%p6466_p11), %s329_s11, 640  }
  0xc6   : > { %5729 = vsyncadd (%p6466_p11), %s329_s11, 4294966656  ;;  %s337_s7 = sand.u32 1, %s5851_s27   ;;  %s6085_s20 = scalar_lea.vmem [#allocation5], %s6073_s3 }
  0xc7   : > { %s338_s19 = scalar_lea.sflag [#allocation6], %s337_s7 }
  0xc8   : > { %5731 = dma.done.wait (%p6466_p11), %s338_s19, 656  }
  0xc9   : > { %5733 = vsyncadd (%p6466_p11), %s338_s19, 4294966640  ;;  %s349_s10 = scalar_lea.vmem [#allocation7], %s6070_s28  ;;  %p6467_p13 = scmp.eq.s32.totalorder %s5851_s27, 0 }
  0xcb   : > { %5735 = dma.done.wait (%p6467_p13), [#allocation9], 73728   ;;  %p6468_p5 = pmov %p6467_p13 }
  0xcd   : > { %5737 = vsyncadd (%p6468_p5), [#allocation9], 4294893568  ;;  %p6469_p9 = pmov %p6468_p5 }
  0xce   : > { %p6470_p2 = pmov %p6468_p5 }
  0xcf   : > { %5739 = dma.done.wait (%p6469_p9), [#allocation12], 46080  }
  0xd0   : > { %5741 = vsyncadd (%p6470_p2), [#allocation12], 4294921216  ;;  %v410_v0 = vld [vmem:[#allocation8 + $0x8] sm:$0xff]  ;;  %v415_v1 = vld [vmem:[#allocation8 + $0x30] sm:$0xff]  ;;  %vm769_vm0 = vcmask 523264   ;;  %vm5782_vm1 = vmmov 0  }
  0xd1   : > { %v412_v2 = vld [vmem:[#allocation8 + $0x18] sm:$0xff]  ;;  %v4367_v3 = vpack.c.bf16 %v415_v1, %v410_v0  ;;  %v417_v4 = vld [vmem:[#allocation8 + $0x40] sm:$0xff]  ;;  %v414_v6 = vld [vmem:[#allocation8 + $0x28] sm:$0xff]  ;;  %s5783_s27 = smov 64   ;;  %vm2151_vm2 = vcmask 64512   ;;  %s398_s29 = scalar_lea.vmem [#allocation13], %s6073_s3 }
  0xd2   : > { %v409_v5 = vld [vmem:[#allocation8] sm:$0xff]  ;;  %v4511_v7 = vpack.c.bf16 %v417_v4, %v412_v2  ;;  %v411_v9 = vld [vmem:[#allocation8 + $0x10] sm:$0xff]  ;;  %v416_v10 = vld [vmem:[#allocation8 + $0x38] sm:$0xff]  ;;  %s5342_s16 = smul.u32 640, %s5760_s24  ;;  %s3783_s30 = sshll.u32 %s398_s29, 4  ;;  %s6358_s30 = int_to_ptr.vmem [resolvable:$true] %s3783_s30 }
  0xd3   : > { %v4369_v8 = vpack.c.bf16 %v414_v6, %v409_v5  ;;  %v420_v11 = vld [vmem:[#allocation8 + $0x58] sm:$0xff]  ;;  %4368 = vmatprep.subr.bf16.mxu0 %v4367_v3  ;;  %v4513_v12 = vpack.c.bf16 %v416_v10, %v411_v9  ;;  %v425_v13 = vld [vmem:[#allocation8 + $0x80] sm:$0xff]  ;;  %v422_v14 = vld [vmem:[#allocation8 + $0x68] sm:$0xff]  ;;  %s6471_s26 = sld [smem:[#allocation27_spill]]  ;;  %s3767_s21 = scalar_lea.sflag [#allocation4], %s6070_s28 }
  0xd4   : > { %v427_v15 = vld [vmem:[#allocation8 + $0x90] sm:$0xff]  ;;  %4512 = vmatprep.subr.bf16.mxu1 %v4511_v7  ;;  %v4371_v16 = vpack.c.bf16 %v425_v13, %v420_v11  ;;  %v424_v19 = vld [vmem:[#allocation8 + $0x78] sm:$0xff]  ;;  %v421_v20 = vld [vmem:[#allocation8 + $0x60] sm:$0xff]  ;;  %s5674_s17 = scalar_lea.vmem %s6358_s30, 640  ;;  %p6473_p7 = scmp.ne.s32.totalorder %s6451_s15, 0 }
  0xd5   : > { %4370 = vmatpush1.bf16.msra.mxu0 %v4369_v8  ;;  %v4515_v17 = vpack.c.bf16 %v427_v15, %v422_v14  ;;  %v419_v18 = vld [vmem:[#allocation8 + $0x50] sm:$0xff]  ;;  %4514 = vmatpush1.bf16.msra.mxu1 %v4513_v12  ;;  %v426_v22 = vld [vmem:[#allocation8 + $0x88] sm:$0xff]  ;;  %v432_v27 = vld [vmem:[#allocation8 + $0xb8] sm:$0xff]  ;;  %p5675_p4 = scmp.ne.s32.totalorder %s6358_s30, %s5674_s17  ;;  %s5784_s24 = smov [#allocation13]  }
  0xd6   : > { %v4373_v21 = vpack.c.bf16 %v424_v19, %v419_v18  ;;  %v430_v23 = vld [vmem:[#allocation8 + $0xa8] sm:$0xff]  ;;  %v435_v24 = vld [vmem:[#allocation8 + $0xd0] sm:$0xff]  ;;  %4372 = vmatprep.subr.bf16.mxu0 %v4371_v16  ;;  %v4517_v25 = vpack.c.bf16 %v426_v22, %v421_v20  ;;  %v437_v28 = vld [vmem:[#allocation8 + $0xe0] sm:$0xff]  ;;  %s5678_s18 = sshll.u32 %s5784_s24, 4  ;;  %s5679_s18 = int_to_ptr.vmem [resolvable:$false] %s5678_s18 }
  0xd7   : > { %4516 = vmatprep.subr.bf16.mxu1 %v4515_v17  ;;  %v4375_v26 = vpack.c.bf16 %v435_v24, %v430_v23  ;;  %v429_v29 = vld [vmem:[#allocation8 + $0xa0] sm:$0xff]  ;;  %v4519_v30 = vpack.c.bf16 %v437_v28, %v432_v27  ;;  %v434_v31 = vld [vmem:[#allocation8 + $0xc8] sm:$0xff]  ;;  %v431_v32 = vld [vmem:[#allocation8 + $0xb0] sm:$0xff]  ;;  %p5676_p3 = pnand %p5675_p4, %p6473_p7  ;;  %s5680_s23 = scalar_lea.vmem %s5679_s18, 1280 }
  0xd8   : > { %v436_v33 = vld [vmem:[#allocation8 + $0xd8] sm:$0xff]  ;;  %v4377_v34 = vpack.c.bf16 %v434_v31, %v429_v29  ;;  %v445_v36 = vld [vmem:[#allocation8 + $0x120] sm:$0xff]  ;;  %v442_v37 = vld [vmem:[#allocation8 + $0x108] sm:$0xff]  ;;  %p5681_p1 = scmp.lt.s32.totalorder %s6358_s30, %s5679_s18  ;;  %p5682_p6 = scmp.lt.s32.totalorder %s5680_s23, %s5674_s17 }
  0xd9   : > { %4374 = vmatpush1.bf16.msra.mxu0 %v4373_v21  ;;  %v440_v35 = vld [vmem:[#allocation8 + $0xf8] sm:$0xff]  ;;  %4518 = vmatpush1.bf16.msra.mxu1 %v4517_v25  ;;  %v4521_v38 = vpack.c.bf16 %v436_v33, %v431_v32  ;;  %v447_v40 = vld [vmem:[#allocation8 + $0x130] sm:$0xff]  ;;  %v441_v44 = vld [vmem:[#allocation8 + $0x100] sm:$0xff]  ;;  %s6472_s1 = smov %s6471_s26  ;;  %s6356_s6 = scalar_lea.hbm %s6471_s26, %s5342_s16 }
  0xda   : > { %4376 = vmatprep.subr.bf16.mxu0 %v4375_v26  ;;  %v4379_v39 = vpack.c.bf16 %v445_v36, %v440_v35  ;;  %v439_v41 = vld [vmem:[#allocation8 + $0xf0] sm:$0xff]  ;;  %v444_v42 = vld [vmem:[#allocation8 + $0x118] sm:$0xff]  ;;  %4520 = vmatprep.subr.bf16.mxu1 %v4519_v30  ;;  %v4523_v43 = vpack.c.bf16 %v447_v40, %v442_v37  ;;  %v446_v45 = vld [vmem:[#allocation8 + $0x128] sm:$0xff]  ;;  %p5677_p10 = pneg %p5676_p3  ;;  %p5683_p0 = por %p5682_p6, %p5681_p1 }
  0xdb   : > { %v450_v46 = vld [vmem:[#allocation8 + $0x148] sm:$0xff]  ;;  %v455_v47 = vld [vmem:[#allocation8 + $0x170] sm:$0xff]  ;;  %v452_v48 = vld [vmem:[#allocation8 + $0x158] sm:$0xff]  ;;  %v4381_v50 = vpack.c.bf16 %v444_v42, %v439_v41  ;;  %v4525_v51 = vpack.c.bf16 %v446_v45, %v441_v44 }
  0xdc   : > { %v457_v49 = vld [vmem:[#allocation8 + $0x180] sm:$0xff]  ;;  %v4383_v52 = vpack.c.bf16 %v455_v47, %v450_v46  ;;  %v454_v54 = vld [vmem:[#allocation8 + $0x168] sm:$0xff]  ;;  %v451_v55 = vld [vmem:[#allocation8 + $0x150] sm:$0xff]  ;;  %p5684_p12 = pnand %p5683_p0, %p5677_p10 }
  0xdd   : > { %4378 = vmatpush1.bf16.msra.mxu0 %v4377_v34  ;;  %4522 = vmatpush1.bf16.msra.mxu1 %v4521_v38  ;;  %v449_v53 = vld [vmem:[#allocation8 + $0x140] sm:$0xff]  ;;  %v4527_v56 = vpack.c.bf16 %v457_v49, %v452_v48  ;;  %v456_v57 = vld [vmem:[#allocation8 + $0x178] sm:$0xff]  ;;  %v462_v60 = vld [vmem:[#allocation8 + $0x1a8] sm:$0xff] }
  0xde   : > { %4380 = vmatprep.subr.bf16.mxu0 %v4379_v39  ;;  %4524 = vmatprep.subr.bf16.mxu1 %v4523_v43  ;;  %v460_v58 = vld [vmem:[#allocation8 + $0x198] sm:$0xff]  ;;  %v465_v59 = vld [vmem:[#allocation8 + $0x1c0] sm:$0xff]  ;;  %v467_v61 = vld [vmem:[#allocation8 + $0x1d0] sm:$0xff]  ;;  %v4385_v62 = vpack.c.bf16 %v454_v54, %v449_v53  ;;  %v4529_v63 = vpack.c.bf16 %v456_v57, %v451_v55 }
  0xdf   : > { %v4387_v0 = vpack.c.bf16 %v465_v59, %v460_v58  ;;  %v459_v1 = vld [vmem:[#allocation8 + $0x190] sm:$0xff]  ;;  %v464_v2 = vld [vmem:[#allocation8 + $0x1b8] sm:$0xff]  ;;  %v461_v3 = vld [vmem:[#allocation8 + $0x1a0] sm:$0xff]  ;;  %v4531_v4 = vpack.c.bf16 %v467_v61, %v462_v60 }
  0xe0   : > { %v466_v5 = vld [vmem:[#allocation8 + $0x1c8] sm:$0xff]  ;;  %v475_v7 = vld [vmem:[#allocation8 + $0x210] sm:$0xff]  ;;  %v472_v8 = vld [vmem:[#allocation8 + $0x1f8] sm:$0xff]  ;;  %v4389_v10 = vpack.c.bf16 %v464_v2, %v459_v1 }
  0xe1   : > { %4382 = vmatpush1.bf16.msra.mxu0 %v4381_v50  ;;  %4526 = vmatpush1.bf16.msra.mxu1 %v4525_v51  ;;  %v470_v6 = vld [vmem:[#allocation8 + $0x1e8] sm:$0xff]  ;;  %v477_v9 = vld [vmem:[#allocation8 + $0x220] sm:$0xff]  ;;  %v4533_v11 = vpack.c.bf16 %v466_v5, %v461_v3  ;;  %v471_v15 = vld [vmem:[#allocation8 + $0x1f0] sm:$0xff] }
  0xe2   : > { %4384 = vmatprep.subr.bf16.mxu0 %v4383_v52  ;;  %4528 = vmatprep.subr.bf16.mxu1 %v4527_v56  ;;  %v4391_v12 = vpack.c.bf16 %v475_v7, %v470_v6  ;;  %v469_v13 = vld [vmem:[#allocation8 + $0x1e0] sm:$0xff]  ;;  %v474_v14 = vld [vmem:[#allocation8 + $0x208] sm:$0xff]  ;;  %v4535_v16 = vpack.c.bf16 %v477_v9, %v472_v8  ;;  %v476_v17 = vld [vmem:[#allocation8 + $0x218] sm:$0xff] }
  0xe3   : > { %v480_v18 = vld [vmem:[#allocation8 + $0x238] sm:$0xff]  ;;  %v485_v19 = vld [vmem:[#allocation8 + $0x260] sm:$0xff]  ;;  %v482_v20 = vld [vmem:[#allocation8 + $0x248] sm:$0xff]  ;;  %v4393_v22 = vpack.c.bf16 %v474_v14, %v469_v13  ;;  %v4537_v23 = vpack.c.bf16 %v476_v17, %v471_v15 }
  0xe4   : > { %v487_v21 = vld [vmem:[#allocation8 + $0x270] sm:$0xff]  ;;  %v4395_v24 = vpack.c.bf16 %v485_v19, %v480_v18  ;;  %v484_v26 = vld [vmem:[#allocation8 + $0x258] sm:$0xff]  ;;  %v481_v27 = vld [vmem:[#allocation8 + $0x240] sm:$0xff] }
  0xe5   : > { %4386 = vmatpush1.bf16.msra.mxu0 %v4385_v62  ;;  %4530 = vmatpush1.bf16.msra.mxu1 %v4529_v63  ;;  %v479_v25 = vld [vmem:[#allocation8 + $0x230] sm:$0xff]  ;;  %v4539_v28 = vpack.c.bf16 %v487_v21, %v482_v20  ;;  %v486_v29 = vld [vmem:[#allocation8 + $0x268] sm:$0xff]  ;;  %v492_v32 = vld [vmem:[#allocation8 + $0x298] sm:$0xff] }
  0xe6   : > { %4388 = vmatprep.subr.bf16.mxu0 %v4387_v0  ;;  %4532 = vmatprep.subr.bf16.mxu1 %v4531_v4  ;;  %v490_v30 = vld [vmem:[#allocation8 + $0x288] sm:$0xff]  ;;  %v495_v31 = vld [vmem:[#allocation8 + $0x2b0] sm:$0xff]  ;;  %v497_v33 = vld [vmem:[#allocation8 + $0x2c0] sm:$0xff]  ;;  %v4397_v34 = vpack.c.bf16 %v484_v26, %v479_v25  ;;  %v4541_v35 = vpack.c.bf16 %v486_v29, %v481_v27 }
  0xe7   : > { %v4399_v36 = vpack.c.bf16 %v495_v31, %v490_v30  ;;  %v489_v37 = vld [vmem:[#allocation8 + $0x280] sm:$0xff]  ;;  %v494_v38 = vld [vmem:[#allocation8 + $0x2a8] sm:$0xff]  ;;  %v491_v39 = vld [vmem:[#allocation8 + $0x290] sm:$0xff]  ;;  %v4543_v40 = vpack.c.bf16 %v497_v33, %v492_v32 }
  0xe8   : > { %v496_v41 = vld [vmem:[#allocation8 + $0x2b8] sm:$0xff]  ;;  %v505_v43 = vld [vmem:[#allocation8 + $0x300] sm:$0xff]  ;;  %v502_v44 = vld [vmem:[#allocation8 + $0x2e8] sm:$0xff]  ;;  %v4401_v46 = vpack.c.bf16 %v494_v38, %v489_v37 }
  0xe9   : > { %4390 = vmatpush1.bf16.msra.mxu0 %v4389_v10  ;;  %4534 = vmatpush1.bf16.msra.mxu1 %v4533_v11  ;;  %v500_v42 = vld [vmem:[#allocation8 + $0x2d8] sm:$0xff]  ;;  %v507_v45 = vld [vmem:[#allocation8 + $0x310] sm:$0xff]  ;;  %v4545_v47 = vpack.c.bf16 %v496_v41, %v491_v39  ;;  %v501_v51 = vld [vmem:[#allocation8 + $0x2e0] sm:$0xff] }
  0xea   : > { %4392 = vmatprep.subr.bf16.mxu0 %v4391_v12  ;;  %4536 = vmatprep.subr.bf16.mxu1 %v4535_v16  ;;  %v4403_v48 = vpack.c.bf16 %v505_v43, %v500_v42  ;;  %v499_v49 = vld [vmem:[#allocation8 + $0x2d0] sm:$0xff]  ;;  %v504_v50 = vld [vmem:[#allocation8 + $0x2f8] sm:$0xff]  ;;  %v4547_v52 = vpack.c.bf16 %v507_v45, %v502_v44  ;;  %v506_v53 = vld [vmem:[#allocation8 + $0x308] sm:$0xff] }
  0xeb   : > { %v510_v54 = vld [vmem:[#allocation8 + $0x328] sm:$0xff]  ;;  %v515_v55 = vld [vmem:[#allocation8 + $0x350] sm:$0xff]  ;;  %v512_v56 = vld [vmem:[#allocation8 + $0x338] sm:$0xff]  ;;  %v4405_v58 = vpack.c.bf16 %v504_v50, %v499_v49  ;;  %v4549_v59 = vpack.c.bf16 %v506_v53, %v501_v51 }
  0xec   : > { %v517_v57 = vld [vmem:[#allocation8 + $0x360] sm:$0xff]  ;;  %v4407_v60 = vpack.c.bf16 %v515_v55, %v510_v54  ;;  %v514_v62 = vld [vmem:[#allocation8 + $0x348] sm:$0xff]  ;;  %v511_v63 = vld [vmem:[#allocation8 + $0x330] sm:$0xff] }
  0xed   : > { %4394 = vmatpush1.bf16.msra.mxu0 %v4393_v22  ;;  %4538 = vmatpush1.bf16.msra.mxu1 %v4537_v23  ;;  %v509_v61 = vld [vmem:[#allocation8 + $0x320] sm:$0xff]  ;;  %v4551_v0 = vpack.c.bf16 %v517_v57, %v512_v56  ;;  %v516_v1 = vld [vmem:[#allocation8 + $0x358] sm:$0xff]  ;;  %v522_v4 = vld [vmem:[#allocation8 + $0x388] sm:$0xff] }
  0xee   : > { %4396 = vmatprep.subr.bf16.mxu0 %v4395_v24  ;;  %4540 = vmatprep.subr.bf16.mxu1 %v4539_v28  ;;  %v520_v2 = vld [vmem:[#allocation8 + $0x378] sm:$0xff]  ;;  %v525_v3 = vld [vmem:[#allocation8 + $0x3a0] sm:$0xff]  ;;  %v527_v5 = vld [vmem:[#allocation8 + $0x3b0] sm:$0xff]  ;;  %v4409_v6 = vpack.c.bf16 %v514_v62, %v509_v61  ;;  %v4553_v8 = vpack.c.bf16 %v516_v1, %v511_v63 }
  0xef   : > { %v519_v7 = vld [vmem:[#allocation8 + $0x370] sm:$0xff]  ;;  %v4411_v9 = vpack.c.bf16 %v525_v3, %v520_v2  ;;  %v524_v10 = vld [vmem:[#allocation8 + $0x398] sm:$0xff]  ;;  %v521_v11 = vld [vmem:[#allocation8 + $0x380] sm:$0xff]  ;;  %v4555_v13 = vpack.c.bf16 %v527_v5, %v522_v4 }
  0xf0   : > { %v526_v12 = vld [vmem:[#allocation8 + $0x3a8] sm:$0xff]  ;;  %v535_v15 = vld [vmem:[#allocation8 + $0x3f0] sm:$0xff]  ;;  %v532_v17 = vld [vmem:[#allocation8 + $0x3d8] sm:$0xff]  ;;  %v4413_v19 = vpack.c.bf16 %v524_v10, %v519_v7 }
  0xf1   : > { %4398 = vmatpush1.bf16.msra.mxu0 %v4397_v34  ;;  %4542 = vmatpush1.bf16.msra.mxu1 %v4541_v35  ;;  %v530_v14 = vld [vmem:[#allocation8 + $0x3c8] sm:$0xff]  ;;  %v6101_v16 = vld [vmem:[%s6085_s20 + $0x8] sm:$0xff]  ;;  %v4557_v20 = vpack.c.bf16 %v526_v12, %v521_v11 }
  0xf2   : > { %4400 = vmatprep.subr.bf16.mxu0 %v4399_v36  ;;  %4544 = vmatprep.subr.bf16.mxu1 %v4543_v40  ;;  %v537_v18 = vld [vmem:[#allocation8 + $0x400] sm:$0xff]  ;;  %v4415_v21 = vpack.c.bf16 %v535_v15, %v530_v14  ;;  %v534_v23 = vld [vmem:[#allocation8 + $0x3e8] sm:$0xff]  ;;  %v531_v24 = vld [vmem:[#allocation8 + $0x3d0] sm:$0xff] }
  0xf3   : > { %837 = vmatprep.mubr.f32.mxu0 %v6101_v16  ;;  %1050 = vmatprep.mubr.f32.mxu1 %v6101_v16  ;;  %v529_v22 = vld [vmem:[#allocation8 + $0x3c0] sm:$0xff]  ;;  %v4559_v25 = vpack.c.bf16 %v537_v18, %v532_v17  ;;  %v536_v26 = vld [vmem:[#allocation8 + $0x3f8] sm:$0xff]  ;;  %v542_v29 = vld [vmem:[#allocation8 + $0x428] sm:$0xff] }
  0xf4   : > { %v540_v27 = vld [vmem:[#allocation8 + $0x418] sm:$0xff]  ;;  %v545_v28 = vld [vmem:[#allocation8 + $0x440] sm:$0xff]  ;;  %v547_v30 = vld [vmem:[#allocation8 + $0x450] sm:$0xff]  ;;  %v4417_v31 = vpack.c.bf16 %v534_v23, %v529_v22  ;;  %v4561_v32 = vpack.c.bf16 %v536_v26, %v531_v24 }
  0xf5   : > { %4402 = vmatpush1.bf16.msra.mxu0 %v4401_v46  ;;  %4546 = vmatpush1.bf16.msra.mxu1 %v4545_v47  ;;  %v4419_v33 = vpack.c.bf16 %v545_v28, %v540_v27  ;;  %v539_v34 = vld [vmem:[#allocation8 + $0x410] sm:$0xff]  ;;  %v544_v35 = vld [vmem:[#allocation8 + $0x438] sm:$0xff]  ;;  %v541_v36 = vld [vmem:[#allocation8 + $0x420] sm:$0xff]  ;;  %v4563_v37 = vpack.c.bf16 %v547_v30, %v542_v29 }
  0xf6   : > { %4404 = vmatprep.subr.bf16.mxu0 %v4403_v48  ;;  %4548 = vmatprep.subr.bf16.mxu1 %v4547_v52  ;;  %v546_v38 = vld [vmem:[#allocation8 + $0x448] sm:$0xff]  ;;  %v555_v40 = vld [vmem:[#allocation8 + $0x490] sm:$0xff]  ;;  %v552_v41 = vld [vmem:[#allocation8 + $0x478] sm:$0xff]  ;;  %v4421_v43 = vpack.c.bf16 %v544_v35, %v539_v34 }
  0xf7   : > { %v550_v39 = vld [vmem:[#allocation8 + $0x468] sm:$0xff]  ;;  %v557_v42 = vld [vmem:[#allocation8 + $0x4a0] sm:$0xff]  ;;  %v4565_v44 = vpack.c.bf16 %v546_v38, %v541_v36  ;;  %v551_v48 = vld [vmem:[#allocation8 + $0x470] sm:$0xff] }
  0xf8   : > { %v4423_v45 = vpack.c.bf16 %v555_v40, %v550_v39  ;;  %v549_v46 = vld [vmem:[#allocation8 + $0x460] sm:$0xff]  ;;  %v554_v47 = vld [vmem:[#allocation8 + $0x488] sm:$0xff]  ;;  %v4567_v49 = vpack.c.bf16 %v557_v42, %v552_v41  ;;  %v556_v50 = vld [vmem:[#allocation8 + $0x498] sm:$0xff] }
  0xf9   : > { %4406 = vmatpush1.bf16.msra.mxu0 %v4405_v58  ;;  %4550 = vmatpush1.bf16.msra.mxu1 %v4549_v59  ;;  %v560_v51 = vld [vmem:[#allocation8 + $0x4b8] sm:$0xff]  ;;  %v565_v52 = vld [vmem:[#allocation8 + $0x4e0] sm:$0xff]  ;;  %v562_v53 = vld [vmem:[#allocation8 + $0x4c8] sm:$0xff]  ;;  %v4425_v55 = vpack.c.bf16 %v554_v47, %v549_v46  ;;  %v4569_v56 = vpack.c.bf16 %v556_v50, %v551_v48 }
  0xfa   : > { %4408 = vmatprep.subr.bf16.mxu0 %v4407_v60  ;;  %4552 = vmatprep.subr.bf16.mxu1 %v4551_v0  ;;  %v567_v54 = vld [vmem:[#allocation8 + $0x4f0] sm:$0xff]  ;;  %v4427_v57 = vpack.c.bf16 %v565_v52, %v560_v51  ;;  %v564_v59 = vld [vmem:[#allocation8 + $0x4d8] sm:$0xff]  ;;  %v561_v60 = vld [vmem:[#allocation8 + $0x4c0] sm:$0xff] }
  0xfb   : > { %v559_v58 = vld [vmem:[#allocation8 + $0x4b0] sm:$0xff]  ;;  %v4571_v61 = vpack.c.bf16 %v567_v54, %v562_v53  ;;  %v566_v62 = vld [vmem:[#allocation8 + $0x4e8] sm:$0xff]  ;;  %v572_v1 = vld [vmem:[#allocation8 + $0x518] sm:$0xff] }
  0xfc   : > { %v570_v63 = vld [vmem:[#allocation8 + $0x508] sm:$0xff]  ;;  %v575_v0 = vld [vmem:[#allocation8 + $0x530] sm:$0xff]  ;;  %v577_v2 = vld [vmem:[#allocation8 + $0x540] sm:$0xff]  ;;  %v4429_v3 = vpack.c.bf16 %v564_v59, %v559_v58  ;;  %v4573_v4 = vpack.c.bf16 %v566_v62, %v561_v60 }
  0xfd   : > { %4410 = vmatpush1.bf16.msra.mxu0 %v4409_v6  ;;  %4554 = vmatpush1.bf16.msra.mxu1 %v4553_v8  ;;  %v4431_v5 = vpack.c.bf16 %v575_v0, %v570_v63  ;;  %v569_v6 = vld [vmem:[#allocation8 + $0x500] sm:$0xff]  ;;  %v574_v7 = vld [vmem:[#allocation8 + $0x528] sm:$0xff]  ;;  %v571_v8 = vld [vmem:[#allocation8 + $0x510] sm:$0xff] }
  0xfe   : > { %4412 = vmatprep.subr.bf16.mxu0 %v4411_v9  ;;  %4556 = vmatprep.subr.bf16.mxu1 %v4555_v13  ;;  %v4575_v9 = vpack.c.bf16 %v577_v2, %v572_v1  ;;  %v576_v10 = vld [vmem:[#allocation8 + $0x538] sm:$0xff]  ;;  %v585_v12 = vld [vmem:[#allocation8 + $0x580] sm:$0xff]  ;;  %v582_v13 = vld [vmem:[#allocation8 + $0x568] sm:$0xff]  ;;  %v4433_v17 = vpack.c.bf16 %v574_v7, %v569_v6 }
  0xff   : > { %v580_v11 = vld [vmem:[#allocation8 + $0x558] sm:$0xff]  ;;  %v587_v14 = vld [vmem:[#allocation8 + $0x590] sm:$0xff]  ;;  %v4577_v18 = vpack.c.bf16 %v576_v10, %v571_v8  ;;  %v581_v22 = vld [vmem:[#allocation8 + $0x560] sm:$0xff] }
 0x100   : > { %v6106_v15 = vld [vmem:[%s6085_s20] sm:$0xff]  ;;  %v4579_v23 = vpack.c.bf16 %v587_v14, %v582_v13  ;;  %v597_v28 = vld [vmem:[#allocation8 + $0x5e0] sm:$0xff] }
 0x101   : > { %4414 = vmatpush1.bf16.msra.mxu0 %v4413_v19  ;;  %4558 = vmatpush1.bf16.msra.mxu1 %v4557_v20  ;;  %v4435_v19 = vpack.c.bf16 %v585_v12, %v580_v11  ;;  %v579_v20 = vld [vmem:[#allocation8 + $0x550] sm:$0xff]  ;;  %v586_v24 = vld [vmem:[#allocation8 + $0x588] sm:$0xff]  ;;  %v592_v27 = vld [vmem:[#allocation8 + $0x5b8] sm:$0xff] }
 0x102   : > { %4416 = vmatprep.subr.bf16.mxu0 %v4415_v21  ;;  %4560 = vmatprep.subr.bf16.mxu1 %v4559_v25  ;;  %v584_v21 = vld [vmem:[#allocation8 + $0x578] sm:$0xff]  ;;  %v590_v25 = vld [vmem:[#allocation8 + $0x5a8] sm:$0xff]  ;;  %v595_v26 = vld [vmem:[#allocation8 + $0x5d0] sm:$0xff]  ;;  %v4581_v30 = vpack.c.bf16 %v586_v24, %v581_v22  ;;  %v4583_v35 = vpack.c.bf16 %v597_v28, %v592_v27 }
 0x103   : > { %v4437_v29 = vpack.c.bf16 %v584_v21, %v579_v20  ;;  %v591_v34 = vld [vmem:[#allocation8 + $0x5b0] sm:$0xff]  ;;  %v596_v36 = vld [vmem:[#allocation8 + $0x5d8] sm:$0xff]  ;;  %v605_v38 = vld [vmem:[#allocation8 + $0x620] sm:$0xff] }
 0x104   : > { %v602_v39 = vld [vmem:[#allocation8 + $0x608] sm:$0xff]  ;;  %v607_v40 = vld [vmem:[#allocation8 + $0x630] sm:$0xff]  ;;  %v4585_v42 = vpack.c.bf16 %v596_v36, %v591_v34  ;;  %v601_v46 = vld [vmem:[#allocation8 + $0x600] sm:$0xff] }
 0x105   : > { %4418 = vmatpush1.bf16.msra.mxu0 %v4417_v31  ;;  %4562 = vmatpush1.bf16.msra.mxu1 %v4561_v32  ;;  %v4439_v31 = vpack.c.bf16 %v595_v26, %v590_v25  ;;  %v589_v32 = vld [vmem:[#allocation8 + $0x5a0] sm:$0xff]  ;;  %v4587_v47 = vpack.c.bf16 %v607_v40, %v602_v39  ;;  %v606_v48 = vld [vmem:[#allocation8 + $0x628] sm:$0xff]  ;;  %v615_v50 = vld [vmem:[#allocation8 + $0x670] sm:$0xff] }
 0x106   : > { %4420 = vmatprep.subr.bf16.mxu0 %v4419_v33  ;;  %4564 = vmatprep.subr.bf16.mxu1 %v4563_v37  ;;  %v594_v33 = vld [vmem:[#allocation8 + $0x5c8] sm:$0xff]  ;;  %v600_v37 = vld [vmem:[#allocation8 + $0x5f8] sm:$0xff]  ;;  %v617_v52 = vld [vmem:[#allocation8 + $0x680] sm:$0xff]  ;;  %v4589_v54 = vpack.c.bf16 %v606_v48, %v601_v46 }
 0x107   : > { %v4441_v41 = vpack.c.bf16 %v594_v33, %v589_v32  ;;  %v612_v51 = vld [vmem:[#allocation8 + $0x658] sm:$0xff]  ;;  %v611_v58 = vld [vmem:[#allocation8 + $0x650] sm:$0xff]  ;;  %v625_v62 = vld [vmem:[#allocation8 + $0x6c0] sm:$0xff] }
 0x108   : > { %v4591_v59 = vpack.c.bf16 %v617_v52, %v612_v51  ;;  %v616_v60 = vld [vmem:[#allocation8 + $0x678] sm:$0xff]  ;;  %v622_v63 = vld [vmem:[#allocation8 + $0x6a8] sm:$0xff]  ;;  %v627_v0 = vld [vmem:[#allocation8 + $0x6d0] sm:$0xff] }
 0x109   : > { %4422 = vmatpush1.bf16.msra.mxu0 %v4421_v43  ;;  %4566 = vmatpush1.bf16.msra.mxu1 %v4565_v44  ;;  %v4443_v43 = vpack.c.bf16 %v605_v38, %v600_v37  ;;  %v599_v44 = vld [vmem:[#allocation8 + $0x5f0] sm:$0xff]  ;;  %v4593_v2 = vpack.c.bf16 %v616_v60, %v611_v58  ;;  %v621_v6 = vld [vmem:[#allocation8 + $0x6a0] sm:$0xff]  ;;  %v4595_v7 = vpack.c.bf16 %v627_v0, %v622_v63  ;;  %v626_v8 = vld [vmem:[#allocation8 + $0x6c8] sm:$0xff] }
 0x10a   : > { %4424 = vmatprep.subr.bf16.mxu0 %v4423_v45  ;;  %4568 = vmatprep.subr.bf16.mxu1 %v4567_v49  ;;  %v604_v45 = vld [vmem:[#allocation8 + $0x618] sm:$0xff]  ;;  %v610_v49 = vld [vmem:[#allocation8 + $0x648] sm:$0xff]  ;;  %v635_v10 = vld [vmem:[#allocation8 + $0x710] sm:$0xff] }
 0x10b   : > { %v4445_v53 = vpack.c.bf16 %v604_v45, %v599_v44  ;;  %v632_v11 = vld [vmem:[#allocation8 + $0x6f8] sm:$0xff]  ;;  %v637_v12 = vld [vmem:[#allocation8 + $0x720] sm:$0xff]  ;;  %v631_v20 = vld [vmem:[#allocation8 + $0x6f0] sm:$0xff] }
 0x10c   : > { %v629_v14 = vld [vmem:[#allocation8 + $0x6e0] sm:$0xff]  ;;  %v636_v21 = vld [vmem:[#allocation8 + $0x718] sm:$0xff]  ;;  %v4599_v22 = vpack.c.bf16 %v637_v12, %v632_v11  ;;  %v642_v26 = vld [vmem:[#allocation8 + $0x748] sm:$0xff] }
 0x10d   : > { %4426 = vmatpush1.bf16.msra.mxu0 %v4425_v55  ;;  %4570 = vmatpush1.bf16.msra.mxu1 %v4569_v56  ;;  %v4447_v55 = vpack.c.bf16 %v615_v50, %v610_v49  ;;  %v609_v56 = vld [vmem:[#allocation8 + $0x640] sm:$0xff]  ;;  %v647_v27 = vld [vmem:[#allocation8 + $0x770] sm:$0xff]  ;;  %v644_v32 = vld [vmem:[#allocation8 + $0x758] sm:$0xff] }
 0x10e   : > { %4428 = vmatprep.subr.bf16.mxu0 %v4427_v57  ;;  %4572 = vmatprep.subr.bf16.mxu1 %v4571_v61  ;;  %v614_v57 = vld [vmem:[#allocation8 + $0x668] sm:$0xff]  ;;  %v620_v61 = vld [vmem:[#allocation8 + $0x698] sm:$0xff]  ;;  %v645_v24 = vld [vmem:[#allocation8 + $0x760] sm:$0xff]  ;;  %v4603_v34 = vpack.c.bf16 %v647_v27, %v642_v26 }
 0x10f   : > { %v4449_v1 = vpack.c.bf16 %v614_v57, %v609_v56  ;;  %v6111_v25 = vld [vmem:[%s6085_s20 + $0x18] sm:$0xff]  ;;  %v652_v38 = vld [vmem:[#allocation8 + $0x798] sm:$0xff] }
 0x110   : > { %v641_v33 = vld [vmem:[#allocation8 + $0x740] sm:$0xff]  ;;  %v650_v36 = vld [vmem:[#allocation8 + $0x788] sm:$0xff]  ;;  %v655_v37 = vld [vmem:[#allocation8 + $0x7b0] sm:$0xff] }
 0x111   : > { %4430 = vmatpush1.bf16.msra.mxu0 %v4429_v3  ;;  %4574 = vmatpush1.bf16.msra.mxu1 %v4573_v4  ;;  %v4451_v3 = vpack.c.bf16 %v625_v62, %v620_v61  ;;  %v619_v4 = vld [vmem:[#allocation8 + $0x690] sm:$0xff]  ;;  %v657_v39 = vld [vmem:[#allocation8 + $0x7c0] sm:$0xff]  ;;  %v654_v44 = vld [vmem:[#allocation8 + $0x7a8] sm:$0xff] }
 0x112   : > { %4432 = vmatprep.subr.bf16.mxu0 %v4431_v5  ;;  %4576 = vmatprep.subr.bf16.mxu1 %v4575_v9  ;;  %v624_v5 = vld [vmem:[#allocation8 + $0x6b8] sm:$0xff]  ;;  %v630_v9 = vld [vmem:[#allocation8 + $0x6e8] sm:$0xff]  ;;  %v651_v45 = vld [vmem:[#allocation8 + $0x790] sm:$0xff]  ;;  %v4607_v46 = vpack.c.bf16 %v657_v39, %v652_v38 }
 0x113   : > { %v4453_v13 = vpack.c.bf16 %v624_v5, %v619_v4  ;;  %v660_v48 = vld [vmem:[#allocation8 + $0x7d8] sm:$0xff]  ;;  %v665_v49 = vld [vmem:[#allocation8 + $0x800] sm:$0xff]  ;;  %v662_v50 = vld [vmem:[#allocation8 + $0x7e8] sm:$0xff] }
 0x114   : > { %838 = vmatmul.mubr.f32.vlgmr.msra.gmra.mrb[0].mxu0 %v6106_v15  ;;  %1051 = vmatmul.mubr.f32.vlgmr.msra.gmra.mrb[0].mxu1 %v6106_v15  ;;  %v667_v51 = vld [vmem:[#allocation8 + $0x810] sm:$0xff]  ;;  %v664_v56 = vld [vmem:[#allocation8 + $0x7f8] sm:$0xff]  ;;  %v661_v57 = vld [vmem:[#allocation8 + $0x7e0] sm:$0xff] }
 0x115   : > { %4434 = vmatpush1.bf16.msra.mxu0 %v4433_v17  ;;  %4578 = vmatpush1.bf16.msra.mxu1 %v4577_v18  ;;  %v4597_v17 = vpack.c.bf16 %v626_v8, %v621_v6  ;;  %v4455_v18 = vpack.c.bf16 %v635_v10, %v630_v9  ;;  %v4611_v58 = vpack.c.bf16 %v667_v51, %v662_v50  ;;  %v670_v60 = vld [vmem:[#allocation8 + $0x828] sm:$0xff]  ;;  %v675_v61 = vld [vmem:[#allocation8 + $0x850] sm:$0xff]  ;;  %v672_v62 = vld [vmem:[#allocation8 + $0x838] sm:$0xff] }
 0x116   : > { %4436 = vmatprep.subr.bf16.mxu0 %v4435_v19  ;;  %4580 = vmatprep.subr.bf16.mxu1 %v4579_v23  ;;  %v634_v19 = vld [vmem:[#allocation8 + $0x708] sm:$0xff]  ;;  %v640_v23 = vld [vmem:[#allocation8 + $0x738] sm:$0xff]  ;;  %v677_v63 = vld [vmem:[#allocation8 + $0x860] sm:$0xff] }
 0x117   : > { %908 = vmatprep.mubr.f32.mxu0 %v6111_v25  ;;  %1121 = vmatprep.mubr.f32.mxu1 %v6111_v25  ;;  %v4457_v28 = vpack.c.bf16 %v634_v19, %v629_v14  ;;  %v674_v4 = vld [vmem:[#allocation8 + $0x848] sm:$0xff]  ;;  %v671_v5 = vld [vmem:[#allocation8 + $0x830] sm:$0xff]  ;;  %v4615_v6 = vpack.c.bf16 %v677_v63, %v672_v62  ;;  %v680_v8 = vld [vmem:[#allocation8 + $0x878] sm:$0xff] }
 0x118   : > { %v685_v9 = vld [vmem:[#allocation8 + $0x8a0] sm:$0xff]  ;;  %v682_v10 = vld [vmem:[#allocation8 + $0x888] sm:$0xff]  ;;  %v687_v11 = vld [vmem:[#allocation8 + $0x8b0] sm:$0xff] }
 0x119   : > { %4438 = vmatpush1.bf16.msra.mxu0 %v4437_v29  ;;  %4582 = vmatpush1.bf16.msra.mxu1 %v4581_v30  ;;  %v4601_v29 = vpack.c.bf16 %v636_v21, %v631_v20  ;;  %v4459_v30 = vpack.c.bf16 %v645_v24, %v640_v23  ;;  %v4475_v14 = vpack.c.bf16 %v685_v9, %v680_v8  ;;  %v681_v19 = vld [vmem:[#allocation8 + $0x880] sm:$0xff]  ;;  %v686_v21 = vld [vmem:[#allocation8 + $0x8a8] sm:$0xff]  ;;  %v695_v23 = vld [vmem:[#allocation8 + $0x8f0] sm:$0xff] }
 0x11a   : > { %4440 = vmatprep.subr.bf16.mxu0 %v4439_v31  ;;  %4584 = vmatprep.subr.bf16.mxu1 %v4583_v35  ;;  %v639_v31 = vld [vmem:[#allocation8 + $0x730] sm:$0xff]  ;;  %v646_v35 = vld [vmem:[#allocation8 + $0x768] sm:$0xff]  ;;  %v4619_v20 = vpack.c.bf16 %v687_v11, %v682_v10  ;;  %v692_v24 = vld [vmem:[#allocation8 + $0x8d8] sm:$0xff] }
 0x11b   : > { %v4461_v40 = vpack.c.bf16 %v644_v32, %v639_v31  ;;  %v697_v26 = vld [vmem:[#allocation8 + $0x900] sm:$0xff]  ;;  %v694_v31 = vld [vmem:[#allocation8 + $0x8e8] sm:$0xff]  ;;  %v691_v32 = vld [vmem:[#allocation8 + $0x8d0] sm:$0xff] }
 0x11c   : > { %v707_v38 = vld [vmem:[#allocation8 + $0x950] sm:$0xff]  ;;  %v717_v50 = vld [vmem:[#allocation8 + $0x9a0] sm:$0xff]  ;;  %v732_v9 = vld [vmem:[#allocation8 + $0xa18] sm:$0xff] }
 0x11d   : > { %4442 = vmatpush1.bf16.msra.mxu0 %v4441_v41  ;;  %4586 = vmatpush1.bf16.msra.mxu1 %v4585_v42  ;;  %v4605_v41 = vpack.c.bf16 %v646_v35, %v641_v33  ;;  %v4463_v42 = vpack.c.bf16 %v655_v37, %v650_v36  ;;  %v4623_v33 = vpack.c.bf16 %v697_v26, %v692_v24  ;;  %v700_v35 = vld [vmem:[#allocation8 + $0x918] sm:$0xff]  ;;  %v705_v36 = vld [vmem:[#allocation8 + $0x940] sm:$0xff]  ;;  %v702_v37 = vld [vmem:[#allocation8 + $0x928] sm:$0xff] }
 0x11e   : > { %4444 = vmatprep.subr.bf16.mxu0 %v4443_v43  ;;  %4588 = vmatprep.subr.bf16.mxu1 %v4587_v47  ;;  %v649_v43 = vld [vmem:[#allocation8 + $0x780] sm:$0xff]  ;;  %v656_v47 = vld [vmem:[#allocation8 + $0x7b8] sm:$0xff]  ;;  %v727_v62 = vld [vmem:[#allocation8 + $0x9f0] sm:$0xff] }
 0x11f   : > { %v4465_v52 = vpack.c.bf16 %v654_v44, %v649_v43  ;;  %v704_v43 = vld [vmem:[#allocation8 + $0x938] sm:$0xff]  ;;  %v701_v44 = vld [vmem:[#allocation8 + $0x920] sm:$0xff]  ;;  %v735_v8 = vld [vmem:[#allocation8 + $0xa30] sm:$0xff] }
 0x120   : > { %v737_v10 = vld [vmem:[#allocation8 + $0xa40] sm:$0xff]  ;;  %v747_v24 = vld [vmem:[#allocation8 + $0xa90] sm:$0xff] }
 0x121   : > { %4446 = vmatpush1.bf16.msra.mxu0 %v4445_v53  ;;  %4590 = vmatpush1.bf16.msra.mxu1 %v4589_v54  ;;  %v4609_v53 = vpack.c.bf16 %v656_v47, %v651_v45  ;;  %v4467_v54 = vpack.c.bf16 %v665_v49, %v660_v48  ;;  %v4627_v45 = vpack.c.bf16 %v707_v38, %v702_v37  ;;  %v710_v47 = vld [vmem:[#allocation8 + $0x968] sm:$0xff]  ;;  %v715_v48 = vld [vmem:[#allocation8 + $0x990] sm:$0xff]  ;;  %v712_v49 = vld [vmem:[#allocation8 + $0x978] sm:$0xff] }
 0x122   : > { %4448 = vmatprep.subr.bf16.mxu0 %v4447_v55  ;;  %4592 = vmatprep.subr.bf16.mxu1 %v4591_v59  ;;  %v659_v55 = vld [vmem:[#allocation8 + $0x7d0] sm:$0xff]  ;;  %v666_v59 = vld [vmem:[#allocation8 + $0x808] sm:$0xff]  ;;  %v752_v37 = vld [vmem:[#allocation8 + $0xab8] sm:$0xff] }
 0x123   : > { %v4469_v0 = vpack.c.bf16 %v664_v56, %v659_v55  ;;  %v714_v55 = vld [vmem:[#allocation8 + $0x988] sm:$0xff]  ;;  %v711_v56 = vld [vmem:[#allocation8 + $0x970] sm:$0xff]  ;;  %v757_v38 = vld [vmem:[#allocation8 + $0xae0] sm:$0xff] }
 0x124   : > { %v6116_v26 = vld [vmem:[%s6085_s20 + $0x10] sm:$0xff] }
 0x125   : > { %4450 = vmatpush1.bf16.msra.mxu0 %v4449_v1  ;;  %4594 = vmatpush1.bf16.msra.mxu1 %v4593_v2  ;;  %v4613_v1 = vpack.c.bf16 %v666_v59, %v661_v57  ;;  %v4471_v2 = vpack.c.bf16 %v675_v61, %v670_v60  ;;  %v4631_v57 = vpack.c.bf16 %v717_v50, %v712_v49  ;;  %v720_v59 = vld [vmem:[#allocation8 + $0x9b8] sm:$0xff]  ;;  %v725_v60 = vld [vmem:[#allocation8 + $0x9e0] sm:$0xff]  ;;  %v722_v61 = vld [vmem:[#allocation8 + $0x9c8] sm:$0xff]  ;;  %v5780_v49 = vmov 0.0  }
 0x126   : > { %4452 = vmatprep.subr.bf16.mxu0 %v4451_v3  ;;  %4596 = vmatprep.subr.bf16.mxu1 %v4595_v7  ;;  %v669_v3 = vld [vmem:[#allocation8 + $0x820] sm:$0xff]  ;;  %v676_v7 = vld [vmem:[#allocation8 + $0x858] sm:$0xff]  ;;  %v762_v50 = vld [vmem:[#allocation8 + $0xb08] sm:$0xff] }
 0x127   : > { %v4473_v12 = vpack.c.bf16 %v674_v4, %v669_v3  ;;  %v724_v3 = vld [vmem:[#allocation8 + $0x9d8] sm:$0xff]  ;;  %v721_v4 = vld [vmem:[#allocation8 + $0x9c0] sm:$0xff] }
 0x129   : > { %4454 = vmatpush1.bf16.msra.mxu0 %v4453_v13  ;;  %4598 = vmatpush1.bf16.msra.mxu1 %v4597_v17  ;;  %v4617_v13 = vpack.c.bf16 %v676_v7, %v671_v5  ;;  %v679_v17 = vld [vmem:[#allocation8 + $0x870] sm:$0xff]  ;;  %v4635_v5 = vpack.c.bf16 %v727_v62, %v722_v61  ;;  %v730_v7 = vld [vmem:[#allocation8 + $0xa08] sm:$0xff]  ;;  %v653_v62 = vld [vmem:[#allocation8 + $0x7a0] sm:$0xff] }
 0x12a   : > { %4456 = vmatprep.subr.bf16.mxu0 %v4455_v18  ;;  %4600 = vmatprep.subr.bf16.mxu1 %v4599_v22  ;;  %v684_v18 = vld [vmem:[#allocation8 + $0x898] sm:$0xff]  ;;  %v690_v22 = vld [vmem:[#allocation8 + $0x8c8] sm:$0xff] }
 0x12b   : > { %v4477_v27 = vpack.c.bf16 %v684_v18, %v679_v17  ;;  %v734_v17 = vld [vmem:[#allocation8 + $0xa28] sm:$0xff]  ;;  %v731_v18 = vld [vmem:[#allocation8 + $0xa10] sm:$0xff] }
 0x12c   : > { %v498_v61 = vld [vmem:[#allocation8 + $0x2c8] sm:$0xff] }
 0x12d   : > { %4458 = vmatpush1.bf16.msra.mxu0 %v4457_v28  ;;  %4602 = vmatpush1.bf16.msra.mxu1 %v4601_v29  ;;  %v4621_v28 = vpack.c.bf16 %v686_v21, %v681_v19  ;;  %v4479_v29 = vpack.c.bf16 %v695_v23, %v690_v22  ;;  %v4639_v19 = vpack.c.bf16 %v737_v10, %v732_v9  ;;  %v740_v21 = vld [vmem:[#allocation8 + $0xa58] sm:$0xff]  ;;  %v745_v22 = vld [vmem:[#allocation8 + $0xa80] sm:$0xff]  ;;  %v742_v23 = vld [vmem:[#allocation8 + $0xa68] sm:$0xff] }
 0x12e   : > { %4460 = vmatprep.subr.bf16.mxu0 %v4459_v30  ;;  %4604 = vmatprep.subr.bf16.mxu1 %v4603_v34  ;;  %v689_v30 = vld [vmem:[#allocation8 + $0x8c0] sm:$0xff]  ;;  %v696_v34 = vld [vmem:[#allocation8 + $0x8f8] sm:$0xff]  ;;  %v663_v10 = vld [vmem:[#allocation8 + $0x7f0] sm:$0xff] }
 0x12f   : > { %v4481_v39 = vpack.c.bf16 %v694_v31, %v689_v30  ;;  %v739_v30 = vld [vmem:[#allocation8 + $0xa50] sm:$0xff]  ;;  %v744_v31 = vld [vmem:[#allocation8 + $0xa78] sm:$0xff] }
 0x130   : > { %v508_v9 = vld [vmem:[#allocation8 + $0x318] sm:$0xff] }
 0x131   : > { %4462 = vmatpush1.bf16.msra.mxu0 %v4461_v40  ;;  %4606 = vmatpush1.bf16.msra.mxu1 %v4605_v41  ;;  %v4625_v40 = vpack.c.bf16 %v696_v34, %v691_v32  ;;  %v4483_v41 = vpack.c.bf16 %v705_v36, %v700_v35  ;;  %v741_v32 = vld [vmem:[#allocation8 + $0xa60] sm:$0xff]  ;;  %v746_v34 = vld [vmem:[#allocation8 + $0xa88] sm:$0xff]  ;;  %v755_v36 = vld [vmem:[#allocation8 + $0xad0] sm:$0xff] }
 0x132   : > { %4464 = vmatprep.subr.bf16.mxu0 %v4463_v42  ;;  %4608 = vmatprep.subr.bf16.mxu1 %v4607_v46  ;;  %v699_v42 = vld [vmem:[#allocation8 + $0x910] sm:$0xff]  ;;  %v706_v46 = vld [vmem:[#allocation8 + $0x948] sm:$0xff] }
 0x133   : > { %v4485_v51 = vpack.c.bf16 %v704_v43, %v699_v42  ;;  %v750_v35 = vld [vmem:[#allocation8 + $0xaa8] sm:$0xff]  ;;  %v749_v42 = vld [vmem:[#allocation8 + $0xaa0] sm:$0xff] }
 0x134   : > { %v754_v43 = vld [vmem:[#allocation8 + $0xac8] sm:$0xff] }
 0x135   : > { %4466 = vmatpush1.bf16.msra.mxu0 %v4465_v52  ;;  %4610 = vmatpush1.bf16.msra.mxu1 %v4609_v53  ;;  %v4629_v52 = vpack.c.bf16 %v706_v46, %v701_v44  ;;  %v4487_v53 = vpack.c.bf16 %v715_v48, %v710_v47  ;;  %v751_v44 = vld [vmem:[#allocation8 + $0xab0] sm:$0xff]  ;;  %v756_v46 = vld [vmem:[#allocation8 + $0xad8] sm:$0xff]  ;;  %v765_v48 = vld [vmem:[#allocation8 + $0xb20] sm:$0xff] }
 0x136   : > { %4468 = vmatprep.subr.bf16.mxu0 %v4467_v54  ;;  %4612 = vmatprep.subr.bf16.mxu1 %v4611_v58  ;;  %v709_v54 = vld [vmem:[#allocation8 + $0x960] sm:$0xff]  ;;  %v716_v58 = vld [vmem:[#allocation8 + $0x998] sm:$0xff] }
 0x137   : > { %v4489_v63 = vpack.c.bf16 %v714_v55, %v709_v54  ;;  %v760_v47 = vld [vmem:[#allocation8 + $0xaf8] sm:$0xff]  ;;  %v759_v55 = vld [vmem:[#allocation8 + $0xaf0] sm:$0xff] }
 0x138   : > { %v4507_v54 = vpack.c.bf16 %v765_v48, %v760_v47  ;;  %v608_v48 = vld [vmem:[#allocation8 + $0x638] sm:$0xff] }
 0x139   : > { %4470 = vmatpush1.bf16.msra.mxu0 %v4469_v0  ;;  %4614 = vmatpush1.bf16.msra.mxu1 %v4613_v1  ;;  %v4633_v0 = vpack.c.bf16 %v716_v58, %v711_v56  ;;  %v4491_v1 = vpack.c.bf16 %v725_v60, %v720_v59  ;;  %v764_v56 = vld [vmem:[#allocation8 + $0xb18] sm:$0xff]  ;;  %v766_v59 = vld [vmem:[#allocation8 + $0xb28] sm:$0xff]  ;;  %v493_v60 = vld [vmem:[#allocation8 + $0x2a0] sm:$0xff] }
 0x13a   : > { %4472 = vmatprep.subr.bf16.mxu0 %v4471_v2  ;;  %4616 = vmatprep.subr.bf16.mxu1 %v4615_v6  ;;  %v719_v2 = vld [vmem:[#allocation8 + $0x9b0] sm:$0xff]  ;;  %v726_v6 = vld [vmem:[#allocation8 + $0x9e8] sm:$0xff] }
 0x13b   : > { %v4493_v11 = vpack.c.bf16 %v724_v3, %v719_v2  ;;  %v4655_v2 = vpack.c.bf16 %v498_v61, %v493_v60  ;;  %v413_v3 = vld [vmem:[#allocation8 + $0x20] sm:$0xff]  ;;  %v543_v60 = vld [vmem:[#allocation8 + $0x430] sm:$0xff]  ;;  %v548_v61 = vld [vmem:[#allocation8 + $0x458] sm:$0xff] }
 0x13d   : > { %4474 = vmatpush1.bf16.msra.mxu0 %v4473_v12  ;;  %4618 = vmatpush1.bf16.msra.mxu1 %v4617_v13  ;;  %v4637_v12 = vpack.c.bf16 %v726_v6, %v721_v4  ;;  %v4495_v13 = vpack.c.bf16 %v735_v8, %v730_v7  ;;  %v418_v4 = vld [vmem:[#allocation8 + $0x48] sm:$0xff]  ;;  %v503_v8 = vld [vmem:[#allocation8 + $0x2f0] sm:$0xff] }
 0x13e   : > { %4476 = vmatprep.subr.bf16.mxu0 %v4475_v14  ;;  %4620 = vmatprep.subr.bf16.mxu1 %v4619_v20  ;;  %v729_v14 = vld [vmem:[#allocation8 + $0xa00] sm:$0xff]  ;;  %v736_v20 = vld [vmem:[#allocation8 + $0xa38] sm:$0xff]  ;;  %v578_v7 = vld [vmem:[#allocation8 + $0x548] sm:$0xff] }
 0x141   : > { %4478 = vmatpush1.bf16.msra.mxu0 %v4477_v27  ;;  %4622 = vmatpush1.bf16.msra.mxu1 %v4621_v28  ;;  %v4497_v27 = vpack.c.bf16 %v734_v17, %v729_v14  ;;  %v4641_v28 = vpack.c.bf16 %v736_v20, %v731_v18  ;;  %v4659_v17 = vpack.c.bf16 %v508_v9, %v503_v8  ;;  %v423_v18 = vld [vmem:[#allocation8 + $0x70] sm:$0xff]  ;;  %v553_v8 = vld [vmem:[#allocation8 + $0x480] sm:$0xff]  ;;  %v558_v9 = vld [vmem:[#allocation8 + $0x4a8] sm:$0xff] }
 0x142   : > { %4480 = vmatprep.subr.bf16.mxu0 %v4479_v29  ;;  %4624 = vmatprep.subr.bf16.mxu1 %v4623_v33  ;;  %v4499_v29 = vpack.c.bf16 %v745_v22, %v740_v21  ;;  %v4643_v33 = vpack.c.bf16 %v747_v24, %v742_v23  ;;  %v583_v20 = vld [vmem:[#allocation8 + $0x570] sm:$0xff]  ;;  %v588_v22 = vld [vmem:[#allocation8 + $0x598] sm:$0xff]  ;;  %v513_v23 = vld [vmem:[#allocation8 + $0x340] sm:$0xff] }
 0x143   : > { %v518_v24 = vld [vmem:[#allocation8 + $0x368] sm:$0xff] }
 0x145   : > { %4482 = vmatpush1.bf16.msra.mxu0 %v4481_v39  ;;  %4626 = vmatpush1.bf16.msra.mxu1 %v4625_v40  ;;  %v4501_v39 = vpack.c.bf16 %v744_v31, %v739_v30  ;;  %v4645_v40 = vpack.c.bf16 %v746_v34, %v741_v32  ;;  %v4693_v30 = vpack.c.bf16 %v588_v22, %v583_v20  ;;  %v433_v32 = vld [vmem:[#allocation8 + $0xc0] sm:$0xff]  ;;  %v638_v22 = vld [vmem:[#allocation8 + $0x728] sm:$0xff] }
 0x146   : > { %4484 = vmatprep.subr.bf16.mxu0 %v4483_v41  ;;  %4628 = vmatprep.subr.bf16.mxu1 %v4627_v45  ;;  %v4503_v41 = vpack.c.bf16 %v755_v36, %v750_v35  ;;  %v4647_v45 = vpack.c.bf16 %v757_v38, %v752_v37  ;;  %v4663_v31 = vpack.c.bf16 %v518_v24, %v513_v23  ;;  %v593_v34 = vld [vmem:[#allocation8 + $0x5c0] sm:$0xff]  ;;  %v598_v36 = vld [vmem:[#allocation8 + $0x5e8] sm:$0xff]  ;;  %v523_v37 = vld [vmem:[#allocation8 + $0x390] sm:$0xff] }
 0x147   : > { %v528_v38 = vld [vmem:[#allocation8 + $0x3b8] sm:$0xff]  ;;  %v633_v20 = vld [vmem:[#allocation8 + $0x700] sm:$0xff]  ;;  %v563_v23 = vld [vmem:[#allocation8 + $0x4d0] sm:$0xff] }
 0x148   : > { %v568_v24 = vld [vmem:[#allocation8 + $0x4f8] sm:$0xff] }
 0x149   : > { %4486 = vmatpush1.bf16.msra.mxu0 %v4485_v51  ;;  %4630 = vmatpush1.bf16.msra.mxu1 %v4629_v52  ;;  %v767_v51 = vld [vmem:[#allocation8 + $0xb30] sm:$0xff]  ;;  %v4505_v52 = vpack.c.bf16 %v754_v43, %v749_v42  ;;  %v4697_v42 = vpack.c.bf16 %v598_v36, %v593_v34  ;;  %v4667_v43 = vpack.c.bf16 %v528_v38, %v523_v37  ;;  %v648_v36 = vld [vmem:[#allocation8 + $0x778] sm:$0xff]  ;;  %v1410_v37 = vld [vmem:[#allocation10 + $0x8] sm:$0xff] }
 0x14a   : > { %4488 = vmatprep.subr.bf16.mxu0 %v4487_v53  ;;  %4632 = vmatprep.subr.bf16.mxu1 %v4631_v57  ;;  %v4649_v53 = vpack.c.bf16 %v756_v46, %v751_v44  ;;  %v761_v57 = vld [vmem:[#allocation8 + $0xb00] sm:$0xff]  ;;  %v4651_v58 = vpack.c.bf16 %v767_v51, %v762_v50  ;;  %v443_v44 = vld [vmem:[#allocation8 + $0x110] sm:$0xff]  ;;  %v538_v51 = vld [vmem:[#allocation8 + $0x408] sm:$0xff] }
 0x14b   : > { %v603_v46 = vld [vmem:[#allocation8 + $0x610] sm:$0xff]  ;;  %v533_v50 = vld [vmem:[#allocation8 + $0x3e0] sm:$0xff] }
 0x14c   : > { %v1413_v38 = vld [vmem:[#allocation10 + $0x20] sm:$0xff] }
 0x14d   : > { %4490 = vmatpush1.bf16.msra.mxu0 %v4489_v63  ;;  %4634 = vmatpush1.bf16.msra.mxu1 %v4633_v0  ;;  %v658_v63 = vld [vmem:[#allocation8 + $0x7c8] sm:$0xff]  ;;  %v4509_v0 = vpack.c.bf16 %v764_v56, %v759_v55  ;;  %v453_v55 = vld [vmem:[#allocation8 + $0x160] sm:$0xff] }
 0x14e   : > { %4492 = vmatprep.subr.bf16.mxu0 %v4491_v1  ;;  %4636 = vmatprep.subr.bf16.mxu1 %v4635_v5  ;;  %v4653_v1 = vpack.c.bf16 %v766_v59, %v761_v57  ;;  %v573_v5 = vld [vmem:[#allocation8 + $0x520] sm:$0xff]  ;;  %v4687_v6 = vpack.c.bf16 %v658_v63, %v653_v62  ;;  %v458_v56 = vld [vmem:[#allocation8 + $0x188] sm:$0xff]  ;;  %v703_v62 = vld [vmem:[#allocation8 + $0x930] sm:$0xff] }
 0x14f   : > { %v4689_v14 = vpack.c.bf16 %v578_v7, %v573_v5  ;;  %v613_v57 = vld [vmem:[#allocation8 + $0x660] sm:$0xff]  ;;  %v618_v59 = vld [vmem:[#allocation8 + $0x688] sm:$0xff]  ;;  %v708_v63 = vld [vmem:[#allocation8 + $0x958] sm:$0xff] }
 0x150   : > { %v623_v5 = vld [vmem:[#allocation8 + $0x6b0] sm:$0xff]  ;;  %v628_v7 = vld [vmem:[#allocation8 + $0x6d8] sm:$0xff] }
 0x151   : > { %4494 = vmatpush1.bf16.msra.mxu0 %v4493_v11  ;;  %4638 = vmatpush1.bf16.msra.mxu1 %v4637_v12  ;;  %v668_v11 = vld [vmem:[#allocation8 + $0x818] sm:$0xff] }
 0x152   : > { %4496 = vmatprep.subr.bf16.mxu0 %v4495_v13  ;;  %4640 = vmatprep.subr.bf16.mxu1 %v4639_v19  ;;  %v6123_v12 = vld [vmem:[%s6085_s20 + $0x20] sm:$0xff]  ;;  %v4657_v13 = vpack.c.bf16 %v418_v4, %v413_v3  ;;  %v4691_v21 = vpack.c.bf16 %v668_v11, %v663_v10  ;;  %v713_v10 = vld [vmem:[#allocation8 + $0x980] sm:$0xff] }
 0x153   : > { %v428_v19 = vld [vmem:[#allocation8 + $0x98] sm:$0xff]  ;;  %v463_v3 = vld [vmem:[#allocation8 + $0x1b0] sm:$0xff]  ;;  %v718_v11 = vld [vmem:[#allocation8 + $0x9a8] sm:$0xff] }
 0x154   : > { %909 = vmatmul.mubr.f32.vlgmr.msra.gmra.mrb[0].mxu0 %v6116_v26  ;;  %1122 = vmatmul.mubr.f32.vlgmr.msra.gmra.mrb[0].mxu1 %v6116_v26  ;;  %v468_v4 = vld [vmem:[#allocation8 + $0x1d8] sm:$0xff] }
 0x155   : > { %4498 = vmatpush1.bf16.msra.mxu0 %v4497_v27  ;;  %4642 = vmatpush1.bf16.msra.mxu1 %v4641_v28  ;;  %v673_v27 = vld [vmem:[#allocation8 + $0x840] sm:$0xff]  ;;  %v678_v28 = vld [vmem:[#allocation8 + $0x868] sm:$0xff] }
 0x156   : > { %4500 = vmatprep.subr.bf16.mxu0 %v4499_v29  ;;  %4644 = vmatprep.subr.bf16.mxu1 %v4643_v33  ;;  %v4661_v29 = vpack.c.bf16 %v428_v19, %v423_v18  ;;  %v438_v33 = vld [vmem:[#allocation8 + $0xe8] sm:$0xff]  ;;  %v4695_v35 = vpack.c.bf16 %v678_v28, %v673_v27  ;;  %v473_v18 = vld [vmem:[#allocation8 + $0x200] sm:$0xff]  ;;  %v723_v27 = vld [vmem:[#allocation8 + $0x9d0] sm:$0xff] }
 0x157   : > { %979 = vmatprep.mubr.f32.mxu0 %v5780_v49  ;;  %1192 = vmatprep.mubr.f32.mxu1 %v5780_v49  ;;  %v478_v19 = vld [vmem:[#allocation8 + $0x228] sm:$0xff]  ;;  %v728_v28 = vld [vmem:[#allocation8 + $0x9f8] sm:$0xff] }
 0x158   : > { %v4715_v34 = vpack.c.bf16 %v728_v28, %v723_v27  ;;  %v1449_v27 = vld [vmem:[#allocation10 + $0x140] sm:$0xff] }
 0x159   : > { %4502 = vmatpush1.bf16.msra.mxu0 %v4501_v39  ;;  %4646 = vmatpush1.bf16.msra.mxu1 %v4645_v40  ;;  %v683_v39 = vld [vmem:[#allocation8 + $0x890] sm:$0xff]  ;;  %v688_v40 = vld [vmem:[#allocation8 + $0x8b8] sm:$0xff] }
 0x15a   : > { %4504 = vmatprep.subr.bf16.mxu0 %v4503_v41  ;;  %4648 = vmatprep.subr.bf16.mxu1 %v4647_v45  ;;  %v4665_v41 = vpack.c.bf16 %v438_v33, %v433_v32  ;;  %v448_v45 = vld [vmem:[#allocation8 + $0x138] sm:$0xff]  ;;  %v4699_v47 = vpack.c.bf16 %v688_v40, %v683_v39  ;;  %v483_v32 = vld [vmem:[#allocation8 + $0x250] sm:$0xff] }
 0x15b   : > { %v488_v33 = vld [vmem:[#allocation8 + $0x278] sm:$0xff] }
 0x15c   : > { %v4685_v39 = vpack.c.bf16 %v488_v33, %v483_v32  ;;  %v1452_v32 = vld [vmem:[#allocation10 + $0x158] sm:$0xff]  ;;  %v1455_v33 = vld [vmem:[#allocation10 + $0x170] sm:$0xff] }
 0x15d   : > { %4506 = vmatpush1.bf16.msra.mxu0 %v4505_v52  ;;  %4650 = vmatpush1.bf16.msra.mxu1 %v4649_v53  ;;  %v693_v52 = vld [vmem:[#allocation8 + $0x8e0] sm:$0xff]  ;;  %v4669_v53 = vpack.c.bf16 %v448_v45, %v443_v44  ;;  %v1412_v45 = vld [vmem:[#allocation10 + $0x18] sm:$0xff] }
 0x15e   : > { %4508 = vmatprep.subr.bf16.mxu0 %v4507_v54  ;;  %4652 = vmatprep.subr.bf16.mxu1 %v4651_v58  ;;  %v4671_v54 = vpack.c.bf16 %v538_v51, %v533_v50  ;;  %v1409_v44 = vld [vmem:[#allocation10] sm:$0xff]  ;;  %v5781_v50 = vmov 0.0|0.0  }
 0x15f   : > { %v4733_v51 = vpack.c.bf16 %v1412_v45, %v1409_v44  ;;  %v1467_v44 = vld [vmem:[#allocation10 + $0x1d0] sm:$0xff] }
 0x161   : > { %4510 = vmatpush1.bf16.msra.mxu0 %v4509_v0  ;;  %4654 = vmatpush1.bf16.msra.mxu1 %v4653_v1  ;;  %v4673_v0 = vpack.c.bf16 %v458_v56, %v453_v55  ;;  %v4705_v1 = vpack.c.bf16 %v618_v59, %v613_v57  ;;  %v1422_v55 = vld [vmem:[#allocation10 + $0x68] sm:$0xff]  ;;  %v1425_v56 = vld [vmem:[#allocation10 + $0x80] sm:$0xff] }
 0x162   : > { %4656 = vmatprep.subr.bf16.mxu0 %v4655_v2  ;;  %4688 = vmatprep.subr.bf16.mxu1 %v4687_v6  ;;  %v4675_v2 = vpack.c.bf16 %v548_v61, %v543_v60  ;;  %v4707_v6 = vpack.c.bf16 %v708_v63, %v703_v62  ;;  %v753_v60 = vld [vmem:[#allocation8 + $0xac0] sm:$0xff]  ;;  %v758_v61 = vld [vmem:[#allocation8 + $0xae8] sm:$0xff]  ;;  %v4739_v62 = vpack.c.bf16 %v1425_v56, %v1422_v55  ;;  %v1476_v55 = vld [vmem:[#allocation10 + $0x218] sm:$0xff] }
 0x163   : > { %v1421_v63 = vld [vmem:[#allocation10 + $0x60] sm:$0xff]  ;;  %v1479_v56 = vld [vmem:[#allocation10 + $0x230] sm:$0xff] }
 0x164   : > { %3950 = vmatmul.mubr.msk.f32.vlgmr.msra.gmra.mrb[0].mxu0 %vm769_vm0, %v6123_v12  ;;  %3951 = vmatmul.mubr.msk.f32.vlgmr.msra.gmra.mrb[0].mxu1 %vm769_vm0, %v6123_v12 }
 0x165   : > { %4658 = vmatpush3.bf16.msra.mxu0 %v4657_v13  ;;  %4690 = vmatpush3.bf16.msra.mxu1 %v4689_v14  ;;  %v4677_v13 = vpack.c.bf16 %v468_v4, %v463_v3  ;;  %v4709_v14 = vpack.c.bf16 %v628_v7, %v623_v5  ;;  %v763_v3 = vld [vmem:[#allocation8 + $0xb10] sm:$0xff]  ;;  %v768_v4 = vld [vmem:[#allocation8 + $0xb38] sm:$0xff]  ;;  %v1430_v7 = vld [vmem:[#allocation10 + $0xa8] sm:$0xff] }
 0x166   : > { %4660 = vmatprep.subr.bf16.mxu0 %v4659_v17  ;;  %4692 = vmatprep.subr.bf16.mxu1 %v4691_v21  ;;  %v4679_v17 = vpack.c.bf16 %v558_v9, %v553_v8  ;;  %v4711_v21 = vpack.c.bf16 %v718_v11, %v713_v10  ;;  %v1434_v8 = vld [vmem:[#allocation10 + $0xc8] sm:$0xff]  ;;  %v1437_v9 = vld [vmem:[#allocation10 + $0xe0] sm:$0xff]  ;;  %v4729_v10 = vpack.c.bf16 %v768_v4, %v763_v3 }
 0x167   : > { %1263 = vmatprep.mubr.f32.mxu0 %v6101_v16  ;;  %1333 = vmatprep.mubr.f32.mxu1 %v6111_v25  ;;  %v698_v16 = vld [vmem:[#allocation8 + $0x908] sm:$0xff]  ;;  %v4701_v25 = vpack.c.bf16 %v608_v48, %v603_v46  ;;  %v1416_v46 = vld [vmem:[#allocation10 + $0x38] sm:$0xff] }
 0x168   : > { %v4703_v58 = vpack.c.bf16 %v698_v16, %v693_v52  ;;  %v743_v52 = vld [vmem:[#allocation8 + $0xa70] sm:$0xff]  ;;  %v748_v16 = vld [vmem:[#allocation8 + $0xa98] sm:$0xff] }
 0x169   : > { %4662 = vmatpush3.bf16.msra.mxu0 %v4661_v29  ;;  %4694 = vmatpush3.bf16.msra.mxu1 %v4693_v30  ;;  %v4681_v29 = vpack.c.bf16 %v478_v19, %v473_v18  ;;  %v4713_v30 = vpack.c.bf16 %v638_v22, %v633_v20  ;;  %v4723_v57 = vpack.c.bf16 %v748_v16, %v743_v52  ;;  %v1440_v18 = vld [vmem:[#allocation10 + $0xf8] sm:$0xff]  ;;  %v1443_v19 = vld [vmem:[#allocation10 + $0x110] sm:$0xff]  ;;  %v1473_v52 = vld [vmem:[#allocation10 + $0x200] sm:$0xff] }
 0x16a   : > { %4664 = vmatprep.subr.bf16.mxu0 %v4663_v31  ;;  %4696 = vmatprep.subr.bf16.mxu1 %v4695_v35  ;;  %v4683_v31 = vpack.c.bf16 %v568_v24, %v563_v23  ;;  %v643_v35 = vld [vmem:[#allocation8 + $0x750] sm:$0xff]  ;;  %v1442_v23 = vld [vmem:[#allocation10 + $0x108] sm:$0xff] }
 0x16b   : > { %v4717_v40 = vpack.c.bf16 %v648_v36, %v643_v35  ;;  %v1439_v22 = vld [vmem:[#allocation10 + $0xf0] sm:$0xff]  ;;  %v1446_v24 = vld [vmem:[#allocation10 + $0x128] sm:$0xff]  ;;  %v4759_v35 = vpack.c.bf16 %v1455_v33, %v1452_v32 }
 0x16c   : > { %v4753_v28 = vpack.c.bf16 %v1442_v23, %v1439_v22  ;;  %v1451_v36 = vld [vmem:[#allocation10 + $0x150] sm:$0xff]  ;;  %v1506_v22 = vld [vmem:[#allocation10 + $0x308] sm:$0xff]  ;;  %v1509_v23 = vld [vmem:[#allocation10 + $0x320] sm:$0xff] }
 0x16d   : > { %4666 = vmatpush3.bf16.msra.mxu0 %v4665_v41  ;;  %4698 = vmatpush3.bf16.msra.mxu1 %v4697_v42  ;;  %v733_v41 = vld [vmem:[#allocation8 + $0xa20] sm:$0xff]  ;;  %v738_v42 = vld [vmem:[#allocation8 + $0xa48] sm:$0xff] }
 0x16e   : > { %4668 = vmatprep.subr.bf16.mxu0 %v4667_v43  ;;  %4700 = vmatprep.subr.bf16.mxu1 %v4699_v47  ;;  %v4731_v43 = vpack.c.bf16 %v1413_v38, %v1410_v37  ;;  %v1419_v47 = vld [vmem:[#allocation10 + $0x50] sm:$0xff]  ;;  %v4720_v48 = vpack.c.bf16 %v738_v42, %v733_v41  ;;  %v1454_v37 = vld [vmem:[#allocation10 + $0x168] sm:$0xff]  ;;  %v1457_v41 = vld [vmem:[#allocation10 + $0x180] sm:$0xff] }
 0x16f   : > { %v1458_v38 = vld [vmem:[#allocation10 + $0x188] sm:$0xff]  ;;  %v1460_v42 = vld [vmem:[#allocation10 + $0x198] sm:$0xff] }
 0x170   : > { %v4765_v45 = vpack.c.bf16 %v1460_v42, %v1457_v41  ;;  %v6143_v32 = vld [vmem:[%s6077_s9] sm:$0xff] }
 0x171   : > { %4670 = vmatpush3.bf16.msra.mxu0 %v4669_v53  ;;  %4702 = vmatpush3.bf16.msra.mxu1 %v4701_v25  ;;  %v4735_v53 = vpack.c.bf16 %v1419_v47, %v1416_v46  ;;  %v1415_v25 = vld [vmem:[#allocation10 + $0x30] sm:$0xff]  ;;  %v1517_v41 = vld [vmem:[#allocation10 + $0x360] sm:$0xff]  ;;  %v1520_v42 = vld [vmem:[#allocation10 + $0x378] sm:$0xff] }
 0x172   : > { %4672 = vmatprep.subr.bf16.mxu0 %v4671_v54  ;;  %4704 = vmatprep.subr.bf16.mxu1 %v4703_v58  ;;  %v1418_v54 = vld [vmem:[#allocation10 + $0x48] sm:$0xff]  ;;  %v1463_v47 = vld [vmem:[#allocation10 + $0x1b0] sm:$0xff] }
 0x173   : > { %v400_v58 = vld [vmem:[%s6077_s9 + $0x8] sm:$0xff]  ;;  %v4737_v59 = vpack.c.bf16 %v1418_v54, %v1415_v25  ;;  %v1472_v54 = vld [vmem:[#allocation10 + $0x1f8] sm:$0xff] }
 0x174   : > { %v1469_v25 = vld [vmem:[#allocation10 + $0x1e0] sm:$0xff] }
 0x175   : > { %4674 = vmatpush3.bf16.msra.mxu0 %v4673_v0  ;;  %4706 = vmatpush3.bf16.msra.mxu1 %v4705_v1  ;;  %v1424_v0 = vld [vmem:[#allocation10 + $0x78] sm:$0xff]  ;;  %v1431_v1 = vld [vmem:[#allocation10 + $0xb0] sm:$0xff] }
 0x176   : > { %4676 = vmatprep.subr.bf16.mxu0 %v4675_v2  ;;  %4708 = vmatprep.subr.bf16.mxu1 %v4707_v6  ;;  %v4741_v2 = vpack.c.bf16 %v1424_v0, %v1421_v63  ;;  %v1427_v6 = vld [vmem:[#allocation10 + $0x90] sm:$0xff] }
 0x177   : > { %v4745_v11 = vpack.c.bf16 %v1430_v7, %v1427_v6  ;;  %v1490_v6 = vld [vmem:[#allocation10 + $0x288] sm:$0xff] }
 0x178   : > { %v1494_v7 = vld [vmem:[#allocation10 + $0x2a8] sm:$0xff] }
 0x179   : > { %4678 = vmatpush3.bf16.msra.mxu0 %v4677_v13  ;;  %4710 = vmatpush3.bf16.msra.mxu1 %v4709_v14  ;;  %v4747_v13 = vpack.c.bf16 %v1437_v9, %v1434_v8  ;;  %v1433_v14 = vld [vmem:[#allocation10 + $0xc0] sm:$0xff] }
 0x17a   : > { %4680 = vmatprep.subr.bf16.mxu0 %v4679_v17  ;;  %4712 = vmatprep.subr.bf16.mxu1 %v4711_v21  ;;  %v1436_v17 = vld [vmem:[#allocation10 + $0xd8] sm:$0xff]  ;;  %v4751_v21 = vpack.c.bf16 %v1443_v19, %v1440_v18  ;;  %v1497_v8 = vld [vmem:[#allocation10 + $0x2c0] sm:$0xff] }
 0x17b   : > { %v4749_v20 = vpack.c.bf16 %v1436_v17, %v1433_v14  ;;  %v1500_v14 = vld [vmem:[#allocation10 + $0x2d8] sm:$0xff]  ;;  %v1503_v17 = vld [vmem:[#allocation10 + $0x2f0] sm:$0xff] }
 0x17c   : > { %v4791_v19 = vpack.c.bf16 %v1503_v17, %v1500_v14  ;;  %v1560_v14 = vld [vmem:[#allocation10 + $0x4b8] sm:$0xff]  ;;  %v1563_v17 = vld [vmem:[#allocation10 + $0x4d0] sm:$0xff] }
 0x17d   : > { %4682 = vmatpush3.bf16.msra.mxu0 %v4681_v29  ;;  %4714 = vmatpush3.bf16.msra.mxu1 %v4713_v30  ;;  %v4755_v29 = vpack.c.bf16 %v1449_v27, %v1446_v24  ;;  %v1445_v30 = vld [vmem:[#allocation10 + $0x120] sm:$0xff]  ;;  %v4795_v27 = vpack.c.bf16 %v1509_v23, %v1506_v22  ;;  %v1566_v22 = vld [vmem:[#allocation10 + $0x4e8] sm:$0xff] }
 0x17e   : > { %4684 = vmatprep.subr.bf16.mxu0 %v4683_v31  ;;  %4716 = vmatprep.subr.bf16.mxu1 %v4715_v34  ;;  %v1448_v31 = vld [vmem:[#allocation10 + $0x138] sm:$0xff]  ;;  %v1569_v23 = vld [vmem:[#allocation10 + $0x500] sm:$0xff] }
 0x17f   : > { %v4757_v34 = vpack.c.bf16 %v1448_v31, %v1445_v30  ;;  %v1512_v30 = vld [vmem:[#allocation10 + $0x338] sm:$0xff]  ;;  %v1515_v31 = vld [vmem:[#allocation10 + $0x350] sm:$0xff] }
 0x181   : > { %4686 = vmatpush3.bf16.msra.mxu0 %v4685_v39  ;;  %4718 = vmatpush3.bf16.msra.mxu1 %v4717_v40  ;;  %v1461_v39 = vld [vmem:[#allocation10 + $0x1a0] sm:$0xff] }
 0x182   : > { %4719 = vmatprep.subr.bf16.mxu0 %v5781_v50  ;;  %4732 = vmatprep.subr.bf16.mxu1 %v4731_v43  ;;  %v4763_v40 = vpack.c.bf16 %v1461_v39, %v1458_v38  ;;  %v1464_v43 = vld [vmem:[#allocation10 + $0x1b8] sm:$0xff]  ;;  %v1518_v38 = vld [vmem:[#allocation10 + $0x368] sm:$0xff]  ;;  %v1521_v39 = vld [vmem:[#allocation10 + $0x380] sm:$0xff] }
 0x183   : > { %v4767_v46 = vpack.c.bf16 %v1467_v44, %v1464_v43  ;;  %v1524_v43 = vld [vmem:[#allocation10 + $0x398] sm:$0xff]  ;;  %v1527_v44 = vld [vmem:[#allocation10 + $0x3b0] sm:$0xff] }
 0x184   : > { %1264 = vmatmul.mubr.f32.vlgmr.msra.gmra.mrb[2].mxu0 %v6106_v15  ;;  %1334 = vmatmul.mubr.f32.vlgmr.msra.gmra.mrb[2].mxu1 %v6116_v26  ;;  %v1428_v15 = vld [vmem:[#allocation10 + $0x98] sm:$0xff]  ;;  %v4726_v26 = vpack.c.bf16 %v758_v61, %v753_v60  ;;  %v1478_v60 = vld [vmem:[#allocation10 + $0x228] sm:$0xff] }
 0x185   : > { %4721 = vmatpush3.bf16.msra.mxu0 %v4720_v48  ;;  %4734 = vmatpush1.bf16.msra.mxu1 %v4733_v51  ;;  %v4743_v5 = vpack.c.bf16 %v1431_v1, %v1428_v15  ;;  %v1466_v48 = vld [vmem:[#allocation10 + $0x1c8] sm:$0xff]  ;;  %v1481_v15 = vld [vmem:[#allocation10 + $0x240] sm:$0xff]  ;;  %v1484_v1 = vld [vmem:[#allocation10 + $0x258] sm:$0xff] }
 0x186   : > { %4722 = vmatprep.subr.bf16.mxu0 %v5781_v50  ;;  %4736 = vmatprep.subr.bf16.mxu1 %v4735_v53  ;;  %v1470_v51 = vld [vmem:[#allocation10 + $0x1e8] sm:$0xff]  ;;  %v4769_v16 = vpack.c.bf16 %v1466_v48, %v1463_v47  ;;  %v4781_v3 = vpack.c.bf16 %v1484_v1, %v1481_v15  ;;  %v1523_v47 = vld [vmem:[#allocation10 + $0x390] sm:$0xff]  ;;  %v1541_v15 = vld [vmem:[#allocation10 + $0x420] sm:$0xff] }
 0x187   : > { %4260 = vmatprep.mubr.msk.f32.mxu0 %vm5782_vm1, %v5780_v49  ;;  %1692 = vmatprep.mubr.f32.mxu1 %v400_v58  ;;  %v4771_v53 = vpack.c.bf16 %v1473_v52, %v1470_v51  ;;  %v1482_v61 = vld [vmem:[#allocation10 + $0x248] sm:$0xff]  ;;  %v1533_v52 = vld [vmem:[#allocation10 + $0x3e0] sm:$0xff]  ;;  %v1544_v1 = vld [vmem:[#allocation10 + $0x438] sm:$0xff] }
 0x188   : > { %v1526_v48 = vld [vmem:[#allocation10 + $0x3a8] sm:$0xff] }
 0x189   : > { %4724 = vmatpush3.bf16.msra.mxu0 %v4723_v57  ;;  %4738 = vmatpush1.bf16.msra.mxu1 %v4737_v59  ;;  %v4773_v57 = vpack.c.bf16 %v1472_v54, %v1469_v25  ;;  %v1475_v59 = vld [vmem:[#allocation10 + $0x210] sm:$0xff]  ;;  %v1530_v51 = vld [vmem:[#allocation10 + $0x3c8] sm:$0xff]  ;;  %v1529_v25 = vld [vmem:[#allocation10 + $0x3c0] sm:$0xff] }
 0x18a   : > { %4725 = vmatprep.subr.bf16.mxu0 %v5781_v50  ;;  %4740 = vmatprep.subr.bf16.mxu1 %v4739_v62  ;;  %v1485_v62 = vld [vmem:[#allocation10 + $0x260] sm:$0xff]  ;;  %v4777_v63 = vpack.c.bf16 %v1478_v60, %v1475_v59  ;;  %v1532_v54 = vld [vmem:[#allocation10 + $0x3d8] sm:$0xff]  ;;  %v1535_v59 = vld [vmem:[#allocation10 + $0x3f0] sm:$0xff] }
 0x18b   : > { %v4779_v0 = vpack.c.bf16 %v1485_v62, %v1482_v61  ;;  %v1538_v60 = vld [vmem:[#allocation10 + $0x408] sm:$0xff]  ;;  %v1545_v62 = vld [vmem:[#allocation10 + $0x440] sm:$0xff] }
 0x18c   : > { %v1542_v61 = vld [vmem:[#allocation10 + $0x428] sm:$0xff] }
 0x18d   : > { %4727 = vmatpush3.bf16.msra.mxu0 %v4726_v26  ;;  %4742 = vmatpush1.bf16.msra.mxu1 %v4741_v2  ;;  %v1488_v26 = vld [vmem:[#allocation10 + $0x278] sm:$0xff]  ;;  %v1491_v2 = vld [vmem:[#allocation10 + $0x290] sm:$0xff] }
 0x18e   : > { %4728 = vmatprep.subr.bf16.mxu0 %v5781_v50  ;;  %4744 = vmatprep.subr.bf16.mxu1 %v4743_v5  ;;  %v4783_v4 = vpack.c.bf16 %v1491_v2, %v1488_v26  ;;  %v1487_v5 = vld [vmem:[#allocation10 + $0x270] sm:$0xff]  ;;  %v1548_v26 = vld [vmem:[#allocation10 + $0x458] sm:$0xff] }
 0x18f   : > { %v4785_v9 = vpack.c.bf16 %v1490_v6, %v1487_v5  ;;  %v1551_v2 = vld [vmem:[#allocation10 + $0x470] sm:$0xff]  ;;  %v1550_v6 = vld [vmem:[#allocation10 + $0x468] sm:$0xff] }
 0x190   : > { %v1547_v5 = vld [vmem:[#allocation10 + $0x450] sm:$0xff] }
 0x191   : > { %4730 = vmatpush3.bf16.msra.mxu0 %v4729_v10  ;;  %4746 = vmatpush1.bf16.msra.mxu1 %v4745_v11  ;;  %v4787_v10 = vpack.c.bf16 %v1497_v8, %v1494_v7  ;;  %v1493_v11 = vld [vmem:[#allocation10 + $0x2a0] sm:$0xff]  ;;  %v1554_v7 = vld [vmem:[#allocation10 + $0x488] sm:$0xff] }
 0x192   : > { %4748 = vmatprep.subr.bf16.mxu1 %v4747_v13  ;;  %v1496_v13 = vld [vmem:[#allocation10 + $0x2b8] sm:$0xff]  ;;  %v1557_v8 = vld [vmem:[#allocation10 + $0x4a0] sm:$0xff] }
 0x193   : > { %v4789_v18 = vpack.c.bf16 %v1496_v13, %v1493_v11  ;;  %v1553_v11 = vld [vmem:[#allocation10 + $0x480] sm:$0xff]  ;;  %v1556_v13 = vld [vmem:[#allocation10 + $0x498] sm:$0xff] }
 0x194   : > { %4261 = vmatmul.mubr.msk.f32.vlgmr.msra.gmra.mrb[4].mxu0 %vm769_vm0, %v6123_v12  ;;  %v4761_v12 = vpack.c.bf16 %v1454_v37, %v1451_v36  ;;  %v1514_v36 = vld [vmem:[#allocation10 + $0x348] sm:$0xff]  ;;  %v6146_v37 = vld [vmem:[%s6077_s9 + $0x18] sm:$0xff] }
 0x195   : > { %1905 = vmatprep.mubr.f32.mxu0 %v400_v58  ;;  %4750 = vmatpush1.bf16.msra.mxu1 %v4749_v20  ;;  %v4775_v58 = vpack.c.bf16 %v1479_v56, %v1476_v55  ;;  %v1499_v20 = vld [vmem:[#allocation10 + $0x2d0] sm:$0xff]  ;;  %v1536_v55 = vld [vmem:[#allocation10 + $0x3f8] sm:$0xff] }
 0x196   : > { %4752 = vmatprep.subr.bf16.mxu1 %v4751_v21  ;;  %v1502_v21 = vld [vmem:[#allocation10 + $0x2e8] sm:$0xff]  ;;  %v1539_v56 = vld [vmem:[#allocation10 + $0x410] sm:$0xff] }
 0x197   : > { %v4793_v24 = vpack.c.bf16 %v1502_v21, %v1499_v20  ;;  %v1559_v20 = vld [vmem:[#allocation10 + $0x4b0] sm:$0xff]  ;;  %v1562_v21 = vld [vmem:[#allocation10 + $0x4c8] sm:$0xff] }
 0x199   : > { %4754 = vmatpush1.bf16.msra.mxu1 %v4753_v28  ;;  %v1505_v28 = vld [vmem:[#allocation10 + $0x300] sm:$0xff] }
 0x19a   : > { %4756 = vmatprep.subr.bf16.mxu1 %v4755_v29  ;;  %v1508_v29 = vld [vmem:[#allocation10 + $0x318] sm:$0xff] }
 0x19b   : > { %v4797_v33 = vpack.c.bf16 %v1508_v29, %v1505_v28  ;;  %v4833_v28 = vpack.c.bf16 %v1562_v21, %v1559_v20  ;;  %v1565_v29 = vld [vmem:[#allocation10 + $0x4e0] sm:$0xff] }
 0x19c   : > { %v1589_v21 = vld [vmem:[#allocation10 + $0x5a0] sm:$0xff] }
 0x19d   : > { %4758 = vmatpush1.bf16.msra.mxu1 %v4757_v34  ;;  %v4799_v34 = vpack.c.bf16 %v1515_v31, %v1512_v30  ;;  %v1411_v31 = vld [vmem:[#allocation10 + $0x10] sm:$0xff] }
 0x19e   : > { %4760 = vmatprep.subr.bf16.mxu1 %v4759_v35  ;;  %v1511_v35 = vld [vmem:[#allocation10 + $0x330] sm:$0xff] }
 0x1a1   : > { %4762 = vmatpush1.bf16.msra.mxu1 %v4761_v12  ;;  %v4801_v12 = vpack.c.bf16 %v1514_v36, %v1511_v35  ;;  %v1568_v35 = vld [vmem:[#allocation10 + $0x4f8] sm:$0xff] }
 0x1a2   : > { %4764 = vmatprep.subr.bf16.mxu1 %v4763_v40  ;;  %v4803_v40 = vpack.c.bf16 %v1521_v39, %v1518_v38  ;;  %v1572_v36 = vld [vmem:[#allocation10 + $0x518] sm:$0xff]  ;;  %v1575_v38 = vld [vmem:[#allocation10 + $0x530] sm:$0xff] }
 0x1a5   : > { %4766 = vmatpush1.bf16.msra.mxu1 %v4765_v45  ;;  %v4805_v45 = vpack.c.bf16 %v1520_v42, %v1517_v41  ;;  %v1417_v41 = vld [vmem:[#allocation10 + $0x40] sm:$0xff] }
 0x1a6   : > { %4768 = vmatprep.subr.bf16.mxu1 %v4767_v46  ;;  %v4807_v46 = vpack.c.bf16 %v1527_v44, %v1524_v43  ;;  %v1420_v43 = vld [vmem:[#allocation10 + $0x58] sm:$0xff]  ;;  %v1471_v44 = vld [vmem:[#allocation10 + $0x1f0] sm:$0xff] }
 0x1a9   : > { %4770 = vmatpush1.bf16.msra.mxu1 %v4769_v16  ;;  %v4809_v16 = vpack.c.bf16 %v1526_v48, %v1523_v47  ;;  %v1571_v47 = vld [vmem:[#allocation10 + $0x510] sm:$0xff]  ;;  %v4881_v48 = vpack.c.bf16 %v1420_v43, %v1417_v41  ;;  %v1598_v41 = vld [vmem:[#allocation10 + $0x5e8] sm:$0xff]  ;;  %v1504_v43 = vld [vmem:[#allocation10 + $0x2f8] sm:$0xff] }
 0x1aa   : > { %4772 = vmatprep.subr.bf16.mxu1 %v4771_v53  ;;  %v4811_v53 = vpack.c.bf16 %v1533_v52, %v1530_v51  ;;  %v1423_v52 = vld [vmem:[#allocation10 + $0x70] sm:$0xff] }
 0x1ad   : > { %4774 = vmatpush1.bf16.msra.mxu1 %v4773_v57  ;;  %v4813_v57 = vpack.c.bf16 %v1532_v54, %v1529_v25  ;;  %v1574_v25 = vld [vmem:[#allocation10 + $0x528] sm:$0xff]  ;;  %v1477_v54 = vld [vmem:[#allocation10 + $0x220] sm:$0xff] }
 0x1ae   : > { %4776 = vmatprep.subr.bf16.mxu1 %v4775_v58  ;;  %v4815_v58 = vpack.c.bf16 %v1539_v56, %v1536_v55  ;;  %v1480_v55 = vld [vmem:[#allocation10 + $0x238] sm:$0xff]  ;;  %v1578_v56 = vld [vmem:[#allocation10 + $0x548] sm:$0xff] }
 0x1b1   : > { %4778 = vmatpush1.bf16.msra.mxu1 %v4777_v63  ;;  %v4817_v63 = vpack.c.bf16 %v1538_v60, %v1535_v59  ;;  %v4841_v59 = vpack.c.bf16 %v1574_v25, %v1571_v47  ;;  %v1577_v60 = vld [vmem:[#allocation10 + $0x540] sm:$0xff]  ;;  %v1604_v25 = vld [vmem:[#allocation10 + $0x618] sm:$0xff] }
 0x1b2   : > { %4780 = vmatprep.subr.bf16.mxu1 %v4779_v0  ;;  %v4819_v0 = vpack.c.bf16 %v1545_v62, %v1542_v61  ;;  %v4887_v61 = vpack.c.bf16 %v1480_v55, %v1477_v54  ;;  %v1429_v62 = vld [vmem:[#allocation10 + $0xa0] sm:$0xff]  ;;  %v1608_v54 = vld [vmem:[#allocation10 + $0x638] sm:$0xff]  ;;  %v1611_v55 = vld [vmem:[#allocation10 + $0x650] sm:$0xff] }
 0x1b5   : > { %4782 = vmatpush1.bf16.msra.mxu1 %v4781_v3  ;;  %v4821_v3 = vpack.c.bf16 %v1544_v1, %v1541_v15  ;;  %v1580_v15 = vld [vmem:[#allocation10 + $0x558] sm:$0xff]  ;;  %v1483_v1 = vld [vmem:[#allocation10 + $0x250] sm:$0xff] }
 0x1b6   : > { %4784 = vmatprep.subr.bf16.mxu1 %v4783_v4  ;;  %v4823_v4 = vpack.c.bf16 %v1551_v2, %v1548_v26  ;;  %v1486_v26 = vld [vmem:[#allocation10 + $0x268] sm:$0xff]  ;;  %v1584_v2 = vld [vmem:[#allocation10 + $0x578] sm:$0xff] }
 0x1b9   : > { %4786 = vmatpush1.bf16.msra.mxu1 %v4785_v9  ;;  %v4825_v9 = vpack.c.bf16 %v1550_v6, %v1547_v5  ;;  %v4845_v5 = vpack.c.bf16 %v1580_v15, %v1577_v60  ;;  %v1583_v6 = vld [vmem:[#allocation10 + $0x570] sm:$0xff]  ;;  %v1610_v15 = vld [vmem:[#allocation10 + $0x648] sm:$0xff] }
 0x1ba   : > { %4788 = vmatprep.subr.bf16.mxu1 %v4787_v10  ;;  %v4827_v10 = vpack.c.bf16 %v1557_v8, %v1554_v7  ;;  %v4891_v7 = vpack.c.bf16 %v1486_v26, %v1483_v1  ;;  %v1435_v8 = vld [vmem:[#allocation10 + $0xd0] sm:$0xff]  ;;  %v1561_v26 = vld [vmem:[#allocation10 + $0x4c0] sm:$0xff] }
 0x1bd   : > { %4790 = vmatpush1.bf16.msra.mxu1 %v4789_v18  ;;  %v4829_v18 = vpack.c.bf16 %v1556_v13, %v1553_v11  ;;  %v1586_v11 = vld [vmem:[#allocation10 + $0x588] sm:$0xff]  ;;  %v1489_v13 = vld [vmem:[#allocation10 + $0x280] sm:$0xff] }
 0x1be   : > { %4792 = vmatprep.subr.bf16.mxu1 %v4791_v19  ;;  %v4831_v19 = vpack.c.bf16 %v1563_v17, %v1560_v14  ;;  %v1492_v14 = vld [vmem:[#allocation10 + $0x298] sm:$0xff]  ;;  %v1590_v17 = vld [vmem:[#allocation10 + $0x5a8] sm:$0xff]  ;;  %v4849_v20 = vpack.c.bf16 %v1586_v11, %v1583_v6 }
 0x1c1   : > { %4794 = vmatpush1.bf16.msra.mxu1 %v4793_v24  ;;  %v1459_v24 = vld [vmem:[#allocation10 + $0x190] sm:$0xff] }
 0x1c2   : > { %4796 = vmatprep.subr.bf16.mxu1 %v4795_v27  ;;  %v1462_v27 = vld [vmem:[#allocation10 + $0x1a8] sm:$0xff] }
 0x1c3   : > { %v4875_v30 = vpack.c.bf16 %v1462_v27, %v1459_v24  ;;  %v1444_v24 = vld [vmem:[#allocation10 + $0x118] sm:$0xff] }
 0x1c4   : > { %1693 = vmatmul.mubr.f32.vlgmr.msra.gmra.mrb[4].mxu1 %v6143_v32 }
 0x1c5   : > { %4798 = vmatpush1.bf16.msra.mxu1 %v4797_v33  ;;  %1763 = vmatprep.mubr.f32.mxu1 %v6146_v37  ;;  %v1414_v33 = vld [vmem:[#allocation10 + $0x28] sm:$0xff] }
 0x1c6   : > { %4800 = vmatprep.subr.bf16.mxu1 %v4799_v34  ;;  %v4835_v34 = vpack.c.bf16 %v1569_v23, %v1566_v22  ;;  %v4877_v39 = vpack.c.bf16 %v1414_v33, %v1411_v31  ;;  %4876 = vmatprep.subr.bf16.mxu0 %v4875_v30  ;;  %v4895_v22 = vpack.c.bf16 %v1492_v14, %v1489_v13  ;;  %v1441_v23 = vld [vmem:[#allocation10 + $0x100] sm:$0xff]  ;;  %v1498_v30 = vld [vmem:[#allocation10 + $0x2c8] sm:$0xff]  ;;  %v1596_v31 = vld [vmem:[#allocation10 + $0x5d8] sm:$0xff] }
 0x1c7   : > { %v1599_v33 = vld [vmem:[#allocation10 + $0x5f0] sm:$0xff]  ;;  %v1616_v13 = vld [vmem:[#allocation10 + $0x678] sm:$0xff] }
 0x1c8   : > { %4878 = vmatpush3.bf16.msra.mxu0 %v4877_v39  ;;  %v1447_v39 = vld [vmem:[#allocation10 + $0x130] sm:$0xff] }
 0x1c9   : > { %4802 = vmatpush1.bf16.msra.mxu1 %v4801_v12  ;;  %v1465_v12 = vld [vmem:[#allocation10 + $0x1c0] sm:$0xff]  ;;  %v1567_v14 = vld [vmem:[#allocation10 + $0x4f0] sm:$0xff] }
 0x1ca   : > { %4804 = vmatprep.subr.bf16.mxu1 %v4803_v40  ;;  %v1468_v40 = vld [vmem:[#allocation10 + $0x1d8] sm:$0xff] }
 0x1cb   : > { %v4879_v42 = vpack.c.bf16 %v1468_v40, %v1465_v12  ;;  %v1450_v12 = vld [vmem:[#allocation10 + $0x148] sm:$0xff]  ;;  %v4855_v40 = vpack.c.bf16 %v1599_v33, %v1596_v31  ;;  %v1576_v31 = vld [vmem:[#allocation10 + $0x538] sm:$0xff] }
 0x1cd   : > { %4806 = vmatpush1.bf16.msra.mxu1 %v4805_v45  ;;  %v1474_v45 = vld [vmem:[#allocation10 + $0x208] sm:$0xff]  ;;  %4880 = vmatprep.subr.bf16.mxu0 %v4879_v42  ;;  %v1501_v42 = vld [vmem:[#allocation10 + $0x2e0] sm:$0xff] }
 0x1ce   : > { %4808 = vmatprep.subr.bf16.mxu1 %v4807_v46  ;;  %v4837_v46 = vpack.c.bf16 %v1568_v35, %v1565_v29  ;;  %v4883_v51 = vpack.c.bf16 %v1474_v45, %v1471_v44  ;;  %4882 = vmatpush3.bf16.msra.mxu0 %v4881_v48  ;;  %v1495_v29 = vld [vmem:[#allocation10 + $0x2b0] sm:$0xff]  ;;  %v1602_v44 = vld [vmem:[#allocation10 + $0x608] sm:$0xff]  ;;  %v1605_v45 = vld [vmem:[#allocation10 + $0x620] sm:$0xff]  ;;  %v4903_v48 = vpack.c.bf16 %v1504_v43, %v1501_v42 }
 0x1cf   : > { %v1534_v42 = vld [vmem:[#allocation10 + $0x3e8] sm:$0xff]  ;;  %v1585_v43 = vld [vmem:[#allocation10 + $0x580] sm:$0xff] }
 0x1d0   : > { %4884 = vmatprep.subr.bf16.mxu0 %v4883_v51  ;;  %v1453_v51 = vld [vmem:[#allocation10 + $0x160] sm:$0xff] }
 0x1d1   : > { %4810 = vmatpush1.bf16.msra.mxu1 %v4809_v16  ;;  %v1426_v16 = vld [vmem:[#allocation10 + $0x88] sm:$0xff] }
 0x1d2   : > { %4812 = vmatprep.subr.bf16.mxu1 %v4811_v53  ;;  %v4839_v53 = vpack.c.bf16 %v1575_v38, %v1572_v36  ;;  %v1595_v36 = vld [vmem:[#allocation10 + $0x5d0] sm:$0xff]  ;;  %v4899_v38 = vpack.c.bf16 %v1498_v30, %v1495_v29  ;;  %v1622_v29 = vld [vmem:[#allocation10 + $0x6a8] sm:$0xff]  ;;  %v1573_v30 = vld [vmem:[#allocation10 + $0x520] sm:$0xff] }
 0x1d3   : > { %v4857_v47 = vpack.c.bf16 %v1598_v41, %v1595_v36  ;;  %v1579_v36 = vld [vmem:[#allocation10 + $0x550] sm:$0xff] }
 0x1d4   : > { %v1531_v41 = vld [vmem:[#allocation10 + $0x3d0] sm:$0xff] }
 0x1d5   : > { %4814 = vmatpush1.bf16.msra.mxu1 %v4813_v57  ;;  %v1581_v57 = vld [vmem:[#allocation10 + $0x560] sm:$0xff] }
 0x1d6   : > { %4816 = vmatprep.subr.bf16.mxu1 %v4815_v58  ;;  %v4885_v58 = vpack.c.bf16 %v1426_v16, %v1423_v52  ;;  %v1456_v52 = vld [vmem:[#allocation10 + $0x178] sm:$0xff]  ;;  %v4859_v16 = vpack.c.bf16 %v1605_v45, %v1602_v44  ;;  %v4925_v45 = vpack.c.bf16 %v1534_v42, %v1531_v41 }
 0x1d7   : > { %v1588_v44 = vld [vmem:[#allocation10 + $0x598] sm:$0xff] }
 0x1d8   : > { %4886 = vmatpush3.bf16.msra.mxu0 %v4885_v58  ;;  %v6151_v58 = vld [vmem:[%s6077_s9 + $0x10] sm:$0xff] }
 0x1d9   : > { %4818 = vmatpush1.bf16.msra.mxu1 %v4817_v63  ;;  %v1432_v63 = vld [vmem:[#allocation10 + $0xb8] sm:$0xff]  ;;  %4888 = vmatprep.subr.bf16.mxu0 %v4887_v61  ;;  %v1607_v61 = vld [vmem:[#allocation10 + $0x630] sm:$0xff] }
 0x1da   : > { %4820 = vmatprep.subr.bf16.mxu1 %v4819_v0  ;;  %v4843_v0 = vpack.c.bf16 %v1581_v57, %v1578_v56  ;;  %v1555_v56 = vld [vmem:[#allocation10 + $0x490] sm:$0xff]  ;;  %v1558_v57 = vld [vmem:[#allocation10 + $0x4a8] sm:$0xff]  ;;  %v4865_v6 = vpack.c.bf16 %v1610_v15, %v1607_v61  ;;  %v1552_v61 = vld [vmem:[#allocation10 + $0x478] sm:$0xff] }
 0x1db   : > { %v4907_v1 = vpack.c.bf16 %v1558_v57, %v1555_v56  ;;  %v1600_v56 = vld [vmem:[#allocation10 + $0x5f8] sm:$0xff] }
 0x1dd   : > { %4822 = vmatpush1.bf16.msra.mxu1 %v4821_v3  ;;  %v1587_v3 = vld [vmem:[#allocation10 + $0x590] sm:$0xff] }
 0x1de   : > { %4824 = vmatprep.subr.bf16.mxu1 %v4823_v4  ;;  %v4889_v4 = vpack.c.bf16 %v1432_v63, %v1429_v62  ;;  %v1507_v62 = vld [vmem:[#allocation10 + $0x310] sm:$0xff]  ;;  %v1510_v63 = vld [vmem:[#allocation10 + $0x328] sm:$0xff] }
 0x1e0   : > { %4890 = vmatpush3.bf16.msra.mxu0 %v4889_v4  ;;  %v1617_v4 = vld [vmem:[#allocation10 + $0x680] sm:$0xff] }
 0x1e1   : > { %4826 = vmatpush1.bf16.msra.mxu1 %v4825_v9  ;;  %v1438_v9 = vld [vmem:[#allocation10 + $0xe8] sm:$0xff]  ;;  %4892 = vmatprep.subr.bf16.mxu0 %v4891_v7  ;;  %v1613_v7 = vld [vmem:[#allocation10 + $0x660] sm:$0xff] }
 0x1e2   : > { %4828 = vmatprep.subr.bf16.mxu1 %v4827_v10  ;;  %v4847_v10 = vpack.c.bf16 %v1587_v3, %v1584_v2  ;;  %v1564_v2 = vld [vmem:[#allocation10 + $0x4d8] sm:$0xff]  ;;  %v1614_v3 = vld [vmem:[#allocation10 + $0x668] sm:$0xff] }
 0x1e3   : > { %v4867_v11 = vpack.c.bf16 %v1617_v4, %v1614_v3  ;;  %v1618_v4 = vld [vmem:[#allocation10 + $0x688] sm:$0xff] }
 0x1e5   : > { %4830 = vmatpush1.bf16.msra.mxu1 %v4829_v18  ;;  %v1593_v18 = vld [vmem:[#allocation10 + $0x5c0] sm:$0xff] }
 0x1e6   : > { %4832 = vmatprep.subr.bf16.mxu1 %v4831_v19  ;;  %v4893_v19 = vpack.c.bf16 %v1438_v9, %v1435_v8  ;;  %v4851_v27 = vpack.c.bf16 %v1593_v18, %v1590_v17  ;;  %v4911_v8 = vpack.c.bf16 %v1564_v2, %v1561_v26  ;;  %v1513_v9 = vld [vmem:[#allocation10 + $0x340] sm:$0xff]  ;;  %v1570_v17 = vld [vmem:[#allocation10 + $0x508] sm:$0xff]  ;;  %v1620_v18 = vld [vmem:[#allocation10 + $0x698] sm:$0xff] }
 0x1e7   : > { %v1612_v26 = vld [vmem:[#allocation10 + $0x658] sm:$0xff]  ;;  %v1615_v2 = vld [vmem:[#allocation10 + $0x670] sm:$0xff] }
 0x1e8   : > { %4894 = vmatpush3.bf16.msra.mxu0 %v4893_v19  ;;  %v1623_v19 = vld [vmem:[#allocation10 + $0x6b0] sm:$0xff] }
 0x1e9   : > { %4834 = vmatpush1.bf16.msra.mxu1 %v4833_v28  ;;  %v1592_v28 = vld [vmem:[#allocation10 + $0x5b8] sm:$0xff]  ;;  %4896 = vmatprep.subr.bf16.mxu0 %v4895_v22  ;;  %v1619_v22 = vld [vmem:[#allocation10 + $0x690] sm:$0xff] }
 0x1ea   : > { %4836 = vmatprep.subr.bf16.mxu1 %v4835_v34  ;;  %v4897_v34 = vpack.c.bf16 %v1444_v24, %v1441_v23  ;;  %v4853_v35 = vpack.c.bf16 %v1592_v28, %v1589_v21  ;;  %v4869_v21 = vpack.c.bf16 %v1616_v13, %v1613_v7  ;;  %v4915_v23 = vpack.c.bf16 %v1570_v17, %v1567_v14  ;;  %v1519_v24 = vld [vmem:[#allocation10 + $0x370] sm:$0xff]  ;;  %v1624_v7 = vld [vmem:[#allocation10 + $0x6b8] sm:$0xff] }
 0x1eb   : > { %v4871_v28 = vpack.c.bf16 %v1623_v19, %v1620_v18 }
 0x1ec   : > { %4898 = vmatpush3.bf16.msra.mxu0 %v4897_v34  ;;  %v4919_v34 = vpack.c.bf16 %v1576_v31, %v1573_v30 }
 0x1ed   : > { %4838 = vmatpush1.bf16.msra.mxu1 %v4837_v46  ;;  %v4901_v46 = vpack.c.bf16 %v1450_v12, %v1447_v39  ;;  %4900 = vmatprep.subr.bf16.mxu0 %v4899_v38  ;;  %v1582_v38 = vld [vmem:[#allocation10 + $0x568] sm:$0xff] }
 0x1ee   : > { %4840 = vmatprep.subr.bf16.mxu1 %v4839_v53  ;;  %v1601_v53 = vld [vmem:[#allocation10 + $0x600] sm:$0xff] }
 0x1ef   : > { %v4861_v60 = vpack.c.bf16 %v1604_v25, %v1601_v53  ;;  %v6158_v12 = vld [vmem:[%s6077_s9 + $0x20] sm:$0xff]  ;;  %v1543_v25 = vld [vmem:[#allocation10 + $0x430] sm:$0xff] }
 0x1f0   : > { %4902 = vmatpush3.bf16.msra.mxu0 %v4901_v46  ;;  %v4927_v46 = vpack.c.bf16 %v1588_v44, %v1585_v43 }
 0x1f1   : > { %4842 = vmatpush1.bf16.msra.mxu1 %v4841_v59  ;;  %v4905_v59 = vpack.c.bf16 %v1456_v52, %v1453_v51  ;;  %4904 = vmatprep.subr.bf16.mxu0 %v4903_v48  ;;  %v1540_v48 = vld [vmem:[#allocation10 + $0x418] sm:$0xff]  ;;  %v1591_v51 = vld [vmem:[#allocation10 + $0x5b0] sm:$0xff]  ;;  %v1594_v52 = vld [vmem:[#allocation10 + $0x5c8] sm:$0xff] }
 0x1f2   : > { %4844 = vmatprep.subr.bf16.mxu1 %v4843_v0  ;;  %v4863_v0 = vpack.c.bf16 %v1611_v55, %v1608_v54  ;;  %v4931_v53 = vpack.c.bf16 %v1594_v52, %v1591_v51  ;;  %v1546_v54 = vld [vmem:[#allocation10 + $0x448] sm:$0xff]  ;;  %v1597_v55 = vld [vmem:[#allocation10 + $0x5e0] sm:$0xff] }
 0x1f3   : > { %v4933_v57 = vpack.c.bf16 %v1546_v54, %v1543_v25 }
 0x1f4   : > { %4906 = vmatpush3.bf16.msra.mxu0 %v4905_v59  ;;  %v4935_v59 = vpack.c.bf16 %v1600_v56, %v1597_v55 }
 0x1f5   : > { %4846 = vmatpush1.bf16.msra.mxu1 %v4845_v5  ;;  %v4909_v5 = vpack.c.bf16 %v1510_v63, %v1507_v62  ;;  %4908 = vmatprep.subr.bf16.mxu0 %v4907_v1  ;;  %v1603_v63 = vld [vmem:[#allocation10 + $0x610] sm:$0xff]  ;;  %v1609_v1 = vld [vmem:[#allocation10 + $0x640] sm:$0xff] }
 0x1f6   : > { %4848 = vmatprep.subr.bf16.mxu1 %v4847_v10  ;;  %v1516_v10 = vld [vmem:[#allocation10 + $0x358] sm:$0xff]  ;;  %v4943_v3 = vpack.c.bf16 %v1612_v26, %v1609_v1 }
 0x1f7   : > { %1906 = vmatmul.mubr.f32.vlgmr.msra.gmra.mrb[6].mxu0 %v6143_v32  ;;  %v4873_v32 = vpack.c.bf16 %v1622_v29, %v1619_v22 }
 0x1f8   : > { %4910 = vmatpush3.bf16.msra.mxu0 %v4909_v5  ;;  %1975 = vmatprep.mubr.f32.mxu0 %v6146_v37  ;;  %v1525_v37 = vld [vmem:[#allocation10 + $0x3a0] sm:$0xff]  ;;  %v4946_v5 = vpack.c.bf16 %v1618_v4, %v1615_v2 }
 0x1f9   : > { %4850 = vmatpush1.bf16.msra.mxu1 %v4849_v20  ;;  %v4913_v20 = vpack.c.bf16 %v1516_v10, %v1513_v9  ;;  %4912 = vmatprep.subr.bf16.mxu0 %v4911_v8 }
 0x1fa   : > { %4852 = vmatprep.subr.bf16.mxu1 %v4851_v27  ;;  %v1522_v27 = vld [vmem:[#allocation10 + $0x388] sm:$0xff] }
 0x1fb   : > { %v4917_v33 = vpack.c.bf16 %v1522_v27, %v1519_v24 }
 0x1fc   : > { %4914 = vmatpush3.bf16.msra.mxu0 %v4913_v20 }
 0x1fd   : > { %4854 = vmatpush1.bf16.msra.mxu1 %v4853_v35  ;;  %4916 = vmatprep.subr.bf16.mxu0 %v4915_v23  ;;  %v1528_v35 = vld [vmem:[#allocation10 + $0x3b8] sm:$0xff] }
 0x1fe   : > { %4856 = vmatprep.subr.bf16.mxu1 %v4855_v40  ;;  %v4921_v39 = vpack.c.bf16 %v1528_v35, %v1525_v37  ;;  %v4923_v40 = vpack.c.bf16 %v1582_v38, %v1579_v36 }
 0x200   : > { %4918 = vmatpush3.bf16.msra.mxu0 %v4917_v33 }
 0x201   : > { %4858 = vmatpush1.bf16.msra.mxu1 %v4857_v47  ;;  %4920 = vmatprep.subr.bf16.mxu0 %v4919_v34  ;;  %v1537_v47 = vld [vmem:[#allocation10 + $0x400] sm:$0xff] }
 0x202   : > { %4860 = vmatprep.subr.bf16.mxu1 %v4859_v16  ;;  %v4929_v16 = vpack.c.bf16 %v1540_v48, %v1537_v47 }
 0x204   : > { %1764 = vmatmul.mubr.f32.vlgmr.msra.gmra.mrb[4].mxu1 %v6151_v58  ;;  %4922 = vmatpush3.bf16.msra.mxu0 %v4921_v39 }
 0x205   : > { %4862 = vmatpush1.bf16.msra.mxu1 %v4861_v60  ;;  %1834 = vmatprep.mubr.f32.mxu1 %v5780_v49  ;;  %v1549_v60 = vld [vmem:[#allocation10 + $0x460] sm:$0xff] }
 0x206   : > { %4864 = vmatprep.subr.bf16.mxu1 %v4863_v0  ;;  %4924 = vmatprep.subr.bf16.mxu0 %v4923_v40  ;;  %v4937_v62 = vpack.c.bf16 %v1552_v61, %v1549_v60  ;;  %v1606_v0 = vld [vmem:[#allocation10 + $0x628] sm:$0xff] }
 0x207   : > { %v4940_v15 = vpack.c.bf16 %v1606_v0, %v1603_v63 }
 0x208   : > { %4926 = vmatpush3.bf16.msra.mxu0 %v4925_v45 }
 0x209   : > { %4866 = vmatpush1.bf16.msra.mxu1 %v4865_v6  ;;  %4928 = vmatprep.subr.bf16.mxu0 %v4927_v46  ;;  %v1621_v6 = vld [vmem:[#allocation10 + $0x6a0] sm:$0xff] }
 0x20a   : > { %4868 = vmatprep.subr.bf16.mxu1 %v4867_v11  ;;  %v4949_v8 = vpack.c.bf16 %v1624_v7, %v1621_v6 }
 0x20c   : > { %4930 = vmatpush3.bf16.msra.mxu0 %v4929_v16 }
 0x20d   : > { %4870 = vmatpush1.bf16.msra.mxu1 %v4869_v21  ;;  %4932 = vmatprep.subr.bf16.mxu0 %v4931_v53 }
 0x20e   : > { %4872 = vmatprep.subr.bf16.mxu1 %v4871_v28 }
 0x210   : > { %4934 = vmatpush3.bf16.msra.mxu0 %v4933_v57 }
 0x211   : > { %4874 = vmatpush1.bf16.msra.mxu1 %v4873_v32  ;;  %4936 = vmatprep.subr.bf16.mxu0 %v4935_v59 }
 0x212   : > { %5315 = vmatprep.subr.mxu1 %v5780_v49 }
 0x214   : > { %3953 = vmatmul.mubr.msk.f32.vlgmr.msra.gmra.mrb[4].mxu1 %vm769_vm0, %v6158_v12  ;;  %4938 = vmatpush3.bf16.msra.mxu0 %v4937_v62 }
 0x215   : > { %4287 = vmatprep.mubr.msk.f32.mxu1 %vm5782_vm1, %v5780_v49  ;;  %4939 = vmatprep.subr.bf16.mxu0 %v5781_v50 }
 0x217   : > { %1976 = vmatmul.mubr.f32.vlgmr.msra.gmra.mrb[8].mxu0 %v6151_v58 }
 0x218   : > { %4941 = vmatpush3.bf16.msra.mxu0 %v4940_v15  ;;  %4279 = vmatprep.mubr.msk.f32.mxu0 %vm5782_vm1, %v5780_v49 }
 0x219   : > { %4942 = vmatprep.subr.bf16.mxu0 %v5781_v50 }
 0x21c   : > { %4944 = vmatpush3.bf16.msra.mxu0 %v4943_v3 }
 0x21d   : > { %4945 = vmatprep.subr.bf16.mxu0 %v5781_v50 }
 0x220   : > { %4947 = vmatpush3.bf16.msra.mxu0 %v4946_v5 }
 0x221   : > { %4948 = vmatprep.subr.bf16.mxu0 %v5781_v50 }
 0x224   : > { %4950 = vmatpush3.bf16.msra.mxu0 %v4949_v8 }
 0x225   : > { %4282 = vmatprep.subr.mxu0 %v5780_v49 }
 0x227   : > { %4280 = vmatmul.mubr.msk.f32.vlgmr.msra.gmra.mrb[10].mxu0 %vm769_vm0, %v6158_v12  ;;  %v6204_v12 = vld [vmem:[%s349_s10] ss:$0 sm:$0xff] }
 0x228   : > { %4284 = vmatprep.mubr.msk.f32.mxu0 %vm5782_vm1, %v5780_v49 }
 0x237   : > { %v981_v58 = vpop.f32.mrb[0].mxu0  ;;  %v1194_v9 = vpop.f32.mrb[0].mxu1 }
 0x238   : > { %2059 = vrot.lane.b32.xlu0 %v981_v58, %s5783_s27  ;;  %v6174_v10 = vpop.f32.mrb[1].mxu0  ;;  %v6178_v11 = vpop.f32.mrb[1].mxu1 }
 0x257   : > { %v4015_v13 = vpop.f32.mrb[2].mxu0  ;;  %v4050_v14 = vpop.f32.mrb[2].mxu1 }
 0x258   : > { %v4016_v17 = vpop.f32.mrb[3].mxu0  ;;  %v4051_v19 = vpop.f32.mrb[3].mxu1 }
 0x259   : > { %v4017_v18 = vadd.f32 %v4016_v17, %v4015_v13  ;;  %v4052_v20 = vadd.f32 %v4051_v19, %v4050_v14 }
 0x25b   : > { %v1336_v21 = vadd.f32 %v4052_v20, %v4017_v18 }
 0x267   : > { %v1405_v22 = vpop.f32.mrb[4].mxu0 }
 0x268   : > { %v6182_v23 = vadd.f32 %v1405_v22, %v1336_v21  ;;  %v4262_v24 = vpop.f32.mrb[5].mxu0 }
 0x2aa   : > { %v2060_v33 = vpop.permute.xlu0 %2059 }
 0x2ca   : > { %v4094_v27 = vpop.f32.mrb[6].mxu0 }
 0x2cb   : > { %v4095_v28 = vpop.f32.mrb[7].mxu0 }
 0x2cc   : > { %v4096_v29 = vadd.f32 %v4095_v28, %v4094_v27 }
 0x2e7   : > { %v1836_v30 = vpop.f32.mrb[4].mxu1 }
 0x2e8   : > { %v6184_v31 = vpop.f32.mrb[5].mxu1  ;;  %4283 = vmatpush3.xpose.msk.msra.mxu0 %vm769_vm0, %v1836_v30  ;;  %5316 = vmatpush3.xpose.msk.msra.mxu1 %vm769_vm0, %v1836_v30 }
 0x2e9   : > { %4293 = vmatprep.subr.mxu0 %v5780_v49  ;;  %4337 = vmatprep.subr.mxu1 %v5780_v49 }
 0x2ea   : > { %v4129_v32 = vpop.f32.mrb[8].mxu0 }
 0x2eb   : > { %4285 = vmatmul.mubr.msk.f32.vlgmr.msra.gmra.mrb[12].mxu0 %vm769_vm0, %v981_v58  ;;  %4288 = vmatmul.mubr.msk.f32.vlgmr.msra.gmra.mrb[6].mxu1 %vm769_vm0, %v2060_v33  ;;  %v4130_v34 = vpop.f32.mrb[9].mxu0 }
 0x2ec   : > { %4290 = vmatprep.mubr.msk.f32.mxu1 %vm5782_vm1, %v5780_v49  ;;  %4295 = vmatprep.mubr.msk.f32.mxu0 %vm5782_vm1, %v5780_v49  ;;  %v4131_v37 = vadd.f32 %v4130_v34, %v4129_v32 }
 0x2ee   : > { %v1978_v35 = vadd.f32 %v4131_v37, %v4096_v29 }
 0x2ef   : > { %4291 = vmatmul.mubr.msk.f32.gmra.mrb[8].mxu1 %vm769_vm0, %v6174_v10 }
 0x2f0   : > { %4339 = vmatprep.mubr.msk.f32.mxu1 %vm5782_vm1, %v5780_v49 }
 0x2fa   : > { %v2047_v36 = vpop.f32.mrb[10].mxu0 }
 0x2fb   : > { %v6200_v38 = vadd.f32 %v2047_v36, %v1978_v35  ;;  %v4281_v39 = vpop.f32.mrb[11].mxu0 }
 0x3be   : > { %v2137_v40 = vpop.f32.mrb[12].mxu0  ;;  %v2142_v41 = vpop.f32.mrb[6].mxu1 }
 0x3bf   : > { %v2138_v42 = vadd.f32 %v6204_v12, %v2137_v40  ;;  %v2143_v43 = vadd.f32 %v6204_v12, %v2142_v41  ;;  %v4286_v44 = vpop.f32.mrb[13].mxu0  ;;  %v4289_v45 = vpop.f32.mrb[7].mxu1 }
 0x3c1   : > { %v2152_v46 = vsel %vm2151_vm2, %v2138_v42, -inf  ;;  %v2155_v47 = vsel %vm2151_vm2, %v2143_v43, -inf }
 0x3c2   : > { %2153 = vmax.xlane.f32.xlu0 %v2152_v46  ;;  %2156 = vmax.xlane.f32.xlu1 %v2155_v47  ;;  %v2147_v48 = vpop.f32.mrb[8].mxu1 }
 0x3c3   : > { %v2148_v51 = vadd.f32 %v6204_v12, %v2147_v48  ;;  %v4292_v52 = vpop.f32.mrb[9].mxu1 }
 0x3c5   : > { %v2158_v16 = vsel %vm2151_vm2, %v2148_v51, -inf }
 0x3c6   : > { %2159 = vmax.xlane.f32.xlu1 %v2158_v16 }
 0x3d7   : > { %2288 = vrot.lane.b32.xlu1 %v1194_v9, %s5783_s27 }
 0x44f   : > { %v2154_v53 = vpop.xlane.xlu0 %2153  ;;  %v2157_v25 = vpop.xlane.xlu1 %2156 }
 0x450   : > { %v2161_v54 = vsub.f32 %v2138_v42, %v2154_v53  ;;  %v2162_v55 = vsub.f32 %v2143_v43, %v2157_v25 }
 0x452   : > { %v2164_v56 = vmul.f32 1.442695, %v2161_v54  ;;  %v2166_v57 = vmul.f32 1.442695, %v2162_v55 }
 0x453   : > { %v2160_v59 = vpop.xlane.xlu1 %2159 }
 0x454   : > { %5464 = vpow2.f32 %v2164_v56  ;;  %v2163_v60 = vsub.f32 %v2148_v51, %v2160_v59 }
 0x455   : > { %5466 = vpow2.f32 %v2166_v57 }
 0x456   : > { %v2168_v61 = vmul.f32 1.442695, %v2163_v60 }
 0x457   : > { %v2289_v2 = vpop.permute.xlu1 %2288 }
 0x458   : > { %5468 = vpow2.f32 %v2168_v61 }
 0x45e   : > { %v5465_v62 = vpop.eup %5464 }
 0x45f   : > { %v5467_v63 = vpop.eup %5466  ;;  %v2170_v0 = vsel %vm2151_vm2, %v5465_v62, 0.0 }
 0x460   : > { %v2173_v15 = vsel %vm2151_vm2, %v5467_v63, 0.0  ;;  %2171 = vadd.xlane.f32.xlu1 %v2170_v0 }
 0x461   : > { %2174 = vadd.xlane.f32.xlu0 %v2173_v15 }
 0x462   : > { %v5469_v1 = vpop.eup %5468 }
 0x463   : > { %v2176_v26 = vsel %vm2151_vm2, %v5469_v1, 0.0 }
 0x465   : > { %2177 = vadd.xlane.f32.xlu0 %v2176_v26 }
 0x471   : > { %2294 = vrot.lane.b32.xlu1 %v1836_v30, %s5783_s27 }
 0x47b   : > { %2195 = vrot.lane.b32.xlu0 %v6184_v31, %s5783_s27 }
 0x47f   : > { %2290 = vrot.lane.b32.xlu0 %v6174_v10, %s5783_s27 }
 0x483   : > { %2292 = vrot.lane.b32.xlu0 %v2289_v2, %s5783_s27 }
 0x4ed   : > { %v2172_v3 = vpop.xlane.xlu1 %2171 }
 0x4ee   : > { %v2175_v4 = vpop.xlane.xlu0 %2174  ;;  %5470 = vrcp.f32 %v2172_v3 }
 0x4ef   : > { %5472 = vrcp.f32 %v2175_v4 }
 0x4f1   : > { %v2295_v22 = vpop.permute.xlu1 %2294 }
 0x4f2   : > { %v2178_v5 = vpop.xlane.xlu0 %2177 }
 0x4f3   : > { %5474 = vrcp.f32 %v2178_v5 }
 0x4f6   : > { %v2196_v6 = vpop.permute.xlu0 %2195 }
 0x4f7   : > { %4294 = vmatpush3.msra.mxu0 %v2196_v6 }
 0x4f8   : > { %v5471_v7 = vpop.eup %5470  ;;  %4304 = vmatprep.subr.mxu0 %v5780_v49 }
 0x4f9   : > { %v5473_v8 = vpop.eup %5472  ;;  %v2182_v58 = vmul.f32 %v5471_v7, %v2172_v3 }
 0x4fa   : > { %v2183_v9 = vmul.f32 %v5473_v8, %v2175_v4  ;;  %v2291_v29 = vpop.permute.xlu0 %2290 }
 0x4fb   : > { %v2185_v13 = vsub.f32 2.0, %v2182_v58 }
 0x4fc   : > { %v2186_v14 = vsub.f32 2.0, %v2183_v9 }
 0x4fd   : > { %v5475_v10 = vpop.eup %5474  ;;  %v2188_v17 = vmul.f32 %v5471_v7, %v2185_v13 }
 0x4fe   : > { %v2184_v18 = vmul.f32 %v5475_v10, %v2178_v5  ;;  %v2189_v19 = vmul.f32 %v5473_v8, %v2186_v14  ;;  %v2293_v30 = vpop.permute.xlu0 %2292 }
 0x4ff   : > { %v2191_v20 = vmul.f32 %v5465_v62, %v2188_v17 }
 0x500   : > { %v2187_v21 = vsub.f32 2.0, %v2184_v18  ;;  %v2192_v24 = vmul.f32 %v5467_v63, %v2189_v19 }
 0x501   : > { %4296 = vmatmul.mubr.msk.f32.vlgmr.msra.gmra.mrb[14].mxu0 %vm2151_vm2, %v2191_v20 }
 0x502   : > { %4305 = vmatpush3.xpose.msk.msra.mxu0 %vm769_vm0, %v2295_v22  ;;  %4298 = vmatprep.mubr.msk.f32.mxu0 %vm5782_vm1, %v5780_v49  ;;  %v2190_v27 = vmul.f32 %v5475_v10, %v2187_v21 }
 0x503   : > { %4315 = vmatprep.subr.mxu0 %v5780_v49 }
 0x504   : > { %v2193_v28 = vmul.f32 %v5469_v1, %v2190_v27  ;;  %v2762_v27 = vld [vmem:[#allocation11] sm:$0xff] }
 0x505   : > { %4299 = vmatmul.mubr.msk.f32.gmra.mrb[16].mxu0 %vm2151_vm2, %v2192_v24  ;;  %v2768_v24 = vld [vmem:[#allocation11 + $0x30] sm:$0xff] }
 0x506   : > { %4301 = vmatprep.mubr.msk.f32.mxu0 %vm5782_vm1, %v5780_v49 }
 0x509   : > { %4302 = vmatmul.mubr.msk.f32.gmra.mrb[18].mxu0 %vm2151_vm2, %v2193_v28 }
 0x50a   : > { %4306 = vmatprep.mubr.msk.f32.mxu0 %vm5782_vm1, %v5780_v49 }
 0x50d   : > { %4307 = vmatmul.mubr.msk.f32.vlgmr.msra.gmra.mrb[20].mxu0 %vm769_vm0, %v2291_v29  ;;  %v2767_v29 = vld [vmem:[#allocation11 + $0x28] sm:$0xff] }
 0x50e   : > { %4316 = vmatpush3.msra.mxu0 %v6200_v38  ;;  %4309 = vmatprep.mubr.msk.f32.mxu0 %vm5782_vm1, %v5780_v49 }
 0x50f   : > { %4326 = vmatprep.subr.mxu0 %v5780_v49 }
 0x511   : > { %4310 = vmatmul.mubr.msk.f32.gmra.mrb[22].mxu0 %vm769_vm0, %v2293_v30  ;;  %v2773_v30 = vld [vmem:[#allocation11 + $0x58] sm:$0xff] }
 0x512   : > { %4312 = vmatprep.mubr.msk.f32.mxu0 %vm5782_vm1, %v5780_v49 }
 0x515   : > { %4313 = vmatmul.mubr.msk.f32.gmra.mrb[24].mxu0 %vm769_vm0, %v2289_v2 }
 0x516   : > { %4317 = vmatprep.mubr.msk.f32.mxu0 %vm5782_vm1, %v5780_v49 }
 0x5d4   : > { %v6245_v33 = vpop.f32.mrb[14].mxu0 }
 0x5d5   : > { %v4297_v32 = vpop.f32.mrb[15].mxu0 }
 0x5d6   : > { %v2778_v32 = vld [vmem:[#allocation11 + $0x80] sm:$0xff] }
 0x5d8   : > { %v6247_v34 = vpop.f32.mrb[16].mxu0 }
 0x5d9   : > { %v4300_v37 = vpop.f32.mrb[17].mxu0 }
 0x5da   : > { %v4953_v37 = vpack.c.bf16 %v2767_v29, %v2762_v27  ;;  %v2868_v27 = vld [vmem:[#allocation11 + $0x350] sm:$0xff] }
 0x5dc   : > { %v6249_v35 = vpop.f32.mrb[18].mxu0 }
 0x5dd   : > { %v4303_v36 = vpop.f32.mrb[19].mxu0 }
 0x5de   : > { %v2772_v36 = vld [vmem:[#allocation11 + $0x50] sm:$0xff] }
 0x5e0   : > { %v2370_v39 = vpop.f32.mrb[20].mxu0 }
 0x5e1   : > { %v2371_v40 = vadd.f32 %v6204_v12, %v2370_v39  ;;  %v4308_v41 = vpop.f32.mrb[21].mxu0  ;;  %v2777_v39 = vld [vmem:[#allocation11 + $0x78] sm:$0xff] }
 0x5e2   : > { %v2788_v41 = vld [vmem:[#allocation11 + $0xd0] sm:$0xff] }
 0x5e3   : > { %v2384_v42 = vsel %vm2151_vm2, %v2371_v40, -inf }
 0x5e4   : > { %2385 = vmax.xlane.f32.xlu0 %v2384_v42  ;;  %v2375_v43 = vpop.f32.mrb[22].mxu0  ;;  %v4957_v42 = vpack.c.bf16 %v2777_v39, %v2772_v36 }
 0x5e5   : > { %v2376_v44 = vadd.f32 %v6204_v12, %v2375_v43  ;;  %v4311_v45 = vpop.f32.mrb[23].mxu0 }
 0x5e6   : > { %v2793_v45 = vld [vmem:[#allocation11 + $0xf8] sm:$0xff] }
 0x5e7   : > { %v2387_v46 = vsel %vm2151_vm2, %v2376_v44, -inf }
 0x5e8   : > { %2388 = vmax.xlane.f32.xlu1 %v2387_v46  ;;  %v2380_v47 = vpop.f32.mrb[24].mxu0  ;;  %v2798_v46 = vld [vmem:[#allocation11 + $0x120] sm:$0xff] }
 0x5e9   : > { %v2381_v48 = vadd.f32 %v6204_v12, %v2380_v47  ;;  %v4314_v51 = vpop.f32.mrb[25].mxu0 }
 0x5ea   : > { %v2792_v51 = vld [vmem:[#allocation11 + $0xf0] sm:$0xff] }
 0x5eb   : > { %v2390_v52 = vsel %vm2151_vm2, %v2381_v48, -inf }
 0x5ec   : > { %2391 = vmax.xlane.f32.xlu0 %v2390_v52  ;;  %v2797_v52 = vld [vmem:[#allocation11 + $0x118] sm:$0xff] }
 0x671   : > { %v2386_v16 = vpop.xlane.xlu0 %2385 }
 0x672   : > { %v2393_v53 = vsub.f32 %v2371_v40, %v2386_v16  ;;  %v2783_v40 = vld [vmem:[#allocation11 + $0xa8] sm:$0xff] }
 0x673   : > { %v4959_v43 = vpack.c.bf16 %v2788_v41, %v2783_v40  ;;  %v2803_v16 = vld [vmem:[#allocation11 + $0x148] sm:$0xff]  ;;  %v2872_v40 = vld [vmem:[#allocation11 + $0x370] sm:$0xff]  ;;  %v2877_v41 = vld [vmem:[#allocation11 + $0x398] sm:$0xff] }
 0x674   : > { %v2396_v25 = vmul.f32 1.442695, %v2393_v53  ;;  %v2808_v53 = vld [vmem:[#allocation11 + $0x170] sm:$0xff] }
 0x675   : > { %v2389_v54 = vpop.xlane.xlu1 %2388 }
 0x676   : > { %5476 = vpow2.f32 %v2396_v25  ;;  %v2394_v55 = vsub.f32 %v2376_v44, %v2389_v54  ;;  %v2782_v44 = vld [vmem:[#allocation11 + $0xa0] sm:$0xff]  ;;  %v4965_v25 = vpack.c.bf16 %v2797_v52, %v2792_v51  ;;  %v4967_v54 = vpack.c.bf16 %v2808_v53, %v2803_v16  ;;  %v2892_v16 = vld [vmem:[#allocation11 + $0x410] sm:$0xff]  ;;  %v2897_v53 = vld [vmem:[#allocation11 + $0x438] sm:$0xff] }
 0x678   : > { %v2398_v56 = vmul.f32 1.442695, %v2394_v55  ;;  %v2802_v55 = vld [vmem:[#allocation11 + $0x140] sm:$0xff] }
 0x679   : > { %v2392_v57 = vpop.xlane.xlu0 %2391 }
 0x67a   : > { %5478 = vpow2.f32 %v2398_v56  ;;  %v2395_v59 = vsub.f32 %v2381_v48, %v2392_v57  ;;  %v4963_v48 = vpack.c.bf16 %v2798_v46, %v2793_v45  ;;  %v2807_v56 = vld [vmem:[#allocation11 + $0x168] sm:$0xff]  ;;  %v2813_v57 = vld [vmem:[#allocation11 + $0x198] sm:$0xff]  ;;  %v2882_v45 = vld [vmem:[#allocation11 + $0x3c0] sm:$0xff] }
 0x67b   : > { %v2887_v46 = vld [vmem:[#allocation11 + $0x3e8] sm:$0xff] }
 0x67c   : > { %v2400_v60 = vmul.f32 1.442695, %v2395_v59  ;;  %v2818_v59 = vld [vmem:[#allocation11 + $0x1c0] sm:$0xff]  ;;  %v5001_v51 = vpack.c.bf16 %v2887_v46, %v2882_v45 }
 0x67e   : > { %5480 = vpow2.f32 %v2400_v60  ;;  %v4969_v60 = vpack.c.bf16 %v2807_v56, %v2802_v55  ;;  %v5005_v55 = vpack.c.bf16 %v2897_v53, %v2892_v16  ;;  %v2764_v53 = vld [vmem:[#allocation11 + $0x10] sm:$0xff] }
 0x680   : > { %v5477_v61 = vpop.eup %5476 }
 0x681   : > { %v2402_v62 = vsel %vm2151_vm2, %v5477_v61, 0.0 }
 0x682   : > { %2403 = vadd.xlane.f32.xlu0 %v2402_v62  ;;  %v2812_v62 = vld [vmem:[#allocation11 + $0x190] sm:$0xff] }
 0x684   : > { %v5479_v63 = vpop.eup %5478 }
 0x685   : > { %v2405_v0 = vsel %vm2151_vm2, %v5479_v63, 0.0 }
 0x686   : > { %2406 = vadd.xlane.f32.xlu0 %v2405_v0  ;;  %v2823_v0 = vld [vmem:[#allocation11 + $0x1e8] sm:$0xff] }
 0x688   : > { %v5481_v15 = vpop.eup %5480 }
 0x689   : > { %v2408_v1 = vsel %vm2151_vm2, %v5481_v15, 0.0 }
 0x68a   : > { %2409 = vadd.xlane.f32.xlu1 %v2408_v1 }
 0x69c   : > { %2516 = vrot.lane.b32.xlu0 %v6178_v11, %s5783_s27 }
 0x6a0   : > { %2650 = vrot.lane.b32.xlu0 %v6200_v38, %s5783_s27 }
 0x70f   : > { %v2404_v26 = vpop.xlane.xlu0 %2403 }
 0x710   : > { %5482 = vrcp.f32 %v2404_v26 }
 0x713   : > { %v2407_v2 = vpop.xlane.xlu0 %2406 }
 0x714   : > { %5484 = vrcp.f32 %v2407_v2 }
 0x717   : > { %v2410_v3 = vpop.xlane.xlu1 %2409  ;;  %v2517_v4 = vpop.permute.xlu0 %2516 }
 0x718   : > { %5486 = vrcp.f32 %v2410_v3 }
 0x71a   : > { %v5483_v5 = vpop.eup %5482 }
 0x71b   : > { %v2414_v6 = vmul.f32 %v5483_v5, %v2404_v26  ;;  %v2651_v7 = vpop.permute.xlu0 %2650 }
 0x71c   : > { %4338 = vmatpush3.msra.mxu1 %v2651_v7 }
 0x71d   : > { %v2417_v8 = vsub.f32 2.0, %v2414_v6 }
 0x71e   : > { %v5485_v58 = vpop.eup %5484 }
 0x71f   : > { %v2420_v9 = vmul.f32 %v5483_v5, %v2417_v8  ;;  %v2415_v13 = vmul.f32 %v5485_v58, %v2407_v2  ;;  %v2822_v2 = vld [vmem:[#allocation11 + $0x1e0] sm:$0xff]  ;;  %v2832_v8 = vld [vmem:[#allocation11 + $0x230] sm:$0xff] }
 0x720   : > { %v2838_v5 = vld [vmem:[#allocation11 + $0x260] sm:$0xff] }
 0x721   : > { %v2423_v14 = vmul.f32 %v5477_v61, %v2420_v9  ;;  %v2418_v10 = vsub.f32 2.0, %v2415_v13  ;;  %v4971_v61 = vpack.c.bf16 %v2818_v59, %v2813_v57  ;;  %v2843_v9 = vld [vmem:[#allocation11 + $0x288] sm:$0xff]  ;;  %v2848_v13 = vld [vmem:[#allocation11 + $0x2b0] sm:$0xff]  ;;  %v2902_v57 = vld [vmem:[#allocation11 + $0x460] sm:$0xff] }
 0x722   : > { %v5487_v17 = vpop.eup %5486  ;;  %v2907_v59 = vld [vmem:[#allocation11 + $0x488] sm:$0xff] }
 0x723   : > { %v2421_v18 = vmul.f32 %v5485_v58, %v2418_v10  ;;  %v2416_v38 = vmul.f32 %v5487_v17, %v2410_v3  ;;  %4318 = vmatmul.mubr.msk.f32.vlgmr.msra.gmra.mrb[26].mxu0 %vm2151_vm2, %v2423_v14  ;;  %v2827_v3 = vld [vmem:[#allocation11 + $0x208] sm:$0xff]  ;;  %v2837_v58 = vld [vmem:[#allocation11 + $0x258] sm:$0xff]  ;;  %v4983_v10 = vpack.c.bf16 %v2848_v13, %v2843_v9 }
 0x724   : > { %4327 = vmatpush3.xpose.msk.msra.mxu0 %vm769_vm0, %v6184_v31  ;;  %4320 = vmatprep.mubr.msk.f32.mxu0 %vm5782_vm1, %v5780_v49  ;;  %v2763_v31 = vld [vmem:[#allocation11 + $0x8] sm:$0xff]  ;;  %v4977_v6 = vpack.c.bf16 %v2827_v3, %v2822_v2  ;;  %v4981_v14 = vpack.c.bf16 %v2837_v58, %v2832_v8 }
 0x725   : > { %v2424_v19 = vmul.f32 %v5479_v63, %v2421_v18  ;;  %v2419_v20 = vsub.f32 2.0, %v2416_v38  ;;  %v4951_v28 = vpack.c.bf16 %v2768_v24, %v2763_v31  ;;  %v2817_v63 = vld [vmem:[#allocation11 + $0x1b8] sm:$0xff]  ;;  %v2847_v18 = vld [vmem:[#allocation11 + $0x2a8] sm:$0xff] }
 0x726   : > { %v4973_v1 = vpack.c.bf16 %v2817_v63, %v2812_v62  ;;  %v2853_v38 = vld [vmem:[#allocation11 + $0x2d8] sm:$0xff]  ;;  %v2863_v24 = vld [vmem:[#allocation11 + $0x328] sm:$0xff]  ;;  %v2918_v62 = vld [vmem:[#allocation11 + $0x4e0] sm:$0xff] }
 0x727   : > { %v2422_v21 = vmul.f32 %v5487_v17, %v2419_v20  ;;  %4321 = vmatmul.mubr.msk.f32.gmra.mrb[28].mxu0 %vm2151_vm2, %v2424_v19  ;;  %4952 = vmatprep.subr.bf16.mxu0 %v4951_v28  ;;  %v2842_v17 = vld [vmem:[#allocation11 + $0x280] sm:$0xff]  ;;  %v2857_v31 = vld [vmem:[#allocation11 + $0x2f8] sm:$0xff]  ;;  %v4991_v29 = vpack.c.bf16 %v2868_v27, %v2863_v24 }
 0x728   : > { %4323 = vmatprep.mubr.msk.f32.mxu0 %vm5782_vm1, %v5780_v49  ;;  %v2858_v19 = vld [vmem:[#allocation11 + $0x300] sm:$0xff]  ;;  %v4985_v20 = vpack.c.bf16 %v2847_v18, %v2842_v17 }
 0x729   : > { %v2425_v22 = vmul.f32 %v5481_v15, %v2422_v21  ;;  %v2828_v15 = vld [vmem:[#allocation11 + $0x210] sm:$0xff]  ;;  %v4987_v21 = vpack.c.bf16 %v2858_v19, %v2853_v38 }
 0x72a   : > { %v4975_v26 = vpack.c.bf16 %v2828_v15, %v2823_v0  ;;  %v2912_v0 = vld [vmem:[#allocation11 + $0x4b0] sm:$0xff]  ;;  %v2917_v15 = vld [vmem:[#allocation11 + $0x4d8] sm:$0xff] }
 0x72b   : > { %4324 = vmatmul.mubr.msk.f32.gmra.mrb[30].mxu0 %vm2151_vm2, %v2425_v22  ;;  %v2852_v22 = vld [vmem:[#allocation11 + $0x2d0] sm:$0xff] }
 0x72c   : > { %4328 = vmatprep.mubr.msk.f32.mxu0 %vm5782_vm1, %v5780_v49  ;;  %v4989_v28 = vpack.c.bf16 %v2857_v31, %v2852_v22 }
 0x72f   : > { %4329 = vmatmul.mubr.msk.f32.vlgmr.msra.gmra.mrb[32].mxu0 %vm769_vm0, %v6178_v11  ;;  %v4955_v11 = vpack.c.bf16 %v2778_v32, %v2773_v30  ;;  %v2862_v30 = vld [vmem:[#allocation11 + $0x320] sm:$0xff]  ;;  %v2867_v32 = vld [vmem:[#allocation11 + $0x348] sm:$0xff] }
 0x730   : > { %4331 = vmatprep.mubr.msk.f32.mxu0 %vm5782_vm1, %v5780_v49  ;;  %4954 = vmatpush1.bf16.msra.mxu0 %v4953_v37  ;;  %v2873_v37 = vld [vmem:[#allocation11 + $0x378] sm:$0xff]  ;;  %v4993_v36 = vpack.c.bf16 %v2867_v32, %v2862_v30 }
 0x731   : > { %4956 = vmatprep.subr.bf16.mxu0 %v4955_v11  ;;  %v2878_v11 = vld [vmem:[#allocation11 + $0x3a0] sm:$0xff] }
 0x732   : > { %v4995_v39 = vpack.c.bf16 %v2878_v11, %v2873_v37 }
 0x733   : > { %4332 = vmatmul.mubr.msk.f32.gmra.mrb[34].mxu0 %vm769_vm0, %v2517_v4  ;;  %v2833_v4 = vld [vmem:[#allocation11 + $0x238] sm:$0xff] }
 0x734   : > { %4334 = vmatprep.mubr.msk.f32.mxu0 %vm5782_vm1, %v5780_v49  ;;  %4958 = vmatpush1.bf16.msra.mxu0 %v4957_v42  ;;  %v4979_v7 = vpack.c.bf16 %v2838_v5, %v2833_v4  ;;  %v2883_v42 = vld [vmem:[#allocation11 + $0x3c8] sm:$0xff] }
 0x735   : > { %4960 = vmatprep.subr.bf16.mxu0 %v4959_v43  ;;  %v2888_v43 = vld [vmem:[#allocation11 + $0x3f0] sm:$0xff] }
 0x737   : > { %4335 = vmatmul.mubr.msk.f32.gmra.mrb[36].mxu0 %vm769_vm0, %v6182_v23  ;;  %v2787_v23 = vld [vmem:[#allocation11 + $0xc8] sm:$0xff] }
 0x738   : > { %v4961_v47 = vpack.c.bf16 %v2787_v23, %v2782_v44  ;;  %v4997_v44 = vpack.c.bf16 %v2877_v41, %v2872_v40  ;;  %v4999_v23 = vpack.c.bf16 %v2888_v43, %v2883_v42 }
 0x73a   : > { %4962 = vmatpush1.bf16.msra.mxu0 %v4961_v47  ;;  %v2893_v47 = vld [vmem:[#allocation11 + $0x418] sm:$0xff] }
 0x73b   : > { %4964 = vmatprep.subr.bf16.mxu0 %v4963_v48  ;;  %v2898_v48 = vld [vmem:[#allocation11 + $0x440] sm:$0xff] }
 0x73c   : > { %v5003_v52 = vpack.c.bf16 %v2898_v48, %v2893_v47 }
 0x73e   : > { %4966 = vmatpush1.bf16.msra.mxu0 %v4965_v25  ;;  %v2903_v25 = vld [vmem:[#allocation11 + $0x468] sm:$0xff] }
 0x73f   : > { %4968 = vmatprep.subr.bf16.mxu0 %v4967_v54  ;;  %v2908_v54 = vld [vmem:[#allocation11 + $0x490] sm:$0xff] }
 0x740   : > { %v5007_v56 = vpack.c.bf16 %v2908_v54, %v2903_v25  ;;  %v2769_v25 = vld [vmem:[#allocation11 + $0x38] sm:$0xff] }
 0x742   : > { %4970 = vmatpush1.bf16.msra.mxu0 %v4969_v60  ;;  %v5009_v60 = vpack.c.bf16 %v2907_v59, %v2902_v57 }
 0x743   : > { %4972 = vmatprep.subr.bf16.mxu0 %v4971_v61  ;;  %v2913_v61 = vld [vmem:[#allocation11 + $0x4b8] sm:$0xff] }
 0x744   : > { %v5011_v63 = vpack.c.bf16 %v2918_v62, %v2913_v61 }
 0x746   : > { %4974 = vmatpush1.bf16.msra.mxu0 %v4973_v1  ;;  %v5013_v1 = vpack.c.bf16 %v2917_v15, %v2912_v0  ;;  %v2774_v0 = vld [vmem:[#allocation11 + $0x60] sm:$0xff]  ;;  %v2779_v15 = vld [vmem:[#allocation11 + $0x88] sm:$0xff] }
 0x747   : > { %4976 = vmatprep.subr.bf16.mxu0 %v4975_v26 }
 0x74a   : > { %4978 = vmatpush1.bf16.msra.mxu0 %v4977_v6 }
 0x74b   : > { %4980 = vmatprep.subr.bf16.mxu0 %v4979_v7 }
 0x74e   : > { %4982 = vmatpush1.bf16.msra.mxu0 %v4981_v14 }
 0x74f   : > { %4984 = vmatprep.subr.bf16.mxu0 %v4983_v10 }
 0x752   : > { %4986 = vmatpush1.bf16.msra.mxu0 %v4985_v20 }
 0x753   : > { %4988 = vmatprep.subr.bf16.mxu0 %v4987_v21 }
 0x756   : > { %4990 = vmatpush1.bf16.msra.mxu0 %v4989_v28 }
 0x757   : > { %4992 = vmatprep.subr.bf16.mxu0 %v4991_v29 }
 0x75a   : > { %4994 = vmatpush1.bf16.msra.mxu0 %v4993_v36 }
 0x75b   : > { %4996 = vmatprep.subr.bf16.mxu0 %v4995_v39 }
 0x75e   : > { %4998 = vmatpush1.bf16.msra.mxu0 %v4997_v44  ;;  %v2765_v44 = vld [vmem:[#allocation11 + $0x18] sm:$0xff] }
 0x75f   : > { %5000 = vmatprep.subr.bf16.mxu0 %v4999_v23  ;;  %v2770_v23 = vld [vmem:[#allocation11 + $0x40] sm:$0xff] }
 0x760   : > { %v5095_v45 = vpack.c.bf16 %v2770_v23, %v2765_v44  ;;  %v2829_v44 = vld [vmem:[#allocation11 + $0x218] sm:$0xff]  ;;  %v2835_v23 = vld [vmem:[#allocation11 + $0x248] sm:$0xff] }
 0x762   : > { %5002 = vmatpush1.bf16.msra.mxu0 %v5001_v51  ;;  %5096 = vmatprep.subr.bf16.mxu1 %v5095_v45  ;;  %v2840_v45 = vld [vmem:[#allocation11 + $0x270] sm:$0xff] }
 0x763   : > { %5004 = vmatprep.subr.bf16.mxu0 %v5003_v52 }
 0x766   : > { %5006 = vmatpush1.bf16.msra.mxu0 %v5005_v55  ;;  %v2775_v55 = vld [vmem:[#allocation11 + $0x68] sm:$0xff] }
 0x767   : > { %5008 = vmatprep.subr.bf16.mxu0 %v5007_v56  ;;  %v2780_v56 = vld [vmem:[#allocation11 + $0x90] sm:$0xff] }
 0x76a   : > { %5010 = vmatpush1.bf16.msra.mxu0 %v5009_v60  ;;  %v5097_v60 = vpack.c.bf16 %v2769_v25, %v2764_v53 }
 0x76b   : > { %5012 = vmatprep.subr.bf16.mxu0 %v5011_v63  ;;  %v5099_v63 = vpack.c.bf16 %v2780_v56, %v2775_v55  ;;  %v2849_v55 = vld [vmem:[#allocation11 + $0x2b8] sm:$0xff]  ;;  %v2855_v56 = vld [vmem:[#allocation11 + $0x2e8] sm:$0xff] }
 0x76e   : > { %5014 = vmatpush1.bf16.msra.mxu0 %v5013_v1 }
 0x7f6   : > { %v2501_v26 = vpop.f32.mrb[26].mxu0 }
 0x7f7   : > { %v5454_v2 = vpack.i.bf16 %v6247_v34, %v2501_v26  ;;  %v4319_v3 = vpop.f32.mrb[27].mxu0  ;;  %v2785_v26 = vld [vmem:[#allocation11 + $0xb8] sm:$0xff] }
 0x7f9   : > { %5455 = vrot.lane.b32.xlu0 %v5454_v2, %s5783_s27  ;;  %v2790_v2 = vld [vmem:[#allocation11 + $0xe0] sm:$0xff] }
 0x7fa   : > { %v6286_v4 = vpop.f32.mrb[28].mxu0 }
 0x7fb   : > { %v4322_v5 = vpop.f32.mrb[29].mxu0 }
 0x7fe   : > { %v6288_v6 = vpop.f32.mrb[30].mxu0 }
 0x7ff   : > { %v4325_v7 = vpop.f32.mrb[31].mxu0 }
 0x800   : > { %v5101_v7 = vpack.c.bf16 %v2779_v15, %v2774_v0  ;;  %v2870_v0 = vld [vmem:[#allocation11 + $0x360] sm:$0xff] }
 0x802   : > { %v2593_v8 = vpop.f32.mrb[32].mxu0 }
 0x803   : > { %v2594_v58 = vadd.f32 %v6204_v12, %v2593_v8  ;;  %v4330_v9 = vpop.f32.mrb[33].mxu0 }
 0x804   : > { %v5103_v9 = vpack.c.bf16 %v2790_v2, %v2785_v26  ;;  %v2864_v26 = vld [vmem:[#allocation11 + $0x330] sm:$0xff]  ;;  %v2869_v2 = vld [vmem:[#allocation11 + $0x358] sm:$0xff] }
 0x805   : > { %v2607_v13 = vsel %vm2151_vm2, %v2594_v58, -inf }
 0x806   : > { %2608 = vmax.xlane.f32.xlu1 %v2607_v13  ;;  %v2598_v14 = vpop.f32.mrb[34].mxu0  ;;  %v2784_v13 = vld [vmem:[#allocation11 + $0xb0] sm:$0xff] }
 0x807   : > { %v2599_v10 = vadd.f32 %v6204_v12, %v2598_v14  ;;  %v4333_v34 = vpop.f32.mrb[35].mxu0  ;;  %v2789_v14 = vld [vmem:[#allocation11 + $0xd8] sm:$0xff] }
 0x808   : > { %v2800_v34 = vld [vmem:[#allocation11 + $0x130] sm:$0xff] }
 0x809   : > { %v2610_v17 = vsel %vm2151_vm2, %v2599_v10, -inf }
 0x80a   : > { %2611 = vmax.xlane.f32.xlu1 %v2610_v17  ;;  %v2603_v18 = vpop.f32.mrb[36].mxu0 }
 0x80b   : > { %v2604_v38 = vadd.f32 %v6204_v12, %v2603_v18  ;;  %v4336_v19 = vpop.f32.mrb[37].mxu0  ;;  %v5105_v18 = vpack.c.bf16 %v2789_v14, %v2784_v13  ;;  %v2885_v13 = vld [vmem:[#allocation11 + $0x3d8] sm:$0xff]  ;;  %v2890_v14 = vld [vmem:[#allocation11 + $0x400] sm:$0xff] }
 0x80d   : > { %v2613_v20 = vsel %vm2151_vm2, %v2604_v38, -inf }
 0x80e   : > { %2614 = vmax.xlane.f32.xlu1 %v2613_v20  ;;  %v2794_v20 = vld [vmem:[#allocation11 + $0x100] sm:$0xff] }
 0x86b   : > { %v5456_v21 = vpop.permute.xlu0 %5455 }
 0x86c   : > { %v5458_v22 = vunpack.i.h.bf16 %v5456_v21  ;;  %v5457_v31 = vunpack.i.l.bf16 %v5456_v21  ;;  %v2799_v21 = vld [vmem:[#allocation11 + $0x128] sm:$0xff] }
 0x86e   : > { %v6298_v24 = vsel %vm769_vm0, %v6245_v33, %v5458_v22  ;;  %v6302_v27 = vsel %vm769_vm0, %v6249_v35, %v5457_v31  ;;  %v2805_v22 = vld [vmem:[#allocation11 + $0x158] sm:$0xff]  ;;  %v2810_v31 = vld [vmem:[#allocation11 + $0x180] sm:$0xff] }
 0x86f   : > { %3189 = vmatprep.mubr.f32.mxu0 %v6302_v27 }
 0x870   : > { %3190 = vmatmul.mubr.f32.vlgmr.msra.gmra.mrb[38].mxu0 %v6298_v24 }
 0x893   : > { %v2609_v12 = vpop.xlane.xlu1 %2608 }
 0x894   : > { %v2616_v28 = vsub.f32 %v2594_v58, %v2609_v12  ;;  %v5109_v12 = vpack.c.bf16 %v2799_v21, %v2794_v20 }
 0x896   : > { %v2619_v29 = vmul.f32 1.442695, %v2616_v28  ;;  %v5111_v28 = vpack.c.bf16 %v2810_v31, %v2805_v22  ;;  %v2894_v22 = vld [vmem:[#allocation11 + $0x420] sm:$0xff]  ;;  %v2899_v31 = vld [vmem:[#allocation11 + $0x448] sm:$0xff] }
 0x897   : > { %v2612_v30 = vpop.xlane.xlu1 %2611 }
 0x898   : > { %5488 = vpow2.f32 %v2619_v29  ;;  %v2617_v32 = vsub.f32 %v2599_v10, %v2612_v30  ;;  %v2795_v10 = vld [vmem:[#allocation11 + $0x108] sm:$0xff]  ;;  %v2804_v29 = vld [vmem:[#allocation11 + $0x150] sm:$0xff]  ;;  %v2809_v30 = vld [vmem:[#allocation11 + $0x178] sm:$0xff] }
 0x899   : > { %v5107_v19 = vpack.c.bf16 %v2800_v34, %v2795_v10  ;;  %v5143_v34 = vpack.c.bf16 %v2890_v14, %v2885_v13  ;;  %v2949_v13 = vld [vmem:[#allocation11 + $0x5d8] sm:$0xff] }
 0x89a   : > { %v2621_v37 = vmul.f32 1.442695, %v2617_v32  ;;  %v2815_v32 = vld [vmem:[#allocation11 + $0x1a8] sm:$0xff] }
 0x89b   : > { %v2615_v11 = vpop.xlane.xlu1 %2614 }
 0x89c   : > { %5490 = vpow2.f32 %v2621_v37  ;;  %v2618_v36 = vsub.f32 %v2604_v38, %v2615_v11  ;;  %v2820_v37 = vld [vmem:[#allocation11 + $0x1d0] sm:$0xff]  ;;  %v5113_v11 = vpack.c.bf16 %v2809_v30, %v2804_v29  ;;  %v5149_v29 = vpack.c.bf16 %v2899_v31, %v2894_v22  ;;  %v2954_v31 = vld [vmem:[#allocation11 + $0x600] sm:$0xff] }
 0x89e   : > { %v2623_v33 = vmul.f32 1.442695, %v2618_v36  ;;  %v5115_v36 = vpack.c.bf16 %v2820_v37, %v2815_v32  ;;  %v2904_v32 = vld [vmem:[#allocation11 + $0x470] sm:$0xff]  ;;  %v2909_v37 = vld [vmem:[#allocation11 + $0x498] sm:$0xff] }
 0x8a0   : > { %5492 = vpow2.f32 %v2623_v33  ;;  %v2814_v33 = vld [vmem:[#allocation11 + $0x1a0] sm:$0xff] }
 0x8a2   : > { %v5489_v39 = vpop.eup %5488 }
 0x8a3   : > { %v2625_v35 = vsel %vm2151_vm2, %v5489_v39, 0.0 }
 0x8a4   : > { %2626 = vadd.xlane.f32.xlu1 %v2625_v35  ;;  %v2825_v35 = vld [vmem:[#allocation11 + $0x1f8] sm:$0xff] }
 0x8a6   : > { %v5491_v40 = vpop.eup %5490 }
 0x8a7   : > { %v2628_v41 = vsel %vm2151_vm2, %v5491_v40, 0.0 }
 0x8a8   : > { %2629 = vadd.xlane.f32.xlu1 %v2628_v41 }
 0x8aa   : > { %v5493_v42 = vpop.eup %5492 }
 0x8ab   : > { %v2631_v43 = vsel %vm2151_vm2, %v5493_v42, 0.0 }
 0x8ac   : > { %2632 = vadd.xlane.f32.xlu1 %v2631_v43  ;;  %v2824_v43 = vld [vmem:[#allocation11 + $0x1f0] sm:$0xff] }
 0x931   : > { %v2627_v46 = vpop.xlane.xlu1 %2626 }
 0x932   : > { %5494 = vrcp.f32 %v2627_v46 }
 0x935   : > { %v2630_v47 = vpop.xlane.xlu1 %2629 }
 0x936   : > { %5496 = vrcp.f32 %v2630_v47 }
 0x939   : > { %v2633_v48 = vpop.xlane.xlu1 %2632 }
 0x93a   : > { %5498 = vrcp.f32 %v2633_v48 }
 0x93c   : > { %v5495_v51 = vpop.eup %5494 }
 0x93d   : > { %v2637_v52 = vmul.f32 %v5495_v51, %v2627_v46  ;;  %v5121_v46 = vpack.c.bf16 %v2829_v44, %v2824_v43  ;;  %v2928_v43 = vld [vmem:[#allocation11 + $0x530] sm:$0xff]  ;;  %v2925_v44 = vld [vmem:[#allocation11 + $0x518] sm:$0xff] }
 0x93f   : > { %v2640_v16 = vsub.f32 2.0, %v2637_v52  ;;  %v2845_v52 = vld [vmem:[#allocation11 + $0x298] sm:$0xff] }
 0x940   : > { %v5497_v54 = vpop.eup %5496 }
 0x941   : > { %v2643_v57 = vmul.f32 %v5495_v51, %v2640_v16  ;;  %v2638_v59 = vmul.f32 %v5497_v54, %v2630_v47  ;;  %v5123_v47 = vpack.c.bf16 %v2840_v45, %v2835_v23  ;;  %v2839_v51 = vld [vmem:[#allocation11 + $0x268] sm:$0xff]  ;;  %v2850_v16 = vld [vmem:[#allocation11 + $0x2c0] sm:$0xff] }
 0x942   : > { %v5127_v25 = vpack.c.bf16 %v2850_v16, %v2845_v52  ;;  %v2930_v45 = vld [vmem:[#allocation11 + $0x540] sm:$0xff]  ;;  %v2924_v52 = vld [vmem:[#allocation11 + $0x510] sm:$0xff]  ;;  %v2929_v16 = vld [vmem:[#allocation11 + $0x538] sm:$0xff] }
 0x943   : > { %v2646_v61 = vmul.f32 %v5489_v39, %v2643_v57  ;;  %v2641_v62 = vsub.f32 2.0, %v2638_v59  ;;  %v2819_v39 = vld [vmem:[#allocation11 + $0x1c8] sm:$0xff]  ;;  %v2860_v57 = vld [vmem:[#allocation11 + $0x310] sm:$0xff] }
 0x944   : > { %v5499_v1 = vpop.eup %5498  ;;  %v5117_v41 = vpack.c.bf16 %v2819_v39, %v2814_v33  ;;  %v5153_v33 = vpack.c.bf16 %v2909_v37, %v2904_v32  ;;  %v2970_v32 = vld [vmem:[#allocation11 + $0x680] sm:$0xff] }
 0x945   : > { %v2644_v3 = vmul.f32 %v5497_v54, %v2641_v62  ;;  %v2639_v5 = vmul.f32 %v5499_v1, %v2633_v48  ;;  %4340 = vmatmul.mubr.msk.f32.vlgmr.msra.gmra.mrb[10].mxu1 %vm2151_vm2, %v2646_v61  ;;  %v2834_v48 = vld [vmem:[#allocation11 + $0x240] sm:$0xff]  ;;  %v2844_v54 = vld [vmem:[#allocation11 + $0x290] sm:$0xff]  ;;  %v2859_v62 = vld [vmem:[#allocation11 + $0x308] sm:$0xff] }
 0x946   : > { %5098 = vmatpush1.bf16.msra.mxu1 %v5097_v60  ;;  %4342 = vmatprep.mubr.msk.f32.mxu1 %vm5782_vm1, %v5780_v49  ;;  %v5125_v53 = vpack.c.bf16 %v2839_v51, %v2834_v48  ;;  %v5129_v59 = vpack.c.bf16 %v2849_v55, %v2844_v54  ;;  %v5131_v60 = vpack.c.bf16 %v2860_v57, %v2855_v56  ;;  %v2854_v61 = vld [vmem:[#allocation11 + $0x2e0] sm:$0xff]  ;;  %v2935_v55 = vld [vmem:[#allocation11 + $0x568] sm:$0xff]  ;;  %v2940_v56 = vld [vmem:[#allocation11 + $0x590] sm:$0xff] }
 0x947   : > { %v2647_v8 = vmul.f32 %v5491_v40, %v2644_v3  ;;  %v2642_v58 = vsub.f32 2.0, %v2639_v5  ;;  %5100 = vmatprep.subr.bf16.mxu1 %v5099_v63  ;;  %v2830_v40 = vld [vmem:[#allocation11 + $0x220] sm:$0xff]  ;;  %v2865_v63 = vld [vmem:[#allocation11 + $0x338] sm:$0xff]  ;;  %v5133_v15 = vpack.c.bf16 %v2859_v62, %v2854_v61  ;;  %v2875_v3 = vld [vmem:[#allocation11 + $0x388] sm:$0xff]  ;;  %v5159_v48 = vpack.c.bf16 %v2930_v45, %v2925_v44 }
 0x948   : > { %v2880_v5 = vld [vmem:[#allocation11 + $0x3b0] sm:$0xff]  ;;  %v2938_v54 = vld [vmem:[#allocation11 + $0x580] sm:$0xff]  ;;  %v2937_v61 = vld [vmem:[#allocation11 + $0x578] sm:$0xff] }
 0x949   : > { %v2645_v17 = vmul.f32 %v5499_v1, %v2642_v58  ;;  %4343 = vmatmul.mubr.msk.f32.gmra.mrb[12].mxu1 %vm2151_vm2, %v2647_v8  ;;  %v5135_v1 = vpack.c.bf16 %v2870_v0, %v2865_v63  ;;  %v5139_v8 = vpack.c.bf16 %v2880_v5, %v2875_v3  ;;  %v2874_v58 = vld [vmem:[#allocation11 + $0x380] sm:$0xff]  ;;  %v2939_v0 = vld [vmem:[#allocation11 + $0x588] sm:$0xff]  ;;  %v2945_v3 = vld [vmem:[#allocation11 + $0x5b8] sm:$0xff] }
 0x94a   : > { %5102 = vmatpush1.bf16.msra.mxu1 %v5101_v7  ;;  %4345 = vmatprep.mubr.msk.f32.mxu1 %vm5782_vm1, %v5780_v49  ;;  %v5137_v7 = vpack.c.bf16 %v2869_v2, %v2864_v26  ;;  %v2934_v62 = vld [vmem:[#allocation11 + $0x560] sm:$0xff]  ;;  %v2975_v44 = vld [vmem:[#allocation11 + $0x6a8] sm:$0xff] }
 0x94b   : > { %v2648_v38 = vmul.f32 %v5493_v42, %v2645_v17  ;;  %5104 = vmatprep.subr.bf16.mxu1 %v5103_v9  ;;  %v5119_v42 = vpack.c.bf16 %v2830_v40, %v2825_v35  ;;  %v2879_v9 = vld [vmem:[#allocation11 + $0x3a8] sm:$0xff]  ;;  %v2884_v17 = vld [vmem:[#allocation11 + $0x3d0] sm:$0xff]  ;;  %v2914_v35 = vld [vmem:[#allocation11 + $0x4c0] sm:$0xff]  ;;  %v5165_v26 = vpack.c.bf16 %v2939_v0, %v2934_v62 }
 0x94c   : > { %v5141_v10 = vpack.c.bf16 %v2879_v9, %v2874_v58  ;;  %v2919_v40 = vld [vmem:[#allocation11 + $0x4e8] sm:$0xff]  ;;  %v2950_v5 = vld [vmem:[#allocation11 + $0x5e0] sm:$0xff]  ;;  %v2944_v9 = vld [vmem:[#allocation11 + $0x5b0] sm:$0xff] }
 0x94d   : > { %4346 = vmatmul.mubr.msk.f32.gmra.mrb[14].mxu1 %vm2151_vm2, %v2648_v38  ;;  %v2895_v38 = vld [vmem:[#allocation11 + $0x428] sm:$0xff] }
 0x94e   : > { %5106 = vmatpush1.bf16.msra.mxu1 %v5105_v18  ;;  %3402 = vmatprep.mubr.f32.mxu1 %v6302_v27  ;;  %v2889_v18 = vld [vmem:[#allocation11 + $0x3f8] sm:$0xff]  ;;  %v2947_v58 = vld [vmem:[#allocation11 + $0x5c8] sm:$0xff] }
 0x94f   : > { %5108 = vmatprep.subr.bf16.mxu1 %v5107_v19  ;;  %v2900_v19 = vld [vmem:[#allocation11 + $0x450] sm:$0xff]  ;;  %v5145_v20 = vpack.c.bf16 %v2889_v18, %v2884_v17  ;;  %v2955_v17 = vld [vmem:[#allocation11 + $0x608] sm:$0xff]  ;;  %v5169_v18 = vpack.c.bf16 %v2949_v13, %v2944_v9  ;;  %v2997_v9 = vld [vmem:[#allocation11 + $0x758] sm:$0xff] }
 0x950   : > { %v5147_v21 = vpack.c.bf16 %v2900_v19, %v2895_v38  ;;  %v2960_v19 = vld [vmem:[#allocation11 + $0x630] sm:$0xff]  ;;  %v2987_v62 = vld [vmem:[#allocation11 + $0x708] sm:$0xff]  ;;  %v2994_v13 = vld [vmem:[#allocation11 + $0x740] sm:$0xff] }
 0x951   : > { %v5171_v22 = vpack.c.bf16 %v2960_v19, %v2955_v17  ;;  %v3008_v17 = vld [vmem:[#allocation11 + $0x7b0] sm:$0xff] }
 0x952   : > { %5110 = vmatpush1.bf16.msra.mxu1 %v5109_v12  ;;  %v2905_v12 = vld [vmem:[#allocation11 + $0x478] sm:$0xff] }
 0x953   : > { %5112 = vmatprep.subr.bf16.mxu1 %v5111_v28  ;;  %v2910_v28 = vld [vmem:[#allocation11 + $0x4a0] sm:$0xff] }
 0x954   : > { %v5151_v30 = vpack.c.bf16 %v2910_v28, %v2905_v12  ;;  %v2959_v12 = vld [vmem:[#allocation11 + $0x628] sm:$0xff] }
 0x955   : > { %v2963_v28 = vld [vmem:[#allocation11 + $0x648] sm:$0xff] }
 0x956   : > { %5114 = vmatpush1.bf16.msra.mxu1 %v5113_v11  ;;  %v2915_v11 = vld [vmem:[#allocation11 + $0x4c8] sm:$0xff] }
 0x957   : > { %5116 = vmatprep.subr.bf16.mxu1 %v5115_v36  ;;  %v2920_v36 = vld [vmem:[#allocation11 + $0x4f0] sm:$0xff] }
 0x958   : > { %v5155_v39 = vpack.c.bf16 %v2920_v36, %v2915_v11  ;;  %v5173_v11 = vpack.c.bf16 %v2959_v12, %v2954_v31  ;;  %v3007_v31 = vld [vmem:[#allocation11 + $0x7a8] sm:$0xff]  ;;  %v3004_v12 = vld [vmem:[#allocation11 + $0x790] sm:$0xff] }
 0x95a   : > { %5118 = vmatpush1.bf16.msra.mxu1 %v5117_v41  ;;  %v5157_v41 = vpack.c.bf16 %v2919_v40, %v2914_v35  ;;  %v2964_v35 = vld [vmem:[#allocation11 + $0x650] sm:$0xff] }
 0x95b   : > { %5120 = vmatprep.subr.bf16.mxu1 %v5119_v42  ;;  %v2923_v42 = vld [vmem:[#allocation11 + $0x508] sm:$0xff] }
 0x95c   : > { %v5015_v23 = vpack.c.bf16 %v2928_v43, %v2923_v42  ;;  %v2973_v42 = vld [vmem:[#allocation11 + $0x698] sm:$0xff]  ;;  %v2978_v43 = vld [vmem:[#allocation11 + $0x6c0] sm:$0xff] }
 0x95e   : > { %5122 = vmatpush1.bf16.msra.mxu1 %v5121_v46  ;;  %v2922_v46 = vld [vmem:[#allocation11 + $0x500] sm:$0xff]  ;;  %5016 = vmatprep.subr.bf16.mxu0 %v5015_v23  ;;  %v2980_v23 = vld [vmem:[#allocation11 + $0x6d0] sm:$0xff] }
 0x95f   : > { %5124 = vmatprep.subr.bf16.mxu1 %v5123_v47  ;;  %v2927_v47 = vld [vmem:[#allocation11 + $0x528] sm:$0xff] }
 0x960   : > { %v5017_v51 = vpack.c.bf16 %v2927_v47, %v2922_v46  ;;  %v5035_v47 = vpack.c.bf16 %v2978_v43, %v2973_v42  ;;  %v3019_v43 = vld [vmem:[#allocation11 + $0x808] sm:$0xff] }
 0x962   : > { %5126 = vmatpush1.bf16.msra.mxu1 %v5125_v53  ;;  %v2933_v53 = vld [vmem:[#allocation11 + $0x558] sm:$0xff]  ;;  %5018 = vmatpush1.bf16.msra.mxu0 %v5017_v51 }
 0x963   : > { %5128 = vmatprep.subr.bf16.mxu1 %v5127_v25  ;;  %v5161_v25 = vpack.c.bf16 %v2929_v16, %v2924_v52  ;;  %v5019_v57 = vpack.c.bf16 %v2938_v54, %v2933_v53  ;;  %v2977_v51 = vld [vmem:[#allocation11 + $0x6b8] sm:$0xff]  ;;  %v2974_v52 = vld [vmem:[#allocation11 + $0x6a0] sm:$0xff]  ;;  %v5179_v16 = vpack.c.bf16 %v2980_v23, %v2975_v44  ;;  %v2979_v53 = vld [vmem:[#allocation11 + $0x6c8] sm:$0xff] }
 0x964   : > { %v2988_v54 = vld [vmem:[#allocation11 + $0x710] sm:$0xff]  ;;  %v3023_v44 = vld [vmem:[#allocation11 + $0x828] sm:$0xff] }
 0x965   : > { %5020 = vmatprep.subr.bf16.mxu0 %v5019_v57  ;;  %v3028_v23 = vld [vmem:[#allocation11 + $0x850] sm:$0xff] }
 0x966   : > { %5130 = vmatpush1.bf16.msra.mxu1 %v5129_v59  ;;  %v5163_v59 = vpack.c.bf16 %v2940_v56, %v2935_v55  ;;  %v2985_v55 = vld [vmem:[#allocation11 + $0x6f8] sm:$0xff]  ;;  %v2990_v56 = vld [vmem:[#allocation11 + $0x720] sm:$0xff] }
 0x967   : > { %5132 = vmatprep.subr.bf16.mxu1 %v5131_v60  ;;  %v2932_v60 = vld [vmem:[#allocation11 + $0x550] sm:$0xff]  ;;  %v5183_v0 = vpack.c.bf16 %v2990_v56, %v2985_v55  ;;  %v3033_v55 = vld [vmem:[#allocation11 + $0x878] sm:$0xff]  ;;  %v3038_v56 = vld [vmem:[#allocation11 + $0x8a0] sm:$0xff] }
 0x968   : > { %v5021_v63 = vpack.c.bf16 %v2937_v61, %v2932_v60  ;;  %v2982_v61 = vld [vmem:[#allocation11 + $0x6e0] sm:$0xff] }
 0x96a   : > { %5134 = vmatpush1.bf16.msra.mxu1 %v5133_v15  ;;  %v2943_v15 = vld [vmem:[#allocation11 + $0x5a8] sm:$0xff]  ;;  %5022 = vmatpush1.bf16.msra.mxu0 %v5021_v63  ;;  %v2984_v63 = vld [vmem:[#allocation11 + $0x6f0] sm:$0xff] }
 0x96b   : > { %5136 = vmatprep.subr.bf16.mxu1 %v5135_v1  ;;  %v2948_v1 = vld [vmem:[#allocation11 + $0x5d0] sm:$0xff] }
 0x96c   : > { %v5023_v2 = vpack.c.bf16 %v2948_v1, %v2943_v15  ;;  %v2989_v15 = vld [vmem:[#allocation11 + $0x718] sm:$0xff] }
 0x96d   : > { %v2993_v1 = vld [vmem:[#allocation11 + $0x738] sm:$0xff] }
 0x96e   : > { %5138 = vmatpush1.bf16.msra.mxu1 %v5137_v7  ;;  %v2942_v7 = vld [vmem:[#allocation11 + $0x5a0] sm:$0xff]  ;;  %5024 = vmatprep.subr.bf16.mxu0 %v5023_v2  ;;  %v2995_v2 = vld [vmem:[#allocation11 + $0x748] sm:$0xff] }
 0x96f   : > { %5140 = vmatprep.subr.bf16.mxu1 %v5139_v8  ;;  %v5167_v8 = vpack.c.bf16 %v2950_v5, %v2945_v3  ;;  %v5025_v14 = vpack.c.bf16 %v2947_v58, %v2942_v7  ;;  %v3000_v3 = vld [vmem:[#allocation11 + $0x770] sm:$0xff]  ;;  %v5041_v5 = vpack.c.bf16 %v2987_v62, %v2982_v61  ;;  %v5185_v7 = vpack.c.bf16 %v2989_v15, %v2984_v63  ;;  %v3034_v15 = vld [vmem:[#allocation11 + $0x880] sm:$0xff] }
 0x970   : > { %v2992_v58 = vld [vmem:[#allocation11 + $0x730] sm:$0xff]  ;;  %v5059_v62 = vpack.c.bf16 %v3038_v56, %v3033_v55  ;;  %v3074_v55 = vld [vmem:[#allocation11 + $0x9c0] sm:$0xff] }
 0x971   : > { %5026 = vmatpush1.bf16.msra.mxu0 %v5025_v14  ;;  %v5187_v14 = vpack.c.bf16 %v3000_v3, %v2995_v2  ;;  %v5045_v19 = vpack.c.bf16 %v2997_v9, %v2992_v58  ;;  %v3032_v63 = vld [vmem:[#allocation11 + $0x870] sm:$0xff]  ;;  %v3043_v2 = vld [vmem:[#allocation11 + $0x8c8] sm:$0xff] }
 0x972   : > { %5142 = vmatpush1.bf16.msra.mxu1 %v5141_v10  ;;  %v2953_v10 = vld [vmem:[#allocation11 + $0x5f8] sm:$0xff]  ;;  %v3048_v3 = vld [vmem:[#allocation11 + $0x8f0] sm:$0xff] }
 0x973   : > { %5144 = vmatprep.subr.bf16.mxu1 %v5143_v34  ;;  %v2958_v34 = vld [vmem:[#allocation11 + $0x620] sm:$0xff]  ;;  %v5063_v9 = vpack.c.bf16 %v3048_v3, %v3043_v2 }
 0x974   : > { %v5027_v38 = vpack.c.bf16 %v2958_v34, %v2953_v10  ;;  %v2999_v10 = vld [vmem:[#allocation11 + $0x768] sm:$0xff] }
 0x975   : > { %v3003_v34 = vld [vmem:[#allocation11 + $0x788] sm:$0xff] }
 0x976   : > { %5146 = vmatpush1.bf16.msra.mxu1 %v5145_v20  ;;  %v2952_v20 = vld [vmem:[#allocation11 + $0x5f0] sm:$0xff]  ;;  %5028 = vmatprep.subr.bf16.mxu0 %v5027_v38  ;;  %v3010_v38 = vld [vmem:[#allocation11 + $0x7c0] sm:$0xff] }
 0x977   : > { %5148 = vmatprep.subr.bf16.mxu1 %v5147_v21  ;;  %v2957_v21 = vld [vmem:[#allocation11 + $0x618] sm:$0xff] }
 0x978   : > { %v5029_v37 = vpack.c.bf16 %v2957_v21, %v2952_v20  ;;  %v5189_v20 = vpack.c.bf16 %v2999_v10, %v2994_v13  ;;  %v5047_v21 = vpack.c.bf16 %v3008_v17, %v3003_v34  ;;  %v3042_v13 = vld [vmem:[#allocation11 + $0x8c0] sm:$0xff]  ;;  %v3044_v10 = vld [vmem:[#allocation11 + $0x8d0] sm:$0xff]  ;;  %v3049_v17 = vld [vmem:[#allocation11 + $0x8f8] sm:$0xff] }
 0x97a   : > { %5150 = vmatpush1.bf16.msra.mxu1 %v5149_v29  ;;  %v2968_v29 = vld [vmem:[#allocation11 + $0x670] sm:$0xff]  ;;  %5030 = vmatpush1.bf16.msra.mxu0 %v5029_v37  ;;  %v3015_v37 = vld [vmem:[#allocation11 + $0x7e8] sm:$0xff] }
 0x97b   : > { %5152 = vmatprep.subr.bf16.mxu1 %v5151_v30  ;;  %v2965_v30 = vld [vmem:[#allocation11 + $0x658] sm:$0xff]  ;;  %v5031_v36 = vpack.c.bf16 %v2968_v29, %v2963_v28 }
 0x97c   : > { %v5175_v40 = vpack.c.bf16 %v2970_v32, %v2965_v30  ;;  %v3009_v29 = vld [vmem:[#allocation11 + $0x7b8] sm:$0xff]  ;;  %v3018_v32 = vld [vmem:[#allocation11 + $0x800] sm:$0xff] }
 0x97d   : > { %5032 = vmatprep.subr.bf16.mxu0 %v5031_v36  ;;  %v3013_v30 = vld [vmem:[#allocation11 + $0x7d8] sm:$0xff] }
 0x97e   : > { %5154 = vmatpush1.bf16.msra.mxu1 %v5153_v33  ;;  %v2962_v33 = vld [vmem:[#allocation11 + $0x640] sm:$0xff] }
 0x97f   : > { %5156 = vmatprep.subr.bf16.mxu1 %v5155_v39  ;;  %v2967_v39 = vld [vmem:[#allocation11 + $0x668] sm:$0xff] }
 0x980   : > { %v5033_v45 = vpack.c.bf16 %v2967_v39, %v2962_v33  ;;  %v5193_v33 = vpack.c.bf16 %v3009_v29, %v3004_v12  ;;  %v5051_v39 = vpack.c.bf16 %v3018_v32, %v3013_v30  ;;  %v3052_v12 = vld [vmem:[#allocation11 + $0x910] sm:$0xff]  ;;  %v3054_v29 = vld [vmem:[#allocation11 + $0x920] sm:$0xff]  ;;  %v3059_v32 = vld [vmem:[#allocation11 + $0x948] sm:$0xff] }
 0x982   : > { %5158 = vmatpush1.bf16.msra.mxu1 %v5157_v41  ;;  %v2969_v41 = vld [vmem:[#allocation11 + $0x678] sm:$0xff]  ;;  %5034 = vmatpush1.bf16.msra.mxu0 %v5033_v45 }
 0x983   : > { %5160 = vmatprep.subr.bf16.mxu1 %v5159_v48  ;;  %v5177_v46 = vpack.c.bf16 %v2969_v41, %v2964_v35  ;;  %v2972_v48 = vld [vmem:[#allocation11 + $0x690] sm:$0xff]  ;;  %5036 = vmatprep.subr.bf16.mxu0 %v5035_v47  ;;  %v3014_v41 = vld [vmem:[#allocation11 + $0x7e0] sm:$0xff]  ;;  %v3025_v45 = vld [vmem:[#allocation11 + $0x838] sm:$0xff] }
 0x984   : > { %v5037_v57 = vpack.c.bf16 %v2977_v51, %v2972_v48  ;;  %v3012_v35 = vld [vmem:[#allocation11 + $0x7d0] sm:$0xff]  ;;  %v5197_v48 = vpack.c.bf16 %v3019_v43, %v3014_v41  ;;  %v5055_v51 = vpack.c.bf16 %v3028_v23, %v3023_v44  ;;  %v3062_v41 = vld [vmem:[#allocation11 + $0x960] sm:$0xff]  ;;  %v3069_v23 = vld [vmem:[#allocation11 + $0x998] sm:$0xff] }
 0x985   : > { %3403 = vmatmul.mubr.f32.vlgmr.msra.gmra.mrb[16].mxu1 %v6298_v24  ;;  %v3064_v43 = vld [vmem:[#allocation11 + $0x970] sm:$0xff] }
 0x986   : > { %5162 = vmatpush1.bf16.msra.mxu1 %v5161_v25  ;;  %v2983_v25 = vld [vmem:[#allocation11 + $0x6e8] sm:$0xff]  ;;  %5038 = vmatpush1.bf16.msra.mxu0 %v5037_v57 }
 0x987   : > { %5164 = vmatprep.subr.bf16.mxu1 %v5163_v59  ;;  %v5181_v59 = vpack.c.bf16 %v2979_v53, %v2974_v52  ;;  %v5039_v60 = vpack.c.bf16 %v2988_v54, %v2983_v25  ;;  %v3022_v52 = vld [vmem:[#allocation11 + $0x820] sm:$0xff]  ;;  %v3024_v53 = vld [vmem:[#allocation11 + $0x830] sm:$0xff]  ;;  %v3029_v54 = vld [vmem:[#allocation11 + $0x858] sm:$0xff] }
 0x988   : > { %v3035_v57 = vld [vmem:[#allocation11 + $0x888] sm:$0xff]  ;;  %v5201_v61 = vpack.c.bf16 %v3029_v54, %v3024_v53  ;;  %v3077_v54 = vld [vmem:[#allocation11 + $0x9d8] sm:$0xff] }
 0x989   : > { %5040 = vmatprep.subr.bf16.mxu0 %v5039_v60 }
 0x98a   : > { %5166 = vmatpush1.bf16.msra.mxu1 %v5165_v26  ;;  %v2998_v26 = vld [vmem:[#allocation11 + $0x760] sm:$0xff]  ;;  %5042 = vmatpush1.bf16.msra.mxu0 %v5041_v5  ;;  %v3045_v5 = vld [vmem:[#allocation11 + $0x8d8] sm:$0xff] }
 0x98b   : > { %5168 = vmatprep.subr.bf16.mxu1 %v5167_v8  ;;  %v5043_v8 = vpack.c.bf16 %v2998_v26, %v2993_v1  ;;  %v3039_v26 = vld [vmem:[#allocation11 + $0x8a8] sm:$0xff] }
 0x98c   : > { %v5205_v58 = vpack.c.bf16 %v3039_v26, %v3034_v15 }
 0x98d   : > { %5044 = vmatprep.subr.bf16.mxu0 %v5043_v8 }
 0x98e   : > { %5170 = vmatpush1.bf16.msra.mxu1 %v5169_v18  ;;  %v3005_v18 = vld [vmem:[#allocation11 + $0x798] sm:$0xff]  ;;  %5046 = vmatpush1.bf16.msra.mxu0 %v5045_v19  ;;  %v3055_v19 = vld [vmem:[#allocation11 + $0x928] sm:$0xff] }
 0x98f   : > { %5172 = vmatprep.subr.bf16.mxu1 %v5171_v22  ;;  %v3002_v22 = vld [vmem:[#allocation11 + $0x780] sm:$0xff]  ;;  %v5191_v28 = vpack.c.bf16 %v3010_v38, %v3005_v18  ;;  %5048 = vmatprep.subr.bf16.mxu0 %v5047_v21  ;;  %v3053_v18 = vld [vmem:[#allocation11 + $0x918] sm:$0xff] }
 0x990   : > { %v5049_v36 = vpack.c.bf16 %v3007_v31, %v3002_v22  ;;  %v3058_v38 = vld [vmem:[#allocation11 + $0x940] sm:$0xff]  ;;  %v5209_v22 = vpack.c.bf16 %v3049_v17, %v3044_v10  ;;  %v3093_v10 = vld [vmem:[#allocation11 + $0xa58] sm:$0xff] }
 0x991   : > { %v5067_v31 = vpack.c.bf16 %v3058_v38, %v3053_v18  ;;  %v3098_v17 = vld [vmem:[#allocation11 + $0xa80] sm:$0xff]  ;;  %v3095_v18 = vld [vmem:[#allocation11 + $0xa68] sm:$0xff]  ;;  %v3100_v38 = vld [vmem:[#allocation11 + $0xa90] sm:$0xff] }
 0x992   : > { %5174 = vmatpush1.bf16.msra.mxu1 %v5173_v11  ;;  %v3020_v11 = vld [vmem:[#allocation11 + $0x810] sm:$0xff]  ;;  %5050 = vmatpush1.bf16.msra.mxu0 %v5049_v36  ;;  %v3065_v36 = vld [vmem:[#allocation11 + $0x978] sm:$0xff] }
 0x993   : > { %5176 = vmatprep.subr.bf16.mxu1 %v5175_v40  ;;  %v3017_v40 = vld [vmem:[#allocation11 + $0x7f8] sm:$0xff]  ;;  %v5195_v42 = vpack.c.bf16 %v3020_v11, %v3015_v37  ;;  %5052 = vmatprep.subr.bf16.mxu0 %v5051_v39  ;;  %v3063_v37 = vld [vmem:[#allocation11 + $0x968] sm:$0xff]  ;;  %v3068_v11 = vld [vmem:[#allocation11 + $0x990] sm:$0xff] }
 0x994   : > { %v5053_v47 = vpack.c.bf16 %v3017_v40, %v3012_v35  ;;  %v5213_v35 = vpack.c.bf16 %v3059_v32, %v3054_v29  ;;  %v5071_v40 = vpack.c.bf16 %v3068_v11, %v3063_v37  ;;  %v5083_v29 = vpack.c.bf16 %v3098_v17, %v3093_v10  ;;  %v3094_v32 = vld [vmem:[#allocation11 + $0xa60] sm:$0xff]  ;;  %v3099_v37 = vld [vmem:[#allocation11 + $0xa88] sm:$0xff]  ;;  %v2776_v10 = vld [vmem:[#allocation11 + $0x70] sm:$0xff] }
 0x995   : > { %v3103_v11 = vld [vmem:[#allocation11 + $0xaa8] sm:$0xff]  ;;  %v2936_v17 = vld [vmem:[#allocation11 + $0x570] sm:$0xff] }
 0x996   : > { %5178 = vmatpush1.bf16.msra.mxu1 %v5177_v46  ;;  %v3030_v46 = vld [vmem:[#allocation11 + $0x860] sm:$0xff]  ;;  %5054 = vmatpush1.bf16.msra.mxu0 %v5053_v47  ;;  %v3075_v47 = vld [vmem:[#allocation11 + $0x9c8] sm:$0xff] }
 0x997   : > { %5180 = vmatprep.subr.bf16.mxu1 %v5179_v16  ;;  %v3027_v16 = vld [vmem:[#allocation11 + $0x848] sm:$0xff]  ;;  %v5199_v25 = vpack.c.bf16 %v3030_v46, %v3025_v45  ;;  %5056 = vmatprep.subr.bf16.mxu0 %v5055_v51  ;;  %v3073_v45 = vld [vmem:[#allocation11 + $0x9b8] sm:$0xff]  ;;  %v3078_v46 = vld [vmem:[#allocation11 + $0x9e0] sm:$0xff] }
 0x998   : > { %v5057_v60 = vpack.c.bf16 %v3027_v16, %v3022_v52  ;;  %v5217_v52 = vpack.c.bf16 %v3069_v23, %v3064_v43  ;;  %v5075_v16 = vpack.c.bf16 %v3078_v46, %v3073_v45  ;;  %v3109_v23 = vld [vmem:[#allocation11 + $0xad8] sm:$0xff]  ;;  %v3118_v46 = vld [vmem:[#allocation11 + $0xb20] sm:$0xff] }
 0x999   : > { %v3113_v45 = vld [vmem:[#allocation11 + $0xaf8] sm:$0xff] }
 0x99a   : > { %5182 = vmatpush1.bf16.msra.mxu1 %v5181_v59  ;;  %v3040_v59 = vld [vmem:[#allocation11 + $0x8b0] sm:$0xff]  ;;  %5058 = vmatpush1.bf16.msra.mxu0 %v5057_v60  ;;  %v3083_v60 = vld [vmem:[#allocation11 + $0xa08] sm:$0xff] }
 0x99b   : > { %5184 = vmatprep.subr.bf16.mxu1 %v5183_v0  ;;  %v3037_v0 = vld [vmem:[#allocation11 + $0x898] sm:$0xff]  ;;  %v5203_v1 = vpack.c.bf16 %v3040_v59, %v3035_v57  ;;  %5060 = vmatprep.subr.bf16.mxu0 %v5059_v62  ;;  %v3079_v57 = vld [vmem:[#allocation11 + $0x9e8] sm:$0xff] }
 0x99c   : > { %v5061_v8 = vpack.c.bf16 %v3037_v0, %v3032_v63  ;;  %v5221_v59 = vpack.c.bf16 %v3079_v57, %v3074_v55  ;;  %v3085_v62 = vld [vmem:[#allocation11 + $0xa18] sm:$0xff]  ;;  %v3090_v0 = vld [vmem:[#allocation11 + $0xa40] sm:$0xff] }
 0x99d   : > { %v5223_v15 = vpack.c.bf16 %v3090_v0, %v3085_v62  ;;  %v3114_v55 = vld [vmem:[#allocation11 + $0xb00] sm:$0xff] }
 0x99e   : > { %5186 = vmatpush1.bf16.msra.mxu1 %v5185_v7  ;;  %v3050_v7 = vld [vmem:[#allocation11 + $0x900] sm:$0xff]  ;;  %5062 = vmatpush1.bf16.msra.mxu0 %v5061_v8 }
 0x99f   : > { %5188 = vmatprep.subr.bf16.mxu1 %v5187_v14  ;;  %v3047_v14 = vld [vmem:[#allocation11 + $0x8e8] sm:$0xff]  ;;  %v5207_v34 = vpack.c.bf16 %v3050_v7, %v3045_v5  ;;  %5064 = vmatprep.subr.bf16.mxu0 %v5063_v9  ;;  %v2846_v57 = vld [vmem:[#allocation11 + $0x2a0] sm:$0xff] }
 0x9a0   : > { %v5065_v21 = vpack.c.bf16 %v3047_v14, %v3042_v13  ;;  %v3087_v9 = vld [vmem:[#allocation11 + $0xa28] sm:$0xff]  ;;  %v3084_v13 = vld [vmem:[#allocation11 + $0xa10] sm:$0xff]  ;;  %v3089_v14 = vld [vmem:[#allocation11 + $0xa38] sm:$0xff] }
 0x9a2   : > { %5190 = vmatpush1.bf16.msra.mxu1 %v5189_v20  ;;  %v3060_v20 = vld [vmem:[#allocation11 + $0x950] sm:$0xff]  ;;  %5066 = vmatpush1.bf16.msra.mxu0 %v5065_v21 }
 0x9a3   : > { %5192 = vmatprep.subr.bf16.mxu1 %v5191_v28  ;;  %v3057_v28 = vld [vmem:[#allocation11 + $0x938] sm:$0xff]  ;;  %v5211_v30 = vpack.c.bf16 %v3060_v20, %v3055_v19  ;;  %5068 = vmatprep.subr.bf16.mxu0 %v5067_v31 }
 0x9a4   : > { %v5069_v39 = vpack.c.bf16 %v3057_v28, %v3052_v12  ;;  %v3097_v31 = vld [vmem:[#allocation11 + $0xa78] sm:$0xff] }
 0x9a6   : > { %5194 = vmatpush1.bf16.msra.mxu1 %v5193_v33  ;;  %v3070_v33 = vld [vmem:[#allocation11 + $0x9a0] sm:$0xff]  ;;  %5070 = vmatpush1.bf16.msra.mxu0 %v5069_v39 }
 0x9a7   : > { %5196 = vmatprep.subr.bf16.mxu1 %v5195_v42  ;;  %v3067_v42 = vld [vmem:[#allocation11 + $0x988] sm:$0xff]  ;;  %v5215_v44 = vpack.c.bf16 %v3070_v33, %v3065_v36  ;;  %5072 = vmatprep.subr.bf16.mxu0 %v5071_v40  ;;  %v3108_v36 = vld [vmem:[#allocation11 + $0xad0] sm:$0xff]  ;;  %v3105_v33 = vld [vmem:[#allocation11 + $0xab8] sm:$0xff] }
 0x9a8   : > { %v5073_v51 = vpack.c.bf16 %v3067_v42, %v3062_v41  ;;  %v3110_v39 = vld [vmem:[#allocation11 + $0xae0] sm:$0xff]  ;;  %v3107_v41 = vld [vmem:[#allocation11 + $0xac8] sm:$0xff]  ;;  %v5087_v42 = vpack.c.bf16 %v3108_v36, %v3103_v11 }
 0x9a9   : > { %v3102_v40 = vld [vmem:[#allocation11 + $0xaa0] sm:$0xff]  ;;  %v5231_v43 = vpack.c.bf16 %v3110_v39, %v3105_v33  ;;  %v2951_v33 = vld [vmem:[#allocation11 + $0x5e8] sm:$0xff]  ;;  %v2876_v39 = vld [vmem:[#allocation11 + $0x390] sm:$0xff] }
 0x9aa   : > { %5198 = vmatpush1.bf16.msra.mxu1 %v5197_v48  ;;  %v3080_v48 = vld [vmem:[#allocation11 + $0x9f0] sm:$0xff]  ;;  %5074 = vmatpush1.bf16.msra.mxu0 %v5073_v51  ;;  %v5089_v51 = vpack.c.bf16 %v3107_v41, %v3102_v40  ;;  %v2946_v11 = vld [vmem:[#allocation11 + $0x5c0] sm:$0xff]  ;;  %v3041_v40 = vld [vmem:[#allocation11 + $0x8b8] sm:$0xff] }
 0x9ab   : > { %5200 = vmatprep.subr.bf16.mxu1 %v5199_v25  ;;  %v5219_v53 = vpack.c.bf16 %v3080_v48, %v3075_v47  ;;  %5076 = vmatprep.subr.bf16.mxu0 %v5075_v16  ;;  %v3072_v25 = vld [vmem:[#allocation11 + $0x9b0] sm:$0xff]  ;;  %v3115_v47 = vld [vmem:[#allocation11 + $0xb08] sm:$0xff] }
 0x9ac   : > { %v5077_v56 = vpack.c.bf16 %v3077_v54, %v3072_v25  ;;  %v3120_v48 = vld [vmem:[#allocation11 + $0xb30] sm:$0xff]  ;;  %v5091_v25 = vpack.c.bf16 %v3118_v46, %v3113_v45  ;;  %v2961_v45 = vld [vmem:[#allocation11 + $0x638] sm:$0xff]  ;;  %v2886_v46 = vld [vmem:[#allocation11 + $0x3e0] sm:$0xff] }
 0x9ad   : > { %v3112_v16 = vld [vmem:[#allocation11 + $0xaf0] sm:$0xff]  ;;  %v5235_v54 = vpack.c.bf16 %v3120_v48, %v3115_v47  ;;  %v2891_v47 = vld [vmem:[#allocation11 + $0x408] sm:$0xff]  ;;  %v3046_v48 = vld [vmem:[#allocation11 + $0x8e0] sm:$0xff] }
 0x9ae   : > { %5202 = vmatpush1.bf16.msra.mxu1 %v5201_v61  ;;  %5078 = vmatpush1.bf16.msra.mxu0 %v5077_v56  ;;  %v3088_v61 = vld [vmem:[#allocation11 + $0xa30] sm:$0xff]  ;;  %v3119_v56 = vld [vmem:[#allocation11 + $0xb28] sm:$0xff] }
 0x9af   : > { %5204 = vmatprep.subr.bf16.mxu1 %v5203_v1  ;;  %v5079_v63 = vpack.c.bf16 %v3088_v61, %v3083_v60  ;;  %v3006_v60 = vld [vmem:[#allocation11 + $0x7a0] sm:$0xff]  ;;  %v3011_v61 = vld [vmem:[#allocation11 + $0x7c8] sm:$0xff] }
 0x9b1   : > { %5080 = vmatprep.subr.bf16.mxu0 %v5079_v63  ;;  %v5237_v63 = vpack.c.bf16 %v3119_v56, %v3114_v55  ;;  %v2966_v55 = vld [vmem:[#allocation11 + $0x660] sm:$0xff] }
 0x9b2   : > { %5206 = vmatpush1.bf16.msra.mxu1 %v5205_v58  ;;  %v3082_v58 = vld [vmem:[#allocation11 + $0xa00] sm:$0xff] }
 0x9b3   : > { %5208 = vmatprep.subr.bf16.mxu1 %v5207_v34  ;;  %v5081_v21 = vpack.c.bf16 %v3087_v9, %v3082_v58  ;;  %v3016_v58 = vld [vmem:[#allocation11 + $0x7f0] sm:$0xff]  ;;  %v3021_v9 = vld [vmem:[#allocation11 + $0x818] sm:$0xff] }
 0x9b6   : > { %5210 = vmatpush1.bf16.msra.mxu1 %v5209_v22  ;;  %v5225_v22 = vpack.c.bf16 %v3089_v14, %v3084_v13 }
 0x9b7   : > { %5212 = vmatprep.subr.bf16.mxu1 %v5211_v30  ;;  %v5227_v30 = vpack.c.bf16 %v3100_v38, %v3095_v18  ;;  %v5275_v38 = vpack.c.bf16 %v3021_v9, %v3016_v58  ;;  %v2911_v58 = vld [vmem:[#allocation11 + $0x4a8] sm:$0xff]  ;;  %v3066_v9 = vld [vmem:[#allocation11 + $0x980] sm:$0xff] }
 0x9ba   : > { %5214 = vmatpush1.bf16.msra.mxu1 %v5213_v35  ;;  %v5229_v35 = vpack.c.bf16 %v3099_v37, %v3094_v32  ;;  %v2786_v32 = vld [vmem:[#allocation11 + $0xc0] sm:$0xff]  ;;  %v2791_v37 = vld [vmem:[#allocation11 + $0xe8] sm:$0xff] }
 0x9bb   : > { %5216 = vmatprep.subr.bf16.mxu1 %v5215_v44  ;;  %v3104_v44 = vld [vmem:[#allocation11 + $0xab0] sm:$0xff]  ;;  %v5249_v41 = vpack.c.bf16 %v2791_v37, %v2786_v32 }
 0x9bc   : > { %v2836_v37 = vld [vmem:[#allocation11 + $0x250] sm:$0xff] }
 0x9be   : > { %5218 = vmatpush1.bf16.msra.mxu1 %v5217_v52  ;;  %v5233_v52 = vpack.c.bf16 %v3109_v23, %v3104_v44  ;;  %v2956_v44 = vld [vmem:[#allocation11 + $0x610] sm:$0xff] }
 0x9bf   : > { %5220 = vmatprep.subr.bf16.mxu1 %v5219_v53  ;;  %v3117_v53 = vld [vmem:[#allocation11 + $0xb18] sm:$0xff] }
 0x9c0   : > { %v5093_v62 = vpack.c.bf16 %v3117_v53, %v3112_v16  ;;  %v5285_v16 = vpack.c.bf16 %v2961_v45, %v2956_v44  ;;  %v5255_v53 = vpack.c.bf16 %v2891_v47, %v2886_v46  ;;  %v3106_v44 = vld [vmem:[#allocation11 + $0xac0] sm:$0xff]  ;;  %v3116_v46 = vld [vmem:[#allocation11 + $0xb10] sm:$0xff]  ;;  %v3121_v47 = vld [vmem:[#allocation11 + $0xb38] sm:$0xff] }
 0x9c2   : > { %5222 = vmatpush1.bf16.msra.mxu1 %v5221_v59  ;;  %v2851_v59 = vld [vmem:[#allocation11 + $0x2c8] sm:$0xff] }
 0x9c3   : > { %5224 = vmatprep.subr.bf16.mxu1 %v5223_v15  ;;  %v5239_v0 = vpack.c.bf16 %v2851_v59, %v2846_v57  ;;  %v5271_v15 = vpack.c.bf16 %v3011_v61, %v3006_v60  ;;  %v2971_v57 = vld [vmem:[#allocation11 + $0x688] sm:$0xff]  ;;  %v2896_v59 = vld [vmem:[#allocation11 + $0x430] sm:$0xff]  ;;  %v2901_v60 = vld [vmem:[#allocation11 + $0x458] sm:$0xff] }
 0x9c4   : > { %v3056_v61 = vld [vmem:[#allocation11 + $0x930] sm:$0xff] }
 0xa18   : > { %v2728_v1 = vpop.f32.mrb[10].mxu1 }
 0xa19   : > { %v4341_v26 = vpop.f32.mrb[11].mxu1 }
 0xa1a   : > { %v2771_v26 = vld [vmem:[#allocation11 + $0x48] sm:$0xff] }
 0xa1c   : > { %v2733_v2 = vpop.f32.mrb[12].mxu1 }
 0xa1d   : > { %v5459_v3 = vpack.i.bf16 %v6288_v6, %v2733_v2  ;;  %v4344_v5 = vpop.f32.mrb[13].mxu1  ;;  %v3092_v6 = vld [vmem:[#allocation11 + $0xa50] sm:$0xff]  ;;  %v2926_v2 = vld [vmem:[#allocation11 + $0x520] sm:$0xff] }
 0xa1e   : > { %v2856_v5 = vld [vmem:[#allocation11 + $0x2f0] sm:$0xff] }
 0xa1f   : > { %5460 = vrot.lane.b32.xlu1 %v5459_v3, %s5783_s27  ;;  %v2931_v3 = vld [vmem:[#allocation11 + $0x548] sm:$0xff] }
 0xa20   : > { %v6320_v7 = vpop.f32.mrb[14].mxu1  ;;  %v5273_v14 = vpack.c.bf16 %v2931_v3, %v2926_v2  ;;  %v2976_v2 = vld [vmem:[#allocation11 + $0x6b0] sm:$0xff] }
 0xa21   : > { %v4347_v8 = vpop.f32.mrb[15].mxu1 }
 0xa22   : > { %v2861_v8 = vld [vmem:[#allocation11 + $0x318] sm:$0xff] }
 0xa23   : > { %v5243_v18 = vpack.c.bf16 %v2861_v8, %v2856_v5  ;;  %v2981_v5 = vld [vmem:[#allocation11 + $0x6d8] sm:$0xff]  ;;  %v2906_v8 = vld [vmem:[#allocation11 + $0x480] sm:$0xff] }
 0xa91   : > { %v5461_v34 = vpop.permute.xlu1 %5460 }
 0xa92   : > { %v5463_v19 = vunpack.i.h.bf16 %v5461_v34  ;;  %v5462_v20 = vunpack.i.l.bf16 %v5461_v34  ;;  %v2781_v34 = vld [vmem:[#allocation11 + $0x98] sm:$0xff] }
 0xa94   : > { %v6323_v12 = vsel %vm769_vm0, %v2728_v1, %v5462_v20  ;;  %v6327_v28 = vsel %vm769_vm0, %v6286_v4, %v5463_v19  ;;  %v5085_v4 = vpack.c.bf16 %v3097_v31, %v3092_v6  ;;  %v2766_v1 = vld [vmem:[#allocation11 + $0x20] sm:$0xff]  ;;  %v2941_v19 = vld [vmem:[#allocation11 + $0x598] sm:$0xff]  ;;  %v3031_v6 = vld [vmem:[#allocation11 + $0x868] sm:$0xff]  ;;  %v5245_v31 = vpack.c.bf16 %v2781_v34, %v2776_v10 }
 0xa95   : > { %3260 = vmatprep.mubr.f32.mxu0 %v6323_v12  ;;  %3473 = vmatprep.mubr.f32.mxu1 %v6323_v12  ;;  %v5241_v13 = vpack.c.bf16 %v2771_v26, %v2766_v1  ;;  %v2866_v20 = vld [vmem:[#allocation11 + $0x340] sm:$0xff]  ;;  %v2816_v1 = vld [vmem:[#allocation11 + $0x1b0] sm:$0xff]  ;;  %v2821_v26 = vld [vmem:[#allocation11 + $0x1d8] sm:$0xff]  ;;  %v5293_v10 = vpack.c.bf16 %v2981_v5, %v2976_v2  ;;  %v5263_v34 = vpack.c.bf16 %v2911_v58, %v2906_v8 }
 0xa96   : > { %3261 = vmatmul.mubr.f32.vlgmr.msra.gmra.mrb[38].mxu0 %v6327_v28  ;;  %3474 = vmatmul.mubr.f32.vlgmr.msra.gmra.mrb[16].mxu1 %v6327_v28 }
 0xa97   : > { %5082 = vmatpush1.bf16.msra.mxu0 %v5081_v21  ;;  %5226 = vmatpush1.bf16.msra.mxu1 %v5225_v22  ;;  %v2871_v21 = vld [vmem:[#allocation11 + $0x368] sm:$0xff]  ;;  %v3026_v22 = vld [vmem:[#allocation11 + $0x840] sm:$0xff] }
 0xa98   : > { %5084 = vmatprep.subr.bf16.mxu0 %v5083_v29  ;;  %5228 = vmatprep.subr.bf16.mxu1 %v5227_v30  ;;  %v5277_v29 = vpack.c.bf16 %v2941_v19, %v2936_v17  ;;  %v5247_v30 = vpack.c.bf16 %v2871_v21, %v2866_v20  ;;  %v5279_v36 = vpack.c.bf16 %v3031_v6, %v3026_v22  ;;  %v2826_v17 = vld [vmem:[#allocation11 + $0x200] sm:$0xff]  ;;  %v2991_v20 = vld [vmem:[#allocation11 + $0x728] sm:$0xff]  ;;  %v2916_v21 = vld [vmem:[#allocation11 + $0x4d0] sm:$0xff] }
 0xa99   : > { %3331 = vmatprep.mubr.f32.mxu0 %v5780_v49  ;;  %3544 = vmatprep.mubr.f32.mxu1 %v5780_v49  ;;  %v2921_v22 = vld [vmem:[#allocation11 + $0x4f8] sm:$0xff]  ;;  %v3076_v6 = vld [vmem:[#allocation11 + $0x9d0] sm:$0xff] }
 0xa9a   : > { %v5267_v32 = vpack.c.bf16 %v2921_v22, %v2916_v21 }
 0xa9b   : > { %5086 = vmatpush1.bf16.msra.mxu0 %v5085_v4  ;;  %5230 = vmatpush1.bf16.msra.mxu1 %v5229_v35  ;;  %v2881_v4 = vld [vmem:[#allocation11 + $0x3b8] sm:$0xff]  ;;  %v3036_v35 = vld [vmem:[#allocation11 + $0x890] sm:$0xff] }
 0xa9c   : > { %5088 = vmatprep.subr.bf16.mxu0 %v5087_v42  ;;  %5232 = vmatprep.subr.bf16.mxu1 %v5231_v43  ;;  %v5251_v42 = vpack.c.bf16 %v2881_v4, %v2876_v39  ;;  %v2801_v43 = vld [vmem:[#allocation11 + $0x138] sm:$0xff]  ;;  %v5283_v23 = vpack.c.bf16 %v3041_v40, %v3036_v35  ;;  %v3086_v40 = vld [vmem:[#allocation11 + $0xa20] sm:$0xff] }
 0xa9d   : > { %v3001_v39 = vld [vmem:[#allocation11 + $0x778] sm:$0xff] }
 0xa9f   : > { %5090 = vmatpush1.bf16.msra.mxu0 %v5089_v51  ;;  %5234 = vmatpush1.bf16.msra.mxu1 %v5233_v52  ;;  %v3051_v51 = vld [vmem:[#allocation11 + $0x908] sm:$0xff] }
 0xaa0   : > { %5092 = vmatprep.subr.bf16.mxu0 %v5091_v25  ;;  %5236 = vmatprep.subr.bf16.mxu1 %v5235_v54  ;;  %v2806_v25 = vld [vmem:[#allocation11 + $0x160] sm:$0xff]  ;;  %v2811_v54 = vld [vmem:[#allocation11 + $0x188] sm:$0xff]  ;;  %v5287_v56 = vpack.c.bf16 %v3051_v51, %v3046_v48 }
 0xaa3   : > { %5094 = vmatpush1.bf16.msra.mxu0 %v5093_v62  ;;  %5238 = vmatpush1.bf16.msra.mxu1 %v5237_v63  ;;  %v3061_v62 = vld [vmem:[#allocation11 + $0x958] sm:$0xff]  ;;  %v5257_v63 = vpack.c.bf16 %v2811_v54, %v2806_v25 }
 0xaa4   : > { %5240 = vmatprep.subr.bf16.mxu0 %v5239_v0  ;;  %5272 = vmatprep.subr.bf16.mxu1 %v5271_v15  ;;  %v5289_v0 = vpack.c.bf16 %v2971_v57, %v2966_v55  ;;  %v5259_v15 = vpack.c.bf16 %v2901_v60, %v2896_v59  ;;  %v5291_v3 = vpack.c.bf16 %v3061_v62, %v3056_v61 }
 0xaa6   : > { %3977 = vmatmul.mubr.msk.f32.vlgmr.msra.gmra.mrb[38].mxu0 %vm769_vm0, %v6320_v7  ;;  %3978 = vmatmul.mubr.msk.f32.vlgmr.msra.gmra.mrb[16].mxu1 %vm769_vm0, %v6320_v7 }
 0xaa7   : > { %5242 = vmatpush3.bf16.msra.mxu0 %v5241_v13  ;;  %3615 = vmatprep.mubr.f32.mxu0 %v6302_v27  ;;  %v5281_v27 = vpack.c.bf16 %v2951_v33, %v2946_v11  ;;  %v3071_v13 = vld [vmem:[#allocation11 + $0x9a8] sm:$0xff]  ;;  %v2841_v11 = vld [vmem:[#allocation11 + $0x278] sm:$0xff]  ;;  %v2996_v33 = vld [vmem:[#allocation11 + $0x750] sm:$0xff] }
 0xaa8   : > { %5274 = vmatpush3.bf16.msra.mxu1 %v5273_v14  ;;  %3685 = vmatprep.mubr.f32.mxu1 %v6323_v12  ;;  %v2796_v12 = vld [vmem:[#allocation11 + $0x110] sm:$0xff]  ;;  %v5261_v14 = vpack.c.bf16 %v2821_v26, %v2816_v1  ;;  %v5295_v19 = vpack.c.bf16 %v3071_v13, %v3066_v9  ;;  %v5269_v4 = vpack.c.bf16 %v2841_v11, %v2836_v37 }
 0xaa9   : > { %5244 = vmatprep.subr.bf16.mxu0 %v5243_v18  ;;  %5276 = vmatprep.subr.bf16.mxu1 %v5275_v38  ;;  %v5253_v52 = vpack.c.bf16 %v2801_v43, %v2796_v12  ;;  %v2831_v18 = vld [vmem:[#allocation11 + $0x228] sm:$0xff]  ;;  %v2986_v38 = vld [vmem:[#allocation11 + $0x700] sm:$0xff]  ;;  %v5301_v35 = vpack.c.bf16 %v3001_v39, %v2996_v33  ;;  %v3101_v12 = vld [vmem:[#allocation11 + $0xa98] sm:$0xff] }
 0xaab   : > { %5246 = vmatpush3.bf16.msra.mxu0 %v5245_v31  ;;  %v3081_v31 = vld [vmem:[#allocation11 + $0x9f8] sm:$0xff] }
 0xaac   : > { %5278 = vmatpush3.bf16.msra.mxu1 %v5277_v29  ;;  %5248 = vmatprep.subr.bf16.mxu0 %v5247_v30  ;;  %v5265_v29 = vpack.c.bf16 %v2831_v18, %v2826_v17  ;;  %v5297_v30 = vpack.c.bf16 %v2991_v20, %v2986_v38 }
 0xaad   : > { %5280 = vmatprep.subr.bf16.mxu1 %v5279_v36  ;;  %v5299_v36 = vpack.c.bf16 %v3081_v31, %v3076_v6 }
 0xaaf   : > { %5250 = vmatpush3.bf16.msra.mxu0 %v5249_v41  ;;  %v3091_v41 = vld [vmem:[#allocation11 + $0xa48] sm:$0xff] }
 0xab0   : > { %5282 = vmatpush3.bf16.msra.mxu1 %v5281_v27  ;;  %5252 = vmatprep.subr.bf16.mxu0 %v5251_v42  ;;  %v5304_v27 = vpack.c.bf16 %v3091_v41, %v3086_v40  ;;  %v3096_v42 = vld [vmem:[#allocation11 + $0xa70] sm:$0xff] }
 0xab1   : > { %5284 = vmatprep.subr.bf16.mxu1 %v5283_v23  ;;  %v5307_v43 = vpack.c.bf16 %v3101_v12, %v3096_v42  ;;  %v3111_v23 = vld [vmem:[#allocation11 + $0xae8] sm:$0xff] }
 0xab2   : > { %v5310_v45 = vpack.c.bf16 %v3111_v23, %v3106_v44 }
 0xab3   : > { %5254 = vmatpush3.bf16.msra.mxu0 %v5253_v52 }
 0xab4   : > { %5286 = vmatpush3.bf16.msra.mxu1 %v5285_v16  ;;  %5256 = vmatprep.subr.bf16.mxu0 %v5255_v53 }
 0xab5   : > { %5288 = vmatprep.subr.bf16.mxu1 %v5287_v56 }
 0xab7   : > { %5258 = vmatpush3.bf16.msra.mxu0 %v5257_v63 }
 0xab8   : > { %5290 = vmatpush3.bf16.msra.mxu1 %v5289_v0  ;;  %5260 = vmatprep.subr.bf16.mxu0 %v5259_v15 }
 0xab9   : > { %5292 = vmatprep.subr.bf16.mxu1 %v5291_v3 }
 0xabb   : > { %5262 = vmatpush3.bf16.msra.mxu0 %v5261_v14 }
 0xabc   : > { %5294 = vmatpush3.bf16.msra.mxu1 %v5293_v10  ;;  %5264 = vmatprep.subr.bf16.mxu0 %v5263_v34 }
 0xabd   : > { %5296 = vmatprep.subr.bf16.mxu1 %v5295_v19 }
 0xabf   : > { %5266 = vmatpush3.bf16.msra.mxu0 %v5265_v29 }
 0xac0   : > { %5298 = vmatpush3.bf16.msra.mxu1 %v5297_v30  ;;  %5268 = vmatprep.subr.bf16.mxu0 %v5267_v32 }
 0xac1   : > { %5300 = vmatprep.subr.bf16.mxu1 %v5299_v36 }
 0xac3   : > { %5270 = vmatpush3.bf16.msra.mxu0 %v5269_v4 }
 0xac4   : > { %5302 = vmatpush3.bf16.msra.mxu1 %v5301_v35  ;;  %5303 = vmatprep.subr.bf16.mxu0 %v5781_v50 }
 0xac6   : > { %3616 = vmatmul.mubr.f32.vlgmr.msra.gmra.mrb[40].mxu0 %v6298_v24  ;;  %v5313_v24 = vpack.c.bf16 %v3121_v47, %v3116_v46 }
 0xac7   : > { %3686 = vmatmul.mubr.f32.vlgmr.msra.gmra.mrb[18].mxu1 %v6327_v28  ;;  %5305 = vmatpush3.bf16.msra.mxu0 %v5304_v27 }
 0xac8   : > { %5306 = vmatprep.subr.bf16.mxu0 %v5781_v50  ;;  %4364 = vmatprep.mubr.msk.f32.mxu0 %vm5782_vm1, %v5780_v49 }
 0xacb   : > { %5308 = vmatpush3.bf16.msra.mxu0 %v5307_v43 }
 0xacc   : > { %5309 = vmatprep.subr.bf16.mxu0 %v5781_v50 }
 0xacf   : > { %5311 = vmatpush3.bf16.msra.mxu0 %v5310_v45 }
 0xad0   : > { %5312 = vmatprep.subr.bf16.mxu0 %v5781_v50 }
 0xad3   : > { %5314 = vmatpush3.bf16.msra.mxu0 %v5313_v24 }
 0xad6   : > { %4365 = vmatmul.mubr.msk.f32.vlgmr.msra.gmra.mrb[42].mxu0 %vm769_vm0, %v6320_v7 }
 0xb79   : > { %v3333_v28 = vpop.f32.mrb[38].mxu0  ;;  %v3546_v48 = vpop.f32.mrb[16].mxu1 }
 0xb7a   : > { %3761 = vst [vmem:[%s398_s29] sm:$0xff] %v3333_v28  ;;  %3763 = vst [vmem:[%s398_s29 + $0x10] sm:$0xff] %v3546_v48  ;;  %v3335_v49 = vpop.f32.mrb[39].mxu0  ;;  %v3548_v51 = vpop.f32.mrb[17].mxu1 }
 0xb7b   : > { %3762 = vst [vmem:[%s398_s29 + $0x8] sm:$0xff] %v3335_v49  ;;  %3764 = vst [vmem:[%s398_s29 + $0x18] sm:$0xff] %v3548_v51 }
 0xb99   : > { %v4197_v52 = vpop.f32.mrb[40].mxu0 }
 0xb9a   : > { %v4232_v16 = vpop.f32.mrb[18].mxu1  ;;  %v4198_v53 = vpop.f32.mrb[41].mxu0 }
 0xb9b   : > { %v4199_v50 = vadd.f32 %v4198_v53, %v4197_v52  ;;  %v4233_v25 = vpop.f32.mrb[19].mxu1 }
 0xb9c   : > { %v4234_v54 = vadd.f32 %v4233_v25, %v4232_v16 }
 0xb9e   : > { %v3688_v55 = vadd.f32 %v4234_v54, %v4199_v50 }
 0xba9   : > { %v3757_v7 = vpop.f32.mrb[42].mxu0 }
 0xbaa   : > { %v3758_v56 = vadd.f32 %v3757_v7, %v3688_v55  ;;  %v4366_v57 = vpop.f32.mrb[43].mxu0 }
 0xbac   : > { %3765 = vst.msk [vmem:[%s398_s29 + $0x20] sm:$0xff] %vm769_vm0, %v3758_v56 }
 0xbad   : > { %5687 = shalt.err (!%p5684_p12)
}
 0xbae   : > { %s5688_s8 = scalar_lea.hbm %s6356_s6, 640  ;;  %s5692_s3 = scalar_lea.hbm %s6472_s1, 1280 }
 0xbaf   : > { %p5689_p8 = scmp.ne.s32.totalorder %s6356_s6, %s5688_s8  ;;  %p5693_p5 = scmp.lt.u32.totalorder %s6356_s6, %s6472_s1 }
 0xbb0   : > { %p5694_p9 = scmp.lt.u32.totalorder %s5692_s3, %s5688_s8  ;;  %p5696_p4 = scmp.lt.u32.totalorder %s5688_s8, %s6356_s6 }
 0xbb1   : > { %p5690_p11 = pnand %p5689_p8, %p6473_p7 }
 0xbb2   : > { %p5695_p2 = por %p5694_p9, %p5693_p5 }
 0xbb3   : > { %p5691_p13 = pneg %p5690_p11 }
 0xbb4   : > { %p5697_p3 = por %p5696_p4, %p5695_p2 }
 0xbb6   : > { %p5698_p10 = pnand %p5697_p3, %p5691_p13 }
 0xbb8   : > { %5701 = shalt.err (!%p5698_p10)
}
 0xbb9   : > { %5361 = dma.vmem_to_hbm [thread:$0]  (%p6473_p7), %s6358_s30, 640, %s6356_s6, %s3767_s21  }
 0xbba PF: > { %s6474_s7 = sld [smem:[#allocation19_spill]]  ;;  %s6475_s19 = sld [smem:[#allocation22_spill]] }
 0xbbb   : > { %s6476_s20 = sld [smem:[#allocation21_spill]] }
 0xbc0   : > { %s3795_s10 = sand.u32 1, %s6474_s7   ;;  %p6477_p1 = scmp.ne.s32.totalorder %s6475_s19, 0 }
 0xbc1   : > { %p6478_p6 = scmp.ge.s32.totalorder %s6476_s20, 2  ;;  %s3796_s27 = scalar_lea.sflag [#allocation4], %s3795_s10 }
 0xbc3   : > { %p5384_p0 = pnand %p6478_p6, %p6477_p1 }
 0xbc5   : > { %5743 = dma.done.wait (!%p5384_p0), %s3796_s27, 640  }
 0xbc6   : > { %5745 = vsyncadd (!%p5384_p0), %s3796_s27, 4294966656  ;;  %s27_s26 = sadd.s32 1, %s6476_s20   ;;  %s6479_s29 = sld [smem:[#allocation20_spill]] }
 0xbc7   : > { %p24_p12 = scmp.ge.s32.totalorder %s27_s26, 4   ;;  %s6480_s23 = sld [smem:[#allocation24_spill]] }
 0xbc8   : > { %s6481_s15 = sld [smem:[#allocation23_spill]]  ;;  %s6482_s21 = smov %s5752_s22 }
 0xbc9   : > { %s6484_s24 = smov %s5764_s25  ;;  %26 = sbr.rel (!%p24_p12) target bundleno = 14 (0xe), region = 125 }
 0xbcc   : > { %s6483_s22 = smov %s6479_s29 }
 0xbce   : > { %s6485_s25 = smov %s6481_s15 }
 0xbd0   :  { %3801 = vsyncpa [#allocation3], 1 }
 0xbd1   :  { %3803 = vsyncpa [#allocation3 + $0x1], 1 }
 0xbd2   :  { %3804 = vsyncpa [#allocation6], 1 }
 0xbd3   :  { %3806 = vsyncpa [#allocation6 + $0x1], 1 }
 0xbd4   :  { %3807 = vsyncpa [#allocation9], 1 }
 0xbd5   :  { %3808 = vsyncpa [#allocation12], 1 }
 0xbd6   :  { %3809 = vsyncpa [#allocation4], 1 }
 0xbd7   :  { %3811 = vsyncpa [#allocation4 + $0x1], 1 }

</bundles_post_ra>
